<compile_context>
chip_gen: v6e
topology: v6e:2x2x1
jax: 0.10.0
libtpu: 0.0.40
codegen_flags: <defaults>
</compile_context>

<pallas_src>
import functools

import numpy as np
import jax
import jax.numpy as jnp
from jax import lax
from jax.experimental import pallas as pl
from jax.experimental.pallas import tpu as pltpu


# --------------------------------------------------------------------------
# BN folding: y = (x - mean)/sqrt(var+eps)*gamma + beta  ->  y = x*scale + bias
# --------------------------------------------------------------------------
def _bn_fold(gamma, beta, mean, var, eps=1e-5):
    scale = gamma / jnp.sqrt(var + eps)
    bias = beta - mean * scale
    return scale.astype(jnp.float32), bias.astype(jnp.float32)


# --------------------------------------------------------------------------
# Fused kernel: expand(1x1)+BN+ReLU6 -> depthwise KxK+BN+ReLU6 -> project(1x1)+BN
#               (+ residual).  One grid step == one image; all weights VMEM-resident.
# Layout: (channels on sublanes, flattened spatial on lanes).
# --------------------------------------------------------------------------
def _fused_block_kernel(x_ref, p_ref, s_ref, w1_ref, b1_ref, wdw_ref, b2_ref,
                        w2_ref, b3_ref, o_ref, *, K, Wp, L_acc, add_residual):
    f32 = jnp.float32
    x = x_ref[0].astype(f32)                                    # (Cin, H*W), lane-dense

    # ---- stage 1: 1x1 expand (BN scale folded into w1) + ReLU6 -------------
    # MXU matmul over the (tiny) Cin contraction; computed on the interior only.
    h1 = jnp.dot(w1_ref[...], x, preferred_element_type=f32)    # (hidden, H*W)
    h1 = jnp.clip(h1 + b1_ref[...], 0.0, 6.0)

    # Scatter into the zero-padded flattened spatial grid via a constant 0/1 matrix
    # on the MXU (replaces wrapper-side jnp.pad + interior-mask multiply).
    h1p = jnp.dot(h1, p_ref[...], preferred_element_type=f32)   # (hidden, Hp*Wp)

    # ---- stage 2: KxK depthwise conv (BN scale folded into w_dw) -----------
    # Dense conv on the padded grid: tap (kh,kw) is a static lane-offset slice of the
    # flattened activation; per-channel tap weight broadcasts along lanes (full-width VPU FMA).
    hidden = h1p.shape[0]
    acc2 = jnp.zeros((hidden, L_acc), f32)
    for kh in range(K):
        for kw in range(K):
            off = kh * Wp + kw
            tap = kh * K + kw
            acc2 = acc2 + h1p[:, off:off + L_acc] * wdw_ref[:, tap:tap + 1]

    # Select the stride-spaced valid output positions via a constant 0/1 matrix (MXU),
    # then bias + ReLU6 on the compact (hidden, Ho*Wo) result.
    a2 = jnp.dot(acc2, s_ref[...], preferred_element_type=f32)  # (hidden, Ho*Wo)
    h2 = jnp.clip(a2 + b2_ref[...], 0.0, 6.0)

    # ---- stage 3: 1x1 project (BN scale folded into w2) + residual ---------
    y = jnp.dot(w2_ref[...], h2, preferred_element_type=f32) + b3_ref[...]   # (Cout, Ho*Wo)
    if add_residual:
        y = y + x                                               # unpadded input ref, aligned
    o_ref[0] = y.astype(o_ref.dtype)                            # lane-dense store


# --------------------------------------------------------------------------
# Full block wrapper (PyTorch-like NCHW in/out)
# --------------------------------------------------------------------------
def super_mobile_conv_block(x_nchw, w1, s1, b1, w_dw, s2, b2, w2, s3, b3,
                            *, stride, pad):
    N, Cin, H, W = x_nchw.shape
    hidden = w1.shape[1]
    Cout = w2.shape[1]
    K = w_dw.shape[0]
    Hp, Wp = H + 2 * pad, W + 2 * pad
    Ho = (Hp - K) // stride + 1
    Wo = (Wp - K) // stride + 1
    add_res = (Cin == Cout) and (Ho == H) and (Wo == W)

    # Width of the dense depthwise accumulator (covers all valid output positions).
    max_off = (K - 1) * Wp + (K - 1)
    L_acc = Hp * Wp - max_off

    # Fold BN scales into the conv weights (eval-mode BN); only folded biases reach the kernel.
    w1f = (w1 * s1[None, :]).T.astype(jnp.float32)                       # (hidden, Cin)
    wdwf = jnp.transpose(w_dw * s2[None, None, :], (2, 0, 1))            # (hidden, K, K)
    wdwf = wdwf.reshape(hidden, K * K).astype(jnp.float32)               # (hidden, K*K)
    w2f = (w2 * s3[None, :]).T.astype(jnp.float32)                       # (Cout, hidden)
    b1f = b1.reshape(hidden, 1).astype(jnp.float32)
    b2f = b2.reshape(hidden, 1).astype(jnp.float32)
    b3f = b3.reshape(Cout, 1).astype(jnp.float32)

    # Constant 0/1 matrices (host-built): P scatters the interior onto the zero-padded
    # flattened grid; S gathers the stride-spaced valid output positions back out.
    P = np.zeros((H * W, Hp * Wp), np.float32)
    ii, jj = np.meshgrid(np.arange(H), np.arange(W), indexing="ij")
    P[(ii * W + jj).ravel(), ((ii + pad) * Wp + (jj + pad)).ravel()] = 1.0
    S = np.zeros((L_acc, Ho * Wo), np.float32)
    oi, oj = np.meshgrid(np.arange(Ho), np.arange(Wo), indexing="ij")
    S[(oi * stride * Wp + oj * stride).ravel(), (oi * Wo + oj).ravel()] = 1.0

    # NCHW-native, lane-dense view of the input (free reshape, no transpose, no pad).
    x_flat = x_nchw.reshape(N, Cin, H * W)

    kernel = functools.partial(_fused_block_kernel, K=K, Wp=Wp, L_acc=L_acc,
                               add_residual=add_res)

    flops = 2 * N * (H * W * Cin * hidden            # expand
                     + H * W * hidden * Hp * Wp      # pad-scatter matmul
                     + Ho * Wo * K * K * hidden      # depthwise
                     + L_acc * hidden * Ho * Wo      # select matmul
                     + Ho * Wo * hidden * Cout)      # project
    bytes_accessed = 4 * int(x_flat.size + N * Cout * Ho * Wo + P.size + S.size
                             + w1f.size + wdwf.size + w2f.size + 2 * hidden + Cout)

    out = pl.pallas_call(
        kernel,
        out_shape=jax.ShapeDtypeStruct((N, Cout, Ho * Wo), x_nchw.dtype),
        grid=(N,),
        in_specs=[
            pl.BlockSpec((1, Cin, H * W), lambda n: (n, 0, 0)),       # per-image input
            pl.BlockSpec((H * W, Hp * Wp), lambda n: (0, 0)),         # pad-scatter matrix (resident)
            pl.BlockSpec((L_acc, Ho * Wo), lambda n: (0, 0)),         # output-select matrix (resident)
            pl.BlockSpec((hidden, Cin), lambda n: (0, 0)),            # w1 (BN-folded, resident)
            pl.BlockSpec((hidden, 1), lambda n: (0, 0)),              # b1
            pl.BlockSpec((hidden, K * K), lambda n: (0, 0)),          # depthwise w (folded)
            pl.BlockSpec((hidden, 1), lambda n: (0, 0)),              # b2
            pl.BlockSpec((Cout, hidden), lambda n: (0, 0)),           # w2 (folded)
            pl.BlockSpec((Cout, 1), lambda n: (0, 0)),                # b3
        ],
        out_specs=pl.BlockSpec((1, Cout, Ho * Wo), lambda n: (n, 0, 0)),
        compiler_params=pltpu.CompilerParams(
            dimension_semantics=("parallel",),                        # megacore over batch
            vmem_limit_bytes=32 * 1024 * 1024),
        cost_estimate=pl.CostEstimate(flops=int(flops), transcendentals=0,
                                      bytes_accessed=bytes_accessed),
    )(x_flat, jnp.asarray(P), jnp.asarray(S), w1f, b1f, wdwf, b2f, w2f, b3f)

    return out.reshape(N, Cout, Ho, Wo)                               # NCHW-native output


# --------------------------------------------------------------------------
# Pure-JAX reference (PyTorch eval semantics) for a correctness check
# --------------------------------------------------------------------------
def _reference(x_nchw, w1, s1, b1, w_dw, s2, b2, w2, s3, b3, *, stride, pad):
    hidden = w1.shape[1]
    hi = jax.lax.Precision.HIGHEST
    # 1x1 expand + BN + ReLU6
    we = jnp.transpose(w1, (1, 0))[:, :, None, None]            # (hidden, Cin, 1, 1)
    h = lax.conv_general_dilated(x_nchw, we, (1, 1), 'VALID',
                                 dimension_numbers=('NCHW', 'OIHW', 'NCHW'),
                                 precision=hi)
    h = jnp.clip(h * s1[None, :, None, None] + b1[None, :, None, None], 0.0, 6.0)
    # depthwise KxK + BN + ReLU6
    wd = jnp.transpose(w_dw, (2, 0, 1))[:, None, :, :]          # (hidden, 1, K, K)
    h = lax.conv_general_dilated(h, wd, (stride, stride), ((pad, pad), (pad, pad)),
                                 dimension_numbers=('NCHW', 'OIHW', 'NCHW'),
                                 feature_group_count=hidden, precision=hi)
    h = jnp.clip(h * s2[None, :, None, None] + b2[None, :, None, None], 0.0, 6.0)
    # 1x1 project + BN
    wp_ = jnp.transpose(w2, (1, 0))[:, :, None, None]           # (Cout, hidden, 1, 1)
    y = lax.conv_general_dilated(h, wp_, (1, 1), 'VALID',
                                 dimension_numbers=('NCHW', 'OIHW', 'NCHW'),
                                 precision=hi)
    y = y * s3[None, :, None, None] + b3[None, :, None, None]
    if y.shape == x_nchw.shape:
        y = y + x_nchw
    return y


# --------------------------------------------------------------------------
if __name__ == "__main__":
    key = jax.random.PRNGKey(0)

    def bn_params(k, c):
        k1, k2, k3, k4 = jax.random.split(k, 4)
        gamma = jax.random.uniform(k1, (c,), minval=0.5, maxval=1.5)
        beta = jax.random.normal(k2, (c,)) * 0.1
        mean = jax.random.normal(k3, (c,)) * 0.1
        var = jax.random.uniform(k4, (c,), minval=0.5, maxval=1.5)
        return _bn_fold(gamma, beta, mean, var)

    def run_case(k, *, N, Cin, Cout, H, W, expand_ratio_list, kernel_size_list, stride):
        hidden = Cin * max(expand_ratio_list)
        K = max(kernel_size_list)
        pad = (K - 1) // 2
        keys = jax.random.split(k, 7)
        x = jax.random.normal(keys[0], (N, Cin, H, W), jnp.float32)
        # NOTE: PyTorch stores the 1x1 weights as (out, in, 1, 1) and the depthwise weight
        # as (C, 1, K, K); an integration wrapper must transpose to the layouts used here.
        w1 = jax.random.normal(keys[1], (Cin, hidden), jnp.float32) * 0.1    # 1x1 expand
        w_dw = jax.random.normal(keys[2], (K, K, hidden), jnp.float32) * 0.1  # depthwise
        w2 = jax.random.normal(keys[3], (hidden, Cout), jnp.float32) * 0.1   # 1x1 project
        s1, b1 = bn_params(keys[4], hidden)
        s2, b2 = bn_params(keys[5], hidden)
        s3, b3 = bn_params(keys[6], Cout)

        out = super_mobile_conv_block(x, w1, s1, b1, w_dw, s2, b2, w2, s3, b3,
                                      stride=stride, pad=pad)
        out = jax.block_until_ready(out)
        ref = _reference(x, w1, s1, b1, w_dw, s2, b2, w2, s3, b3,
                         stride=stride, pad=pad)
        assert out.shape == ref.shape, (out.shape, ref.shape)
        err = float(jnp.max(jnp.abs(out - ref)))
        assert err < 2e-2, f"max abs error {err}"

    k1, k2 = jax.random.split(key)
    # Case A: K=5, stride=1, Cin==Cout -> residual path exercised.
    run_case(k1, N=2, Cin=4, Cout=4, H=16, W=16,
             expand_ratio_list=[3, 6], kernel_size_list=[3, 5], stride=1)
    # Case B: K=3, stride=2, Cin!=Cout -> strided depthwise + no-residual path exercised.
    run_case(k2, N=2, Cin=4, Cout=8, H=16, W=16,
             expand_ratio_list=[4], kernel_size_list=[3], stride=2)

    print("KERNEL_OK")
</pallas_src>

<mosaic_0001>
module attributes {stable_mosaic.version = 11 : i64} {
  func.func @_fused_block_kernel(%arg0: i32, %arg1: memref<1x4x256xf32, #tpu.memory_space<vmem>>, %arg2: memref<256x400xf32, #tpu.memory_space<vmem>>, %arg3: memref<316x256xf32, #tpu.memory_space<vmem>>, %arg4: memref<24x4xf32, #tpu.memory_space<vmem>>, %arg5: memref<24x1xf32, #tpu.memory_space<vmem>>, %arg6: memref<24x25xf32, #tpu.memory_space<vmem>>, %arg7: memref<24x1xf32, #tpu.memory_space<vmem>>, %arg8: memref<4x24xf32, #tpu.memory_space<vmem>>, %arg9: memref<4x1xf32, #tpu.memory_space<vmem>>, %arg10: memref<1x4x256xf32, #tpu.memory_space<vmem>>) attributes {dimension_semantics = [#tpu.dimension_semantics<parallel>], iteration_bounds = array<i64: 2>, scalar_prefetch = 0 : i64, scratch_operands = 0 : i64, tpu.core_type = #tpu.core_type<tc>, window_params = [{transform_indices = @transform_0, window_bounds = array<i64: 1, 4, 256>}, {pipeline_mode = #tpu.pipeline_mode<synchronous>, transform_indices = @transform_1, window_bounds = array<i64: 256, 400>}, {pipeline_mode = #tpu.pipeline_mode<synchronous>, transform_indices = @transform_2, window_bounds = array<i64: 316, 256>}, {pipeline_mode = #tpu.pipeline_mode<synchronous>, transform_indices = @transform_3, window_bounds = array<i64: 24, 4>}, {pipeline_mode = #tpu.pipeline_mode<synchronous>, transform_indices = @transform_4, window_bounds = array<i64: 24, 1>}, {pipeline_mode = #tpu.pipeline_mode<synchronous>, transform_indices = @transform_5, window_bounds = array<i64: 24, 25>}, {pipeline_mode = #tpu.pipeline_mode<synchronous>, transform_indices = @transform_6, window_bounds = array<i64: 24, 1>}, {pipeline_mode = #tpu.pipeline_mode<synchronous>, transform_indices = @transform_7, window_bounds = array<i64: 4, 24>}, {pipeline_mode = #tpu.pipeline_mode<synchronous>, transform_indices = @transform_8, window_bounds = array<i64: 4, 1>}, {transform_indices = @transform_9, window_bounds = array<i64: 1, 4, 256>}]} {
    %c0 = arith.constant 0 : index
    %c0_0 = arith.constant 0 : index
    %c0_1 = arith.constant 0 : index
    %0 = vector.load %arg1[%c0, %c0_0, %c0_1] : memref<1x4x256xf32, #tpu.memory_space<vmem>>, vector<1x4x256xf32>
    %1 = vector.shape_cast %0 : vector<1x4x256xf32> to vector<4x256xf32>
    %c0_2 = arith.constant 0 : index
    %c0_3 = arith.constant 0 : index
    %2 = vector.load %arg4[%c0_2, %c0_3] : memref<24x4xf32, #tpu.memory_space<vmem>>, vector<24x4xf32>
    %cst = arith.constant dense<0.000000e+00> : vector<24x256xf32>
    %3 = tpu.matmul %2, %1, %cst {dimension_numbers = #tpu.dot_dimension_numbers<[1], [0], [0], [1], [0, 0, 1, 1], [], []>} : vector<24x4xf32>, vector<4x256xf32>, vector<24x256xf32> -> vector<24x256xf32>
    %c0_4 = arith.constant 0 : index
    %c0_5 = arith.constant 0 : index
    %4 = vector.load %arg5[%c0_4, %c0_5] : memref<24x1xf32, #tpu.memory_space<vmem>>, vector<24x1xf32>
    %5 = vector.broadcast %4 : vector<24x1xf32> to vector<24x256xf32>
    %6 = arith.addf %3, %5 : vector<24x256xf32>
    %cst_6 = arith.constant 0.000000e+00 : f32
    %cst_7 = arith.constant 6.000000e+00 : f32
    %7 = vector.broadcast %cst_6 : f32 to vector<24x256xf32>
    %8 = arith.maximumf %7, %6 : vector<24x256xf32>
    %9 = vector.broadcast %cst_7 : f32 to vector<24x256xf32>
    %10 = arith.minimumf %9, %8 : vector<24x256xf32>
    %c0_8 = arith.constant 0 : index
    %c0_9 = arith.constant 0 : index
    %11 = vector.load %arg2[%c0_8, %c0_9] : memref<256x400xf32, #tpu.memory_space<vmem>>, vector<256x400xf32>
    %cst_10 = arith.constant dense<0.000000e+00> : vector<24x400xf32>
    %12 = tpu.matmul %10, %11, %cst_10 {dimension_numbers = #tpu.dot_dimension_numbers<[1], [0], [0], [1], [0, 0, 1, 1], [], []>} : vector<24x256xf32>, vector<256x400xf32>, vector<24x400xf32> -> vector<24x400xf32>
    %cst_11 = arith.constant 0.000000e+00 : f32
    %13 = vector.broadcast %cst_11 : f32 to vector<24x316xf32>
    %14 = vector.extract_strided_slice %12 {offsets = [0, 0], sizes = [24, 316], strides = [1, 1]} : vector<24x400xf32> to vector<24x316xf32>
    %c0_12 = arith.constant 0 : index
    %c0_13 = arith.constant 0 : index
    %15 = vector.load %arg6[%c0_12, %c0_13] : memref<24x25xf32, #tpu.memory_space<vmem>>, vector<24x1xf32>
    %16 = vector.broadcast %15 : vector<24x1xf32> to vector<24x316xf32>
    %17 = arith.mulf %14, %16 : vector<24x316xf32>
    %18 = arith.addf %13, %17 : vector<24x316xf32>
    %19 = vector.extract_strided_slice %12 {offsets = [0, 1], sizes = [24, 316], strides = [1, 1]} : vector<24x400xf32> to vector<24x316xf32>
    %c0_14 = arith.constant 0 : index
    %c1 = arith.constant 1 : index
    %20 = vector.load %arg6[%c0_14, %c1] : memref<24x25xf32, #tpu.memory_space<vmem>>, vector<24x1xf32>
    %21 = vector.broadcast %20 : vector<24x1xf32> to vector<24x316xf32>
    %22 = arith.mulf %19, %21 : vector<24x316xf32>
    %23 = arith.addf %18, %22 : vector<24x316xf32>
    %24 = vector.extract_strided_slice %12 {offsets = [0, 2], sizes = [24, 316], strides = [1, 1]} : vector<24x400xf32> to vector<24x316xf32>
    %c0_15 = arith.constant 0 : index
    %c2 = arith.constant 2 : index
    %25 = vector.load %arg6[%c0_15, %c2] : memref<24x25xf32, #tpu.memory_space<vmem>>, vector<24x1xf32>
    %26 = vector.broadcast %25 : vector<24x1xf32> to vector<24x316xf32>
    %27 = arith.mulf %24, %26 : vector<24x316xf32>
    %28 = arith.addf %23, %27 : vector<24x316xf32>
    %29 = vector.extract_strided_slice %12 {offsets = [0, 3], sizes = [24, 316], strides = [1, 1]} : vector<24x400xf32> to vector<24x316xf32>
    %c0_16 = arith.constant 0 : index
    %c3 = arith.constant 3 : index
    %30 = vector.load %arg6[%c0_16, %c3] : memref<24x25xf32, #tpu.memory_space<vmem>>, vector<24x1xf32>
    %31 = vector.broadcast %30 : vector<24x1xf32> to vector<24x316xf32>
    %32 = arith.mulf %29, %31 : vector<24x316xf32>
    %33 = arith.addf %28, %32 : vector<24x316xf32>
    %34 = vector.extract_strided_slice %12 {offsets = [0, 4], sizes = [24, 316], strides = [1, 1]} : vector<24x400xf32> to vector<24x316xf32>
    %c0_17 = arith.constant 0 : index
    %c4 = arith.constant 4 : index
    %35 = vector.load %arg6[%c0_17, %c4] : memref<24x25xf32, #tpu.memory_space<vmem>>, vector<24x1xf32>
    %36 = vector.broadcast %35 : vector<24x1xf32> to vector<24x316xf32>
    %37 = arith.mulf %34, %36 : vector<24x316xf32>
    %38 = arith.addf %33, %37 : vector<24x316xf32>
    %39 = vector.extract_strided_slice %12 {offsets = [0, 20], sizes = [24, 316], strides = [1, 1]} : vector<24x400xf32> to vector<24x316xf32>
    %c0_18 = arith.constant 0 : index
    %c5 = arith.constant 5 : index
    %40 = vector.load %arg6[%c0_18, %c5] : memref<24x25xf32, #tpu.memory_space<vmem>>, vector<24x1xf32>
    %41 = vector.broadcast %40 : vector<24x1xf32> to vector<24x316xf32>
    %42 = arith.mulf %39, %41 : vector<24x316xf32>
    %43 = arith.addf %38, %42 : vector<24x316xf32>
    %44 = vector.extract_strided_slice %12 {offsets = [0, 21], sizes = [24, 316], strides = [1, 1]} : vector<24x400xf32> to vector<24x316xf32>
    %c0_19 = arith.constant 0 : index
    %c6 = arith.constant 6 : index
    %45 = vector.load %arg6[%c0_19, %c6] : memref<24x25xf32, #tpu.memory_space<vmem>>, vector<24x1xf32>
    %46 = vector.broadcast %45 : vector<24x1xf32> to vector<24x316xf32>
    %47 = arith.mulf %44, %46 : vector<24x316xf32>
    %48 = arith.addf %43, %47 : vector<24x316xf32>
    %49 = vector.extract_strided_slice %12 {offsets = [0, 22], sizes = [24, 316], strides = [1, 1]} : vector<24x400xf32> to vector<24x316xf32>
    %c0_20 = arith.constant 0 : index
    %c7 = arith.constant 7 : index
    %50 = vector.load %arg6[%c0_20, %c7] : memref<24x25xf32, #tpu.memory_space<vmem>>, vector<24x1xf32>
    %51 = vector.broadcast %50 : vector<24x1xf32> to vector<24x316xf32>
    %52 = arith.mulf %49, %51 : vector<24x316xf32>
    %53 = arith.addf %48, %52 : vector<24x316xf32>
    %54 = vector.extract_strided_slice %12 {offsets = [0, 23], sizes = [24, 316], strides = [1, 1]} : vector<24x400xf32> to vector<24x316xf32>
    %c0_21 = arith.constant 0 : index
    %c8 = arith.constant 8 : index
    %55 = vector.load %arg6[%c0_21, %c8] : memref<24x25xf32, #tpu.memory_space<vmem>>, vector<24x1xf32>
    %56 = vector.broadcast %55 : vector<24x1xf32> to vector<24x316xf32>
    %57 = arith.mulf %54, %56 : vector<24x316xf32>
    %58 = arith.addf %53, %57 : vector<24x316xf32>
    %59 = vector.extract_strided_slice %12 {offsets = [0, 24], sizes = [24, 316], strides = [1, 1]} : vector<24x400xf32> to vector<24x316xf32>
    %c0_22 = arith.constant 0 : index
    %c9 = arith.constant 9 : index
    %60 = vector.load %arg6[%c0_22, %c9] : memref<24x25xf32, #tpu.memory_space<vmem>>, vector<24x1xf32>
    %61 = vector.broadcast %60 : vector<24x1xf32> to vector<24x316xf32>
    %62 = arith.mulf %59, %61 : vector<24x316xf32>
    %63 = arith.addf %58, %62 : vector<24x316xf32>
    %64 = vector.extract_strided_slice %12 {offsets = [0, 40], sizes = [24, 316], strides = [1, 1]} : vector<24x400xf32> to vector<24x316xf32>
    %c0_23 = arith.constant 0 : index
    %c10 = arith.constant 10 : index
    %65 = vector.load %arg6[%c0_23, %c10] : memref<24x25xf32, #tpu.memory_space<vmem>>, vector<24x1xf32>
    %66 = vector.broadcast %65 : vector<24x1xf32> to vector<24x316xf32>
    %67 = arith.mulf %64, %66 : vector<24x316xf32>
    %68 = arith.addf %63, %67 : vector<24x316xf32>
    %69 = vector.extract_strided_slice %12 {offsets = [0, 41], sizes = [24, 316], strides = [1, 1]} : vector<24x400xf32> to vector<24x316xf32>
    %c0_24 = arith.constant 0 : index
    %c11 = arith.constant 11 : index
    %70 = vector.load %arg6[%c0_24, %c11] : memref<24x25xf32, #tpu.memory_space<vmem>>, vector<24x1xf32>
    %71 = vector.broadcast %70 : vector<24x1xf32> to vector<24x316xf32>
    %72 = arith.mulf %69, %71 : vector<24x316xf32>
    %73 = arith.addf %68, %72 : vector<24x316xf32>
    %74 = vector.extract_strided_slice %12 {offsets = [0, 42], sizes = [24, 316], strides = [1, 1]} : vector<24x400xf32> to vector<24x316xf32>
    %c0_25 = arith.constant 0 : index
    %c12 = arith.constant 12 : index
    %75 = vector.load %arg6[%c0_25, %c12] : memref<24x25xf32, #tpu.memory_space<vmem>>, vector<24x1xf32>
    %76 = vector.broadcast %75 : vector<24x1xf32> to vector<24x316xf32>
    %77 = arith.mulf %74, %76 : vector<24x316xf32>
    %78 = arith.addf %73, %77 : vector<24x316xf32>
    %79 = vector.extract_strided_slice %12 {offsets = [0, 43], sizes = [24, 316], strides = [1, 1]} : vector<24x400xf32> to vector<24x316xf32>
    %c0_26 = arith.constant 0 : index
    %c13 = arith.constant 13 : index
    %80 = vector.load %arg6[%c0_26, %c13] : memref<24x25xf32, #tpu.memory_space<vmem>>, vector<24x1xf32>
    %81 = vector.broadcast %80 : vector<24x1xf32> to vector<24x316xf32>
    %82 = arith.mulf %79, %81 : vector<24x316xf32>
    %83 = arith.addf %78, %82 : vector<24x316xf32>
    %84 = vector.extract_strided_slice %12 {offsets = [0, 44], sizes = [24, 316], strides = [1, 1]} : vector<24x400xf32> to vector<24x316xf32>
    %c0_27 = arith.constant 0 : index
    %c14 = arith.constant 14 : index
    %85 = vector.load %arg6[%c0_27, %c14] : memref<24x25xf32, #tpu.memory_space<vmem>>, vector<24x1xf32>
    %86 = vector.broadcast %85 : vector<24x1xf32> to vector<24x316xf32>
    %87 = arith.mulf %84, %86 : vector<24x316xf32>
    %88 = arith.addf %83, %87 : vector<24x316xf32>
    %89 = vector.extract_strided_slice %12 {offsets = [0, 60], sizes = [24, 316], strides = [1, 1]} : vector<24x400xf32> to vector<24x316xf32>
    %c0_28 = arith.constant 0 : index
    %c15 = arith.constant 15 : index
    %90 = vector.load %arg6[%c0_28, %c15] : memref<24x25xf32, #tpu.memory_space<vmem>>, vector<24x1xf32>
    %91 = vector.broadcast %90 : vector<24x1xf32> to vector<24x316xf32>
    %92 = arith.mulf %89, %91 : vector<24x316xf32>
    %93 = arith.addf %88, %92 : vector<24x316xf32>
    %94 = vector.extract_strided_slice %12 {offsets = [0, 61], sizes = [24, 316], strides = [1, 1]} : vector<24x400xf32> to vector<24x316xf32>
    %c0_29 = arith.constant 0 : index
    %c16 = arith.constant 16 : index
    %95 = vector.load %arg6[%c0_29, %c16] : memref<24x25xf32, #tpu.memory_space<vmem>>, vector<24x1xf32>
    %96 = vector.broadcast %95 : vector<24x1xf32> to vector<24x316xf32>
    %97 = arith.mulf %94, %96 : vector<24x316xf32>
    %98 = arith.addf %93, %97 : vector<24x316xf32>
    %99 = vector.extract_strided_slice %12 {offsets = [0, 62], sizes = [24, 316], strides = [1, 1]} : vector<24x400xf32> to vector<24x316xf32>
    %c0_30 = arith.constant 0 : index
    %c17 = arith.constant 17 : index
    %100 = vector.load %arg6[%c0_30, %c17] : memref<24x25xf32, #tpu.memory_space<vmem>>, vector<24x1xf32>
    %101 = vector.broadcast %100 : vector<24x1xf32> to vector<24x316xf32>
    %102 = arith.mulf %99, %101 : vector<24x316xf32>
    %103 = arith.addf %98, %102 : vector<24x316xf32>
    %104 = vector.extract_strided_slice %12 {offsets = [0, 63], sizes = [24, 316], strides = [1, 1]} : vector<24x400xf32> to vector<24x316xf32>
    %c0_31 = arith.constant 0 : index
    %c18 = arith.constant 18 : index
    %105 = vector.load %arg6[%c0_31, %c18] : memref<24x25xf32, #tpu.memory_space<vmem>>, vector<24x1xf32>
    %106 = vector.broadcast %105 : vector<24x1xf32> to vector<24x316xf32>
    %107 = arith.mulf %104, %106 : vector<24x316xf32>
    %108 = arith.addf %103, %107 : vector<24x316xf32>
    %109 = vector.extract_strided_slice %12 {offsets = [0, 64], sizes = [24, 316], strides = [1, 1]} : vector<24x400xf32> to vector<24x316xf32>
    %c0_32 = arith.constant 0 : index
    %c19 = arith.constant 19 : index
    %110 = vector.load %arg6[%c0_32, %c19] : memref<24x25xf32, #tpu.memory_space<vmem>>, vector<24x1xf32>
    %111 = vector.broadcast %110 : vector<24x1xf32> to vector<24x316xf32>
    %112 = arith.mulf %109, %111 : vector<24x316xf32>
    %113 = arith.addf %108, %112 : vector<24x316xf32>
    %114 = vector.extract_strided_slice %12 {offsets = [0, 80], sizes = [24, 316], strides = [1, 1]} : vector<24x400xf32> to vector<24x316xf32>
    %c0_33 = arith.constant 0 : index
    %c20 = arith.constant 20 : index
    %115 = vector.load %arg6[%c0_33, %c20] : memref<24x25xf32, #tpu.memory_space<vmem>>, vector<24x1xf32>
    %116 = vector.broadcast %115 : vector<24x1xf32> to vector<24x316xf32>
    %117 = arith.mulf %114, %116 : vector<24x316xf32>
    %118 = arith.addf %113, %117 : vector<24x316xf32>
    %119 = vector.extract_strided_slice %12 {offsets = [0, 81], sizes = [24, 316], strides = [1, 1]} : vector<24x400xf32> to vector<24x316xf32>
    %c0_34 = arith.constant 0 : index
    %c21 = arith.constant 21 : index
    %120 = vector.load %arg6[%c0_34, %c21] : memref<24x25xf32, #tpu.memory_space<vmem>>, vector<24x1xf32>
    %121 = vector.broadcast %120 : vector<24x1xf32> to vector<24x316xf32>
    %122 = arith.mulf %119, %121 : vector<24x316xf32>
    %123 = arith.addf %118, %122 : vector<24x316xf32>
    %124 = vector.extract_strided_slice %12 {offsets = [0, 82], sizes = [24, 316], strides = [1, 1]} : vector<24x400xf32> to vector<24x316xf32>
    %c0_35 = arith.constant 0 : index
    %c22 = arith.constant 22 : index
    %125 = vector.load %arg6[%c0_35, %c22] : memref<24x25xf32, #tpu.memory_space<vmem>>, vector<24x1xf32>
    %126 = vector.broadcast %125 : vector<24x1xf32> to vector<24x316xf32>
    %127 = arith.mulf %124, %126 : vector<24x316xf32>
    %128 = arith.addf %123, %127 : vector<24x316xf32>
    %129 = vector.extract_strided_slice %12 {offsets = [0, 83], sizes = [24, 316], strides = [1, 1]} : vector<24x400xf32> to vector<24x316xf32>
    %c0_36 = arith.constant 0 : index
    %c23 = arith.constant 23 : index
    %130 = vector.load %arg6[%c0_36, %c23] : memref<24x25xf32, #tpu.memory_space<vmem>>, vector<24x1xf32>
    %131 = vector.broadcast %130 : vector<24x1xf32> to vector<24x316xf32>
    %132 = arith.mulf %129, %131 : vector<24x316xf32>
    %133 = arith.addf %128, %132 : vector<24x316xf32>
    %134 = vector.extract_strided_slice %12 {offsets = [0, 84], sizes = [24, 316], strides = [1, 1]} : vector<24x400xf32> to vector<24x316xf32>
    %c0_37 = arith.constant 0 : index
    %c24 = arith.constant 24 : index
    %135 = vector.load %arg6[%c0_37, %c24] : memref<24x25xf32, #tpu.memory_space<vmem>>, vector<24x1xf32>
    %136 = vector.broadcast %135 : vector<24x1xf32> to vector<24x316xf32>
    %137 = arith.mulf %134, %136 : vector<24x316xf32>
    %138 = arith.addf %133, %137 : vector<24x316xf32>
    %c0_38 = arith.constant 0 : index
    %c0_39 = arith.constant 0 : index
    %139 = vector.load %arg3[%c0_38, %c0_39] : memref<316x256xf32, #tpu.memory_space<vmem>>, vector<316x256xf32>
    %cst_40 = arith.constant dense<0.000000e+00> : vector<24x256xf32>
    %140 = tpu.matmul %138, %139, %cst_40 {dimension_numbers = #tpu.dot_dimension_numbers<[1], [0], [0], [1], [0, 0, 1, 1], [], []>} : vector<24x316xf32>, vector<316x256xf32>, vector<24x256xf32> -> vector<24x256xf32>
    %c0_41 = arith.constant 0 : index
    %c0_42 = arith.constant 0 : index
    %141 = vector.load %arg7[%c0_41, %c0_42] : memref<24x1xf32, #tpu.memory_space<vmem>>, vector<24x1xf32>
    %142 = vector.broadcast %141 : vector<24x1xf32> to vector<24x256xf32>
    %143 = arith.addf %140, %142 : vector<24x256xf32>
    %cst_43 = arith.constant 0.000000e+00 : f32
    %cst_44 = arith.constant 6.000000e+00 : f32
    %144 = vector.broadcast %cst_43 : f32 to vector<24x256xf32>
    %145 = arith.maximumf %144, %143 : vector<24x256xf32>
    %146 = vector.broadcast %cst_44 : f32 to vector<24x256xf32>
    %147 = arith.minimumf %146, %145 : vector<24x256xf32>
    %c0_45 = arith.constant 0 : index
    %c0_46 = arith.constant 0 : index
    %148 = vector.load %arg8[%c0_45, %c0_46] : memref<4x24xf32, #tpu.memory_space<vmem>>, vector<4x24xf32>
    %cst_47 = arith.constant dense<0.000000e+00> : vector<4x256xf32>
    %149 = tpu.matmul %148, %147, %cst_47 {dimension_numbers = #tpu.dot_dimension_numbers<[1], [0], [0], [1], [0, 0, 1, 1], [], []>} : vector<4x24xf32>, vector<24x256xf32>, vector<4x256xf32> -> vector<4x256xf32>
    %c0_48 = arith.constant 0 : index
    %c0_49 = arith.constant 0 : index
    %150 = vector.load %arg9[%c0_48, %c0_49] : memref<4x1xf32, #tpu.memory_space<vmem>>, vector<4x1xf32>
    %151 = vector.broadcast %150 : vector<4x1xf32> to vector<4x256xf32>
    %152 = arith.addf %149, %151 : vector<4x256xf32>
    %153 = arith.addf %152, %1 : vector<4x256xf32>
    %c0_50 = arith.constant 0 : index
    %c0_51 = arith.constant 0 : index
    %c0_52 = arith.constant 0 : index
    %154 = vector.load %arg10[%c0_50, %c0_51, %c0_52] : memref<1x4x256xf32, #tpu.memory_space<vmem>>, vector<1x4x256xf32>
    %155 = vector.shape_cast %154 : vector<1x4x256xf32> to vector<4x256xf32>
    %156 = vector.shape_cast %153 : vector<4x256xf32> to vector<1x4x256xf32>
    tpu.vector_store %arg10[%c0_50, %c0_51, %c0_52], %156 {strides = array<i32>} : memref<1x4x256xf32, #tpu.memory_space<vmem>>, vector<1x4x256xf32>,
    return
  }
  func.func @transform_0(%arg0: i32) -> (i32, i32, i32) {
    %c0_i32 = arith.constant 0 : i32
    %c0_i32_0 = arith.constant 0 : i32
    %c0_i32_1 = arith.constant 0 : i32
    return %arg0, %c0_i32, %c0_i32_0 : i32, i32, i32
  }
  func.func @transform_1(%arg0: i32) -> (i32, i32) {
    %c0_i32 = arith.constant 0 : i32
    %c0_i32_0 = arith.constant 0 : i32
    %c0_i32_1 = arith.constant 0 : i32
    return %c0_i32, %c0_i32_0 : i32, i32
  }
  func.func @transform_2(%arg0: i32) -> (i32, i32) {
    %c0_i32 = arith.constant 0 : i32
    %c0_i32_0 = arith.constant 0 : i32
    %c0_i32_1 = arith.constant 0 : i32
    return %c0_i32, %c0_i32_0 : i32, i32
  }
  func.func @transform_3(%arg0: i32) -> (i32, i32) {
    %c0_i32 = arith.constant 0 : i32
    %c0_i32_0 = arith.constant 0 : i32
    %c0_i32_1 = arith.constant 0 : i32
    return %c0_i32, %c0_i32_0 : i32, i32
  }
  func.func @transform_4(%arg0: i32) -> (i32, i32) {
    %c0_i32 = arith.constant 0 : i32
    %c0_i32_0 = arith.constant 0 : i32
    %c0_i32_1 = arith.constant 0 : i32
    return %c0_i32, %c0_i32_0 : i32, i32
  }
  func.func @transform_5(%arg0: i32) -> (i32, i32) {
    %c0_i32 = arith.constant 0 : i32
    %c0_i32_0 = arith.constant 0 : i32
    %c0_i32_1 = arith.constant 0 : i32
    return %c0_i32, %c0_i32_0 : i32, i32
  }
  func.func @transform_6(%arg0: i32) -> (i32, i32) {
    %c0_i32 = arith.constant 0 : i32
    %c0_i32_0 = arith.constant 0 : i32
    %c0_i32_1 = arith.constant 0 : i32
    return %c0_i32, %c0_i32_0 : i32, i32
  }
  func.func @transform_7(%arg0: i32) -> (i32, i32) {
    %c0_i32 = arith.constant 0 : i32
    %c0_i32_0 = arith.constant 0 : i32
    %c0_i32_1 = arith.constant 0 : i32
    return %c0_i32, %c0_i32_0 : i32, i32
  }
  func.func @transform_8(%arg0: i32) -> (i32, i32) {
    %c0_i32 = arith.constant 0 : i32
    %c0_i32_0 = arith.constant 0 : i32
    %c0_i32_1 = arith.constant 0 : i32
    return %c0_i32, %c0_i32_0 : i32, i32
  }
  func.func @transform_9(%arg0: i32) -> (i32, i32, i32) {
    %c0_i32 = arith.constant 0 : i32
    %c0_i32_0 = arith.constant 0 : i32
    %c0_i32_1 = arith.constant 0 : i32
    return %arg0, %c0_i32, %c0_i32_0 : i32, i32, i32
  }
}

</mosaic_0001>

<bundles_post_ra>
// kernel: tpu_custom_call.1
= control target key start
LH: loop header
LB: loop body
LE: loop exit
PB: predicated region body
PF: predicated region fallthrough
CT: control target
= control target key end

     0   :  { %14 = vsyncpa [#allocation3], 0  ;;  %s6097_s0 = inlined_call_operand.vmem [shape: f32[2,4,256], index: 0, kind: input, shape index: {}]   ;;  %s6098_s1 = inlined_call_operand.vmem [shape: f32[256,400], index: 1, kind: input, shape index: {}]   ;;  %s6099_s2 = inlined_call_operand.vmem [shape: f32[316,256], index: 2, kind: input, shape index: {}]   ;;  %s6100_s3 = inlined_call_operand.vmem [shape: f32[24,4], index: 3, kind: input, shape index: {}]   ;;  %s6101_s4 = inlined_call_operand.vmem [shape: f32[24,1], index: 4, kind: input, shape index: {}]   ;;  %s6102_s5 = inlined_call_operand.vmem [shape: f32[24,25], index: 5, kind: input, shape index: {}]   ;;  %s6103_s6 = inlined_call_operand.vmem [shape: f32[24,1], index: 6, kind: input, shape index: {}]   ;;  %s6104_s7 = inlined_call_operand.vmem [shape: f32[4,24], index: 7, kind: input, shape index: {}]   ;;  %s6105_s8 = inlined_call_operand.vmem [shape: f32[4,1], index: 8, kind: input, shape index: {}]   ;;  %s6106_s9 = inlined_call_operand.hbm [shape: f32[2,4,256], index: 9, kind: output, shape index: {}]  }
   0x1   :  { %16 = vsyncpa [#allocation3 + $0x1], 0  ;;  %s3423_s30 = smov 0   ;;  %s3425_s10 = smov 0  }
   0x2   :  { %s3427_s11 = smov 0   ;;  %s3429_s12 = smov 0  }
   0x3 LB: > { %s3444_s13 = sadd.s32 4294967295, %s3320_s12   ;;  %s3078_s14 = sadd.s32 4294967294, %s3320_s12   ;;  %s3320_s12 = sphi %s3429_s12, %s6489_s12   ;;  %s3316_s11 = sphi %s3427_s11, %s6488_s11   ;;  %s3312_s10 = sphi %s3425_s10, %s6487_s10   ;;  %s3308_s30 = sphi %s3423_s30, %s6486_s30  }
   0x4   : > { %s3448_s15 = sadd.s32 1, %s3320_s12   ;;  %s223_s16 = sadd.s32 1, %s3316_s11 }
   0x5   : > { %s220_s17 = ssub.s32 %s3320_s12, %s3448_s15  ;;  %p233_p0 = scmp.ne.s32.totalorder %s3316_s11, %s3312_s10 }
   0x6   : > { %p221_p1 = scmp.eq.s32.totalorder %s220_s17, 0  ;;  %p234_p2 = scmp.eq.s32.totalorder %s3444_s13, 1 }
   0x7   : > { %p239_p3 = scmp.ne.s32.totalorder %s3312_s10, %s3308_s30  ;;  %p240_p4 = scmp.eq.s32.totalorder %s3078_s14, 1 }
   0x8   : > { %s3459_s18 = scalar_select %p221_p1, %s3316_s11, %s223_s16  }
   0x9   : > { %p3461_p5 = por %p234_p2, %p233_p0  ;;  %p3465_p6 = por %p240_p4, %p239_p3 }
   0xa   : > { %p3081_p7 = scmp.ge.s32.totalorder %s3320_s12, 1  ;;  %p290_p8 = scmp.lt.s32.totalorder %s3320_s12, 3 }
   0xc   : > { %p291_p9 = pnand %p3081_p7, %p290_p8 }
   0xe   : > { %294 = sbr.rel (%p291_p9) target bundleno = 1468 (0x5bc), region = 56 }
  0x13   : > { %v3474_v0 = vld [vmem:[%s6102_s5] sm:$0xff]  ;;  %v3322_v1 = vmov 1   ;;  %p326_p10 = scmp.lt.s32.totalorder %s3444_s13, 1  ;;  %v6107_v2 = vmov 0.0   ;;  %v3483_v3 = vld [vmem:[%s6102_s5 + $0x8] sm:$0xff]  ;;  %v337_v4 = vld [vmem:[%s6101_s4 + $0x10] sm:$0xff] }
  0x14   : > { %3193 = vset.pattern.permute.xlu0 %v3322_v1  ;;  %434 = vmatprep.mubr.f32.mxu0 %v6107_v2  ;;  %v3324_v5 = vmov 2   ;;  %v3325_v6 = vmov 0   ;;  %vm365_vm0 = vcmask 1043456   ;;  %v332_v9 = vld [vmem:[%s6100_s3] sm:$0xff]  ;;  %vm355_vm1 = vcmask 31744   ;;  %v333_v11 = vld [vmem:[%s6100_s3 + $0x8] sm:$0xff] }
  0x15   : > { %796 = vperm.xlu0 %3193, %v3474_v0   ;;  %s327_s23 = scalar_select %p326_p10, %s3444_s13, 1  ;;  %3192 = vset.pattern.permute.xlu1 %v3325_v6  ;;  %v3326_v10 = vmov 3   ;;  %v3327_v12 = vmov 4   ;;  %v3516_v13 = vld [vmem:[%s6102_s5 + $0x10] sm:$0xff]  ;;  %v3328_v15 = vmov 5   ;;  %v3329_v16 = vmov 6  }
  0x16   : > { %350 = vperm.xlu1 %3192, %v337_v4   ;;  %v334_v14 = vld [vmem:[%s6100_s3 + $0x10] sm:$0xff]  ;;  %v3330_v17 = vmov 7   ;;  %v3331_v18 = vmov 8   ;;  %v3332_v19 = vmov 9   ;;  %v3333_v20 = vmov 10   ;;  %v526_v21 = vld [vmem:[%s6098_s1 + $0x1e8] sm:$0xff] }
  0x17   : > { %s3101_s28 = sshll.u32 %s327_s23, 3  ;;  %v528_v22 = vld [vmem:[%s6098_s1 + $0x1f8] sm:$0xff]  ;;  %593 = vmatprep.subr.mxu1 %v526_v21  ;;  %v3334_v23 = vmov 11   ;;  %v525_v24 = vld [vmem:[%s6098_s1 + $0x1e0] sm:$0xff]  ;;  %v527_v25 = vld [vmem:[%s6098_s1 + $0x1f0] sm:$0xff]  ;;  %v3335_v34 = vmov 12  }
  0x18   : > { %s3491_s16 = scalar_lea.vmem %s6097_s0, %s3101_s28  ;;  %594 = vmatpush1.msra.mxu1 %v525_v24  ;;  %v522_v26 = vld [vmem:[%s6098_s1 + $0x1c8] sm:$0xff]  ;;  %v524_v27 = vld [vmem:[%s6098_s1 + $0x1d8] sm:$0xff]  ;;  %v521_v28 = vld [vmem:[%s6098_s1 + $0x1c0] sm:$0xff]  ;;  %v3336_v41 = vmov 13   ;;  %v3337_v48 = vmov 14   ;;  %v3338_v55 = vmov 15  }
  0x19   : > { %3196 = vset.pattern.permute.xlu0 %v3324_v5  ;;  %v331_v7 = vld [vmem:[%s3491_s16] sm:$0xff]  ;;  %595 = vmatprep.subr.mxu1 %v522_v26  ;;  %v523_v29 = vld [vmem:[%s6098_s1 + $0x1d0] sm:$0xff]  ;;  %v518_v30 = vld [vmem:[%s6098_s1 + $0x1a8] sm:$0xff]  ;;  %v3339_v62 = vmov 16   ;;  %s3348_s24 = smov 126   ;;  %s6146_s25 = smov 127  }
  0x1a   : > { %873 = vperm.xlu0 %3196, %v3483_v3   ;;  %v3496_v8 = vcombine.high %v331_v7, %v331_v7  ;;  %764 = vperm.xlu1 %3192, %v3474_v0   ;;  %v520_v31 = vld [vmem:[%s6098_s1 + $0x1b8] sm:$0xff]  ;;  %v517_v32 = vld [vmem:[%s6098_s1 + $0x1a0] sm:$0xff]  ;;  %v519_v33 = vld [vmem:[%s6098_s1 + $0x1b0] sm:$0xff]  ;;  %s6149_s26 = smov 124   ;;  %s6119_s27 = smov 125   ;;  %vm843_vm2 = vcmask 1039360  }
  0x1b   : > { %596 = vmatpush1.msra.mxu1 %v521_v28  ;;  %v514_v35 = vld [vmem:[%s6098_s1 + $0x188] sm:$0xff]  ;;  %v516_v36 = vld [vmem:[%s6098_s1 + $0x198] sm:$0xff]  ;;  %v513_v37 = vld [vmem:[%s6098_s1 + $0x180] sm:$0xff]  ;;  %s6137_s28 = smov 107   ;;  %s6116_s29 = smov 108   ;;  %vm916_vm3 = vcmask 1031168  }
  0x1c   : > { %6229 = vst [vmem:[#allocation5_spill] sm:$0xff] %v3496_v8  ;;  %3085 = vmatprep.subr.msk.mxu0 %vm365_vm0, %v3496_v8  ;;  %597 = vmatprep.subr.mxu1 %v518_v30  ;;  %v515_v38 = vld [vmem:[%s6098_s1 + $0x190] sm:$0xff]  ;;  %v510_v39 = vld [vmem:[%s6098_s1 + $0x168] sm:$0xff]  ;;  %v512_v40 = vld [vmem:[%s6098_s1 + $0x178] sm:$0xff]  ;;  %s6124_s14 = smov 106   ;;  %s6114_s17 = smov 105  }
  0x1d   : > { %3086 = vmatpush1.msk.msra.mxu0 %vm365_vm0, %v331_v7  ;;  %598 = vmatpush1.msra.mxu1 %v517_v32  ;;  %v509_v42 = vld [vmem:[%s6098_s1 + $0x160] sm:$0xff]  ;;  %v511_v43 = vld [vmem:[%s6098_s1 + $0x170] sm:$0xff]  ;;  %v506_v44 = vld [vmem:[%s6098_s1 + $0x148] sm:$0xff]  ;;  %s6126_s21 = smov 104   ;;  %s3357_s22 = smov 87   ;;  %vm989_vm4 = vcmask 1022976  }
  0x1e   : > { %3197 = vset.pattern.permute.xlu0 %v3326_v10  ;;  %3087 = vmatmul.mubr.msk.f32.vlgmr.msra.gmra.mxu0 %vm355_vm1, %v332_v9  ;;  %v508_v45 = vld [vmem:[%s6098_s1 + $0x158] sm:$0xff]  ;;  %v505_v46 = vld [vmem:[%s6098_s1 + $0x140] sm:$0xff]  ;;  %v507_v47 = vld [vmem:[%s6098_s1 + $0x150] sm:$0xff]  ;;  %s6151_s23 = smov 86   ;;  %vm1062_vm5 = vcmask 1014784   ;;  %vm1135_vm6 = vcmask 883712  }
  0x1f   : > { %942 = vperm.xlu0 %3197, %v3474_v0   ;;  %440 = vmatprep.mubr.f32.mxu0 %v6107_v2  ;;  %v502_v49 = vld [vmem:[%s6098_s1 + $0x128] sm:$0xff]  ;;  %v504_v50 = vld [vmem:[%s6098_s1 + $0x138] sm:$0xff]  ;;  %v501_v51 = vld [vmem:[%s6098_s1 + $0x120] sm:$0xff]  ;;  %vm1208_vm7 = vcmask 875520   ;;  %vm1281_vm8 = vcmask 867328   ;;  %vm1427_vm9 = vcmask 850944  }
  0x20   : > { %774 = vperm.xlu1 %3192, %v3516_v13   ;;  %676 = vmatprep.subr.mxu0 %v528_v22  ;;  %v503_v52 = vld [vmem:[%s6098_s1 + $0x130] sm:$0xff]  ;;  %v498_v53 = vld [vmem:[%s6098_s1 + $0x108] sm:$0xff]  ;;  %v500_v54 = vld [vmem:[%s6098_s1 + $0x118] sm:$0xff]  ;;  %vm1354_vm10 = vcmask 859136   ;;  %vm1500_vm11 = vcmask 719872   ;;  %vm1573_vm12 = vcmask 711680  }
  0x21   : > { %677 = vmatpush1.msra.mxu0 %v527_v25  ;;  %599 = vmatprep.subr.mxu1 %v514_v35  ;;  %v497_v56 = vld [vmem:[%s6098_s1 + $0x100] sm:$0xff]  ;;  %v499_v57 = vld [vmem:[%s6098_s1 + $0x110] sm:$0xff]  ;;  %v494_v58 = vld [vmem:[%s6098_s1 + $0xe8] sm:$0xff]  ;;  %v3343_v35 = vmov 20   ;;  %vm1646_vm13 = vcmask 703488   ;;  %vm1719_vm14 = vcmask 695296  }
  0x22   : > { %3088 = vmatmul.mubr.msk.f32.gmra.mxu0 %vm355_vm1, %v333_v11  ;;  %678 = vmatprep.subr.mxu0 %v524_v27  ;;  %v496_v59 = vld [vmem:[%s6098_s1 + $0xf8] sm:$0xff]  ;;  %v493_v60 = vld [vmem:[%s6098_s1 + $0xe0] sm:$0xff]  ;;  %v495_v61 = vld [vmem:[%s6098_s1 + $0xf0] sm:$0xff]  ;;  %v3342_v27 = vmov 19   ;;  %vm1792_vm15 = vcmask 687104  }
  0x23   : > { %3200 = vset.pattern.permute.xlu0 %v3327_v12  ;;  %446 = vmatprep.mubr.f32.mxu0 %v6107_v2  ;;  %v490_v63 = vld [vmem:[%s6098_s1 + $0xc8] sm:$0xff]  ;;  %v489_v4 = vld [vmem:[%s6098_s1 + $0xc0] sm:$0xff]  ;;  %v488_v9 = vld [vmem:[%s6098_s1 + $0xb8] sm:$0xff] }
  0x24   : > { %1019 = vperm.xlu0 %3200, %v3483_v3   ;;  %3194 = vset.pattern.permute.xlu1 %v3322_v1  ;;  %v492_v1 = vld [vmem:[%s6098_s1 + $0xd8] sm:$0xff]  ;;  %v486_v7 = vld [vmem:[%s6098_s1 + $0xa8] sm:$0xff]  ;;  %v485_v11 = vld [vmem:[%s6098_s1 + $0xa0] sm:$0xff] }
  0x25   : > { %800 = vperm.xlu1 %3194, %v3483_v3   ;;  %679 = vmatpush1.msra.mxu0 %v523_v29  ;;  %v478_v21 = vld [vmem:[%s6098_s1 + $0x68] sm:$0xff]  ;;  %v480_v22 = vld [vmem:[%s6098_s1 + $0x78] sm:$0xff]  ;;  %v477_v24 = vld [vmem:[%s6098_s1 + $0x60] sm:$0xff] }
  0x26   : > { %3089 = vmatmul.mubr.msk.f32.gmra.mxu0 %vm355_vm1, %v334_v14  ;;  %680 = vmatprep.subr.mxu0 %v520_v31  ;;  %v482_v14 = vld [vmem:[%s6098_s1 + $0x88] sm:$0xff]  ;;  %v479_v25 = vld [vmem:[%s6098_s1 + $0x70] sm:$0xff]  ;;  %v473_v28 = vld [vmem:[%s6098_s1 + $0x40] sm:$0xff]  ;;  %vm1865_vm1 = vcmask 556032  }
  0x27   : > { %681 = vmatpush1.msra.mxu0 %v519_v33  ;;  %600 = vmatpush1.msra.mxu1 %v513_v37  ;;  %v474_v26 = vld [vmem:[%s6098_s1 + $0x48] sm:$0xff]  ;;  %v475_v29 = vld [vmem:[%s6098_s1 + $0x50] sm:$0xff]  ;;  %v472_v31 = vld [vmem:[%s6098_s1 + $0x38] sm:$0xff] }
  0x28   : > { %3201 = vset.pattern.permute.xlu0 %v3328_v15  ;;  %682 = vmatprep.subr.mxu0 %v516_v36  ;;  %v470_v30 = vld [vmem:[%s6098_s1 + $0x28] sm:$0xff]  ;;  %v469_v32 = vld [vmem:[%s6098_s1 + $0x20] sm:$0xff]  ;;  %v471_v33 = vld [vmem:[%s6098_s1 + $0x30] sm:$0xff] }
  0x29   : > { %1088 = vperm.xlu0 %3201, %v3474_v0   ;;  %804 = vperm.xlu1 %3194, %v3516_v13   ;;  %v466_v36 = vld [vmem:[%s6098_s1 + $0x8] sm:$0xff]  ;;  %v468_v37 = vld [vmem:[%s6098_s1 + $0x18] sm:$0xff] }
  0x2a   : > { %683 = vmatpush1.msra.mxu0 %v515_v38  ;;  %601 = vmatprep.subr.mxu1 %v510_v39  ;;  %v465_v38 = vld [vmem:[%s6098_s1] sm:$0xff]  ;;  %v467_v39 = vld [vmem:[%s6098_s1 + $0x10] sm:$0xff] }
  0x2b   : > { %684 = vmatprep.subr.mxu0 %v512_v40  ;;  %602 = vmatpush1.msra.mxu1 %v509_v42  ;;  %v590_v40 = vld [vmem:[%s6098_s1 + $0x3e8] sm:$0xff]  ;;  %v3344_v42 = vmov 21  }
  0x2c   : > { %685 = vmatpush1.msra.mxu0 %v511_v43  ;;  %603 = vmatprep.subr.mxu1 %v506_v44  ;;  %v589_v43 = vld [vmem:[%s6098_s1 + $0x3e0] sm:$0xff]  ;;  %v591_v44 = vld [vmem:[%s6098_s1 + $0x3f0] sm:$0xff] }
  0x2d   : > { %3204 = vset.pattern.permute.xlu0 %v3329_v16  ;;  %3195 = vset.pattern.permute.xlu1 %v3324_v5  ;;  %v491_v5 = vld [vmem:[%s6098_s1 + $0xd0] sm:$0xff] }
  0x2e   : > { %1165 = vperm.xlu0 %3204, %v3483_v3   ;;  %869 = vperm.xlu1 %3195, %v3474_v0  }
  0x2f   : > { %686 = vmatprep.subr.mxu0 %v508_v45  ;;  %604 = vmatpush1.msra.mxu1 %v505_v46  ;;  %v586_v45 = vld [vmem:[%s6098_s1 + $0x3c8] sm:$0xff]  ;;  %v588_v46 = vld [vmem:[%s6098_s1 + $0x3d8] sm:$0xff] }
  0x30   : > { %687 = vmatpush1.msra.mxu0 %v507_v47  ;;  %605 = vmatprep.subr.mxu1 %v502_v49  ;;  %v585_v47 = vld [vmem:[%s6098_s1 + $0x3c0] sm:$0xff]  ;;  %v587_v49 = vld [vmem:[%s6098_s1 + $0x3d0] sm:$0xff] }
  0x31   : > { %688 = vmatprep.subr.mxu0 %v504_v50  ;;  %606 = vmatpush1.msra.mxu1 %v501_v51  ;;  %v3345_v50 = vmov 24   ;;  %v582_v51 = vld [vmem:[%s6098_s1 + $0x3a8] sm:$0xff] }
  0x32   : > { %3205 = vset.pattern.permute.xlu0 %v3330_v17  ;;  %877 = vperm.xlu1 %3195, %v3516_v13  }
  0x33   : > { %1234 = vperm.xlu0 %3205, %v3474_v0   ;;  %689 = vmatpush1.msra.mxu0 %v503_v52  ;;  %v584_v52 = vld [vmem:[%s6098_s1 + $0x3b8] sm:$0xff] }
  0x34   : > { %607 = vmatprep.subr.mxu1 %v498_v53  ;;  %690 = vmatprep.subr.mxu0 %v500_v54  ;;  %v581_v53 = vld [vmem:[%s6098_s1 + $0x3a0] sm:$0xff]  ;;  %v583_v54 = vld [vmem:[%s6098_s1 + $0x3b0] sm:$0xff] }
  0x35   : > { %608 = vmatpush1.msra.mxu1 %v497_v56  ;;  %691 = vmatpush1.msra.mxu0 %v499_v57  ;;  %v578_v56 = vld [vmem:[%s6098_s1 + $0x388] sm:$0xff]  ;;  %v335_v57 = vld [vmem:[%s6101_s4] sm:$0xff] }
  0x36   : > { %3198 = vset.pattern.permute.xlu1 %v3326_v10  ;;  %609 = vmatprep.subr.mxu1 %v494_v58  ;;  %v3340_v10 = vmov 17   ;;  %v577_v58 = vld [vmem:[%s6098_s1 + $0x380] sm:$0xff] }
  0x37   : > { %1242 = vperm.xlu0 %3205, %v3516_v13   ;;  %946 = vperm.xlu1 %3198, %v3483_v3  }
  0x38   : > { %692 = vmatprep.subr.mxu0 %v496_v59  ;;  %610 = vmatpush1.msra.mxu1 %v493_v60  ;;  %v579_v59 = vld [vmem:[%s6098_s1 + $0x390] sm:$0xff]  ;;  %v574_v60 = vld [vmem:[%s6098_s1 + $0x368] sm:$0xff] }
  0x39   : > { %693 = vmatpush1.msra.mxu0 %v495_v61  ;;  %611 = vmatprep.subr.mxu1 %v490_v63  ;;  %v576_v61 = vld [vmem:[%s6098_s1 + $0x378] sm:$0xff]  ;;  %v336_v63 = vld [vmem:[%s6101_s4 + $0x8] sm:$0xff] }
  0x3a   : > { %694 = vmatprep.subr.mxu0 %v492_v1  ;;  %612 = vmatpush1.msra.mxu1 %v489_v4  ;;  %v573_v1 = vld [vmem:[%s6098_s1 + $0x360] sm:$0xff]  ;;  %v575_v4 = vld [vmem:[%s6098_s1 + $0x370] sm:$0xff] }
  0x3b   : > { %3211 = vset.pattern.permute.xlu0 %v3331_v18  ;;  %950 = vperm.xlu1 %3198, %v3516_v13  }
  0x3c   : > { %1315 = vperm.xlu0 %3211, %v3516_v13   ;;  %695 = vmatpush1.msra.mxu0 %v491_v5  ;;  %v570_v5 = vld [vmem:[%s6098_s1 + $0x348] sm:$0xff] }
  0x3d   : > { %613 = vmatprep.subr.mxu1 %v486_v7  ;;  %696 = vmatprep.subr.mxu0 %v488_v9  ;;  %v572_v7 = vld [vmem:[%s6098_s1 + $0x358] sm:$0xff]  ;;  %v569_v9 = vld [vmem:[%s6098_s1 + $0x340] sm:$0xff] }
  0x3e   : > { %614 = vmatpush1.msra.mxu1 %v485_v11 }
  0x3f   : > { %3199 = vset.pattern.permute.xlu1 %v3327_v12  ;;  %v487_v12 = vld [vmem:[%s6098_s1 + $0xb0] sm:$0xff]  ;;  %615 = vmatprep.subr.mxu1 %v482_v14  ;;  %v566_v14 = vld [vmem:[%s6098_s1 + $0x328] sm:$0xff] }
  0x40   : > { %3212 = vset.pattern.permute.xlu0 %v3332_v19  ;;  %1015 = vperm.xlu1 %3199, %v3474_v0  }
  0x41   : > { %1380 = vperm.xlu0 %3212, %v3474_v0   ;;  %697 = vmatpush1.msra.mxu0 %v487_v12  ;;  %v571_v12 = vld [vmem:[%s6098_s1 + $0x350] sm:$0xff] }
  0x44   : > { %1023 = vperm.xlu1 %3199, %v3516_v13  }
  0x45   : > { %1388 = vperm.xlu0 %3212, %v3516_v13  }
  0x48   : > { %3202 = vset.pattern.permute.xlu1 %v3328_v15  ;;  %v484_v15 = vld [vmem:[%s6098_s1 + $0x98] sm:$0xff] }
  0x49   : > { %3217 = vset.pattern.permute.xlu0 %v3333_v20  ;;  %1092 = vperm.xlu1 %3202, %v3483_v3  }
  0x4a   : > { %1461 = vperm.xlu0 %3217, %v3516_v13   ;;  %698 = vmatprep.subr.mxu0 %v484_v15  ;;  %v568_v15 = vld [vmem:[%s6098_s1 + $0x338] sm:$0xff] }
  0x4d   : > { %1096 = vperm.xlu1 %3202, %v3516_v13  }
  0x4e   : > { %3220 = vset.pattern.permute.xlu0 %v3334_v23 }
  0x4f   : > { %1534 = vperm.xlu0 %3220, %v3516_v13  }
  0x51   : > { %3203 = vset.pattern.permute.xlu1 %v3329_v16  ;;  %v481_v16 = vld [vmem:[%s6098_s1 + $0x80] sm:$0xff] }
  0x52   : > { %1161 = vperm.xlu1 %3203, %v3474_v0   ;;  %616 = vmatpush1.msra.mxu1 %v481_v16  ;;  %v567_v16 = vld [vmem:[%s6098_s1 + $0x330] sm:$0xff] }
  0x53   : > { %3223 = vset.pattern.permute.xlu0 %v3335_v34  ;;  %617 = vmatprep.subr.mxu1 %v478_v21  ;;  %v564_v21 = vld [vmem:[%s6098_s1 + $0x318] sm:$0xff] }
  0x54   : > { %1607 = vperm.xlu0 %3223, %v3516_v13   ;;  %618 = vmatpush1.msra.mxu1 %v477_v24  ;;  %v561_v24 = vld [vmem:[%s6098_s1 + $0x300] sm:$0xff] }
  0x55   : > { %619 = vmatprep.subr.mxu1 %v474_v26  ;;  %v558_v26 = vld [vmem:[%s6098_s1 + $0x2e8] sm:$0xff] }
  0x56   : > { %1169 = vperm.xlu1 %3203, %v3516_v13   ;;  %620 = vmatpush1.msra.mxu1 %v473_v28  ;;  %v557_v28 = vld [vmem:[%s6098_s1 + $0x2e0] sm:$0xff] }
  0x57   : > { %621 = vmatprep.subr.mxu1 %v470_v30  ;;  %v554_v30 = vld [vmem:[%s6098_s1 + $0x2c8] sm:$0xff] }
  0x58   : > { %3226 = vset.pattern.permute.xlu0 %v3336_v41  ;;  %622 = vmatpush1.msra.mxu1 %v469_v32 }
  0x59   : > { %1680 = vperm.xlu0 %3226, %v3516_v13   ;;  %623 = vmatprep.subr.mxu1 %v466_v36  ;;  %v555_v36 = vld [vmem:[%s6098_s1 + $0x2d0] sm:$0xff] }
  0x5a   : > { %3206 = vset.pattern.permute.xlu1 %v3330_v17  ;;  %v483_v17 = vld [vmem:[%s6098_s1 + $0x90] sm:$0xff]  ;;  %624 = vmatpush1.msra.mxu1 %v465_v38  ;;  %v549_v38 = vld [vmem:[%s6098_s1 + $0x2a0] sm:$0xff] }
  0x5b   : > { %1238 = vperm.xlu1 %3206, %v3483_v3   ;;  %699 = vmatpush1.msra.mxu0 %v483_v17  ;;  %v562_v17 = vld [vmem:[%s6098_s1 + $0x308] sm:$0xff] }
  0x5c   : > { %700 = vmatprep.subr.mxu0 %v480_v22  ;;  %625 = vmatprep.subr.mxu1 %v590_v40  ;;  %v546_v40 = vld [vmem:[%s6098_s1 + $0x288] sm:$0xff] }
  0x5d   : > { %3229 = vset.pattern.permute.xlu0 %v3337_v48  ;;  %701 = vmatpush1.msra.mxu0 %v479_v25  ;;  %v563_v25 = vld [vmem:[%s6098_s1 + $0x310] sm:$0xff] }
  0x5e   : > { %1753 = vperm.xlu0 %3229, %v3516_v13   ;;  %626 = vmatpush2.msra.mxu1 %v589_v43 }
  0x5f   : > { %3207 = vset.pattern.permute.xlu1 %v3331_v18  ;;  %v3341_v18 = vmov 18   ;;  %627 = vmatprep.subr.mxu1 %v586_v45  ;;  %v547_v45 = vld [vmem:[%s6098_s1 + $0x290] sm:$0xff] }
  0x60   : > { %1307 = vperm.xlu1 %3207, %v3474_v0   ;;  %628 = vmatpush2.msra.mxu1 %v585_v47  ;;  %v544_v47 = vld [vmem:[%s6098_s1 + $0x278] sm:$0xff] }
  0x61   : > { %629 = vmatprep.subr.mxu1 %v582_v51  ;;  %v543_v51 = vld [vmem:[%s6098_s1 + $0x270] sm:$0xff] }
  0x62   : > { %3232 = vset.pattern.permute.xlu0 %v3338_v55  ;;  %630 = vmatpush2.msra.mxu1 %v581_v53  ;;  %v540_v53 = vld [vmem:[%s6098_s1 + $0x258] sm:$0xff] }
  0x63   : > { %1826 = vperm.xlu0 %3232, %v3516_v13   ;;  %631 = vmatprep.subr.mxu1 %v578_v56  ;;  %v537_v56 = vld [vmem:[%s6098_s1 + $0x240] sm:$0xff] }
  0x64   : > { %1311 = vperm.xlu1 %3207, %v3483_v3   ;;  %632 = vmatpush2.msra.mxu1 %v577_v58  ;;  %v533_v58 = vld [vmem:[%s6098_s1 + $0x220] sm:$0xff] }
  0x65   : > { %633 = vmatprep.subr.mxu1 %v574_v60  ;;  %v530_v60 = vld [vmem:[%s6098_s1 + $0x208] sm:$0xff] }
  0x66   : > { %634 = vmatpush2.msra.mxu1 %v573_v1  ;;  %v529_v1 = vld [vmem:[%s6098_s1 + $0x200] sm:$0xff] }
  0x67   : > { %3235 = vset.pattern.permute.xlu0 %v3339_v62  ;;  %635 = vmatprep.subr.mxu1 %v570_v5 }
  0x68   : > { %1899 = vperm.xlu0 %3235, %v3516_v13   ;;  %3208 = vset.pattern.permute.xlu1 %v3333_v20 }
  0x69   : > { %1453 = vperm.xlu1 %3208, %v3474_v0   ;;  %636 = vmatpush2.msra.mxu1 %v569_v9 }
  0x6a   : > { %637 = vmatprep.subr.mxu1 %v566_v14 }
  0x6c   : > { %3238 = vset.pattern.permute.xlu0 %v3340_v10 }
  0x6d   : > { %1972 = vperm.xlu0 %3238, %v3516_v13   ;;  %3209 = vset.pattern.permute.xlu1 %v3332_v19  ;;  %v476_v19 = vld [vmem:[%s6098_s1 + $0x58] sm:$0xff] }
  0x6e   : > { %1384 = vperm.xlu1 %3209, %v3483_v3   ;;  %702 = vmatprep.subr.mxu0 %v476_v19  ;;  %v560_v19 = vld [vmem:[%s6098_s1 + $0x2f8] sm:$0xff] }
  0x6f   : > { %703 = vmatpush1.msra.mxu0 %v475_v29  ;;  %v559_v29 = vld [vmem:[%s6098_s1 + $0x2f0] sm:$0xff] }
  0x70   : > { %704 = vmatprep.subr.mxu0 %v472_v31  ;;  %v556_v31 = vld [vmem:[%s6098_s1 + $0x2d8] sm:$0xff] }
  0x71   : > { %3241 = vset.pattern.permute.xlu0 %v3341_v18  ;;  %705 = vmatpush1.msra.mxu0 %v471_v33  ;;  %v553_v33 = vld [vmem:[%s6098_s1 + $0x2c0] sm:$0xff] }
  0x72   : > { %2045 = vperm.xlu0 %3241, %v3516_v13   ;;  %3210 = vset.pattern.permute.xlu1 %v3334_v23 }
  0x73   : > { %1526 = vperm.xlu1 %3210, %v3474_v0   ;;  %706 = vmatprep.subr.mxu0 %v468_v37  ;;  %v550_v37 = vld [vmem:[%s6098_s1 + $0x2a8] sm:$0xff] }
  0x74   : > { %707 = vmatpush1.msra.mxu0 %v467_v39  ;;  %v551_v39 = vld [vmem:[%s6098_s1 + $0x2b0] sm:$0xff] }
  0x76   : > { %3244 = vset.pattern.permute.xlu0 %v3342_v27 }
  0x77   : > { %2118 = vperm.xlu0 %3244, %v3516_v13   ;;  %3213 = vset.pattern.permute.xlu1 %v3333_v20  ;;  %v592_v20 = vld [vmem:[%s6098_s1 + $0x3f8] sm:$0xff] }
  0x78   : > { %1457 = vperm.xlu1 %3213, %v3483_v3   ;;  %708 = vmatprep.subr.mxu0 %v592_v20  ;;  %v548_v20 = vld [vmem:[%s6098_s1 + $0x298] sm:$0xff] }
  0x79   : > { %709 = vmatpush2.msra.mxu0 %v591_v44  ;;  %v545_v44 = vld [vmem:[%s6098_s1 + $0x280] sm:$0xff] }
  0x7a   : > { %710 = vmatprep.subr.mxu0 %v588_v46  ;;  %v542_v46 = vld [vmem:[%s6098_s1 + $0x268] sm:$0xff] }
  0x7b   : > { %3247 = vset.pattern.permute.xlu0 %v3343_v35  ;;  %711 = vmatpush2.msra.mxu0 %v587_v49  ;;  %v541_v49 = vld [vmem:[%s6098_s1 + $0x260] sm:$0xff] }
  0x7c   : > { %2191 = vperm.xlu0 %3247, %v3516_v13   ;;  %3214 = vset.pattern.permute.xlu1 %v3335_v34 }
  0x7d   : > { %1599 = vperm.xlu1 %3214, %v3474_v0   ;;  %712 = vmatprep.subr.mxu0 %v584_v52  ;;  %v538_v52 = vld [vmem:[%s6098_s1 + $0x248] sm:$0xff] }
  0x7e   : > { %713 = vmatpush2.msra.mxu0 %v583_v54 }
  0x80   : > { %3250 = vset.pattern.permute.xlu0 %v3344_v42 }
  0x81   : > { %2279 = vperm.xlu0 %3250, %v3516_v13   ;;  %3215 = vset.pattern.permute.xlu1 %v3334_v23  ;;  %v580_v23 = vld [vmem:[%s6098_s1 + $0x398] sm:$0xff] }
  0x82   : > { %1530 = vperm.xlu1 %3215, %v3483_v3   ;;  %714 = vmatprep.subr.mxu0 %v580_v23  ;;  %v534_v23 = vld [vmem:[%s6098_s1 + $0x228] sm:$0xff] }
  0x83   : > { %715 = vmatpush2.msra.mxu0 %v579_v59  ;;  %v535_v59 = vld [vmem:[%s6098_s1 + $0x230] sm:$0xff] }
  0x84   : > { %716 = vmatprep.subr.mxu0 %v576_v61  ;;  %v532_v61 = vld [vmem:[%s6098_s1 + $0x218] sm:$0xff] }
  0x85   : > { %3253 = vset.pattern.permute.xlu0 %v3345_v50  ;;  %717 = vmatpush2.msra.mxu0 %v575_v4  ;;  %v531_v4 = vld [vmem:[%s6098_s1 + $0x210] sm:$0xff] }
  0x86   : > { %2539 = vperm.xlu0 %3253, %v3483_v3   ;;  %3216 = vset.pattern.permute.xlu1 %v3336_v41 }
  0x87   : > { %1672 = vperm.xlu1 %3216, %v3474_v0   ;;  %718 = vmatprep.subr.mxu0 %v572_v7 }
  0x88   : > { %719 = vmatpush2.msra.mxu0 %v571_v12 }
  0x89   : > { %720 = vmatprep.subr.mxu0 %v568_v15 }
  0x8a   : > { %3254 = vset.pattern.permute.xlu0 %v3325_v6  ;;  %721 = vmatpush2.msra.mxu0 %v567_v16 }
  0x8b   : > { %340 = vperm.xlu0 %3254, %v335_v57   ;;  %3218 = vset.pattern.permute.xlu1 %v3335_v34  ;;  %v565_v34 = vld [vmem:[%s6098_s1 + $0x320] sm:$0xff]  ;;  %v539_v57 = vld [vmem:[%s6098_s1 + $0x250] sm:$0xff] }
  0x8c   : > { %1603 = vperm.xlu1 %3218, %v3483_v3   ;;  %638 = vmatpush2.msra.mxu1 %v565_v34 }
  0x8d   : > { %639 = vmatprep.subr.mxu1 %v562_v17  ;;  %722 = vmatprep.subr.mxu0 %v564_v21  ;;  %v3346_v17 = vmov 22  }
  0x8e   : > { %640 = vmatpush2.msra.mxu1 %v561_v24  ;;  %723 = vmatpush2.msra.mxu0 %v563_v25  ;;  %v3347_v24 = vmov 23  }
  0x8f   : > { %345 = vperm.xlu0 %3254, %v336_v63   ;;  %641 = vmatprep.subr.mxu1 %v558_v26 }
  0x90   : > { %v3859_v11 = vpop.permute.xlu0 %796  ;;  %3219 = vset.pattern.permute.xlu1 %v3337_v48  ;;  %724 = vmatprep.subr.mxu0 %v560_v19 }
  0x91   : > { %1745 = vperm.xlu1 %3219, %v3474_v0   ;;  %642 = vmatpush2.msra.mxu1 %v557_v28 }
  0x92   : > { %725 = vmatpush2.msra.mxu0 %v559_v29  ;;  %643 = vmatprep.subr.mxu1 %v554_v30 }
  0x93   : > { %769 = vperm.xlu0 %3254, %v3483_v3   ;;  %726 = vmatprep.subr.mxu0 %v556_v31 }
  0x94   : > { %644 = vmatpush2.msra.mxu1 %v553_v33  ;;  %727 = vmatpush2.msra.mxu0 %v555_v36  ;;  %v351_v33 = vpop.permute.xlu1 %350 }
  0x95   : > { %v3885_v22 = vpop.permute.xlu0 %873  ;;  %3221 = vset.pattern.permute.xlu1 %v3336_v41  ;;  %v552_v41 = vld [vmem:[%s6098_s1 + $0x2b8] sm:$0xff]  ;;  %645 = vmatprep.subr.mxu1 %v550_v37 }
  0x96   : > { %1676 = vperm.xlu1 %3221, %v3483_v3   ;;  %728 = vmatprep.subr.mxu0 %v552_v41 }
  0x97   : > { %646 = vmatpush2.msra.mxu1 %v549_v38  ;;  %729 = vmatpush2.msra.mxu0 %v551_v39 }
  0x98   : > { %647 = vmatprep.subr.mxu1 %v546_v40  ;;  %730 = vmatprep.subr.mxu0 %v548_v20 }
  0x99   : > { %648 = vmatpush2.msra.mxu1 %v545_v44  ;;  %731 = vmatpush2.msra.mxu0 %v547_v45 }
  0x9a   : > { %v3913_v32 = vpop.permute.xlu0 %942  ;;  %3222 = vset.pattern.permute.xlu1 %v3338_v55  ;;  %649 = vmatprep.subr.mxu1 %v542_v46 }
  0x9b   : > { %1818 = vperm.xlu1 %3222, %v3474_v0   ;;  %732 = vmatprep.subr.mxu0 %v544_v47 }
  0x9c   : > { %650 = vmatpush2.msra.mxu1 %v541_v49  ;;  %733 = vmatpush2.msra.mxu0 %v543_v51 }
  0x9d   : > { %651 = vmatprep.subr.mxu1 %v538_v52  ;;  %734 = vmatprep.subr.mxu0 %v540_v53 }
  0x9e   : > { %652 = vmatpush2.msra.mxu1 %v537_v56  ;;  %735 = vmatpush2.msra.mxu0 %v539_v57 }
  0x9f   : > { %v3941_v43 = vpop.permute.xlu0 %1019  ;;  %3224 = vset.pattern.permute.xlu1 %v3337_v48  ;;  %v536_v48 = vld [vmem:[%s6098_s1 + $0x238] sm:$0xff]  ;;  %653 = vmatprep.subr.mxu1 %v534_v23 }
  0xa0   : > { %1749 = vperm.xlu1 %3224, %v3483_v3   ;;  %736 = vmatprep.subr.mxu0 %v536_v48  ;;  %v4076_v48 = vpop.permute.xlu1 %764 }
  0xa1   : > { %654 = vmatpush2.msra.mxu1 %v533_v58  ;;  %737 = vmatpush2.msra.mxu0 %v535_v59  ;;  %6236 = vst [vmem:[#allocation12_spill] sm:$0xff] %v4076_v48 }
  0xa2   : > { %655 = vmatprep.subr.mxu1 %v530_v60  ;;  %738 = vmatprep.subr.mxu0 %v532_v61 }
  0xa3   : > { %656 = vmatpush2.msra.mxu1 %v529_v1  ;;  %739 = vmatpush2.msra.mxu0 %v531_v4 }
  0xa4   : > { %v3969_v54 = vpop.permute.xlu0 %1088  ;;  %3225 = vset.pattern.permute.xlu1 %v3339_v62  ;;  %v4081_v59 = vpop.permute.xlu1 %774 }
  0xa5   : > { %1891 = vperm.xlu1 %3225, %v3474_v0   ;;  %6237 = vst [vmem:[#allocation13_spill] sm:$0xff] %v4081_v59 }
  0xa9   : > { %v3997_v63 = vpop.permute.xlu0 %1165  ;;  %3227 = vset.pattern.permute.xlu1 %v3338_v55 }
  0xaa   : > { %1822 = vperm.xlu1 %3227, %v3483_v3  }
  0xae   : > { %v4007_v5 = vpop.permute.xlu0 %1234  ;;  %3228 = vset.pattern.permute.xlu1 %v3340_v10 }
  0xaf   : > { %1964 = vperm.xlu1 %3228, %v3474_v0  }
  0xb2   : > { %v4011_v7 = vpop.permute.xlu0 %1242 }
  0xb3   : > { %3230 = vset.pattern.permute.xlu1 %v3339_v62 }
  0xb4   : > { %1895 = vperm.xlu1 %3230, %v3483_v3  }
  0xb7   : > { %v4015_v9 = vpop.permute.xlu0 %1315 }
  0xb8   : > { %3231 = vset.pattern.permute.xlu1 %v3341_v18 }
  0xb9   : > { %2037 = vperm.xlu1 %3231, %v3474_v0  }
  0xbc   : > { %v4019_v12 = vpop.permute.xlu0 %1380 }
  0xbd   : > { %3233 = vset.pattern.permute.xlu1 %v3340_v10 }
  0xbe   : > { %1968 = vperm.xlu1 %3233, %v3483_v3  }
  0xc0   : > { %v4023_v55 = vpop.permute.xlu0 %1388 }
  0xc2   : > { %3234 = vset.pattern.permute.xlu1 %v3342_v27 }
  0xc3   : > { %2110 = vperm.xlu1 %3234, %v3474_v0  }
  0xc5   : > { %v4027_v14 = vpop.permute.xlu0 %1461 }
  0xc7   : > { %3236 = vset.pattern.permute.xlu1 %v3341_v18 }
  0xc8   : > { %2041 = vperm.xlu1 %3236, %v3483_v3  }
  0xca   : > { %v4031_v62 = vpop.permute.xlu0 %1534 }
  0xcc   : > { %3237 = vset.pattern.permute.xlu1 %v3343_v35 }
  0xcd   : > { %2183 = vperm.xlu1 %3237, %v3474_v0  }
  0xcf   : > { %v4035_v15 = vpop.permute.xlu0 %1607 }
  0xd1   : > { %3239 = vset.pattern.permute.xlu1 %v3342_v27 }
  0xd2   : > { %2114 = vperm.xlu1 %3239, %v3483_v3  }
  0xd4   : > { %v4039_v10 = vpop.permute.xlu0 %1680 }
  0xd6   : > { %3240 = vset.pattern.permute.xlu1 %v3344_v42 }
  0xd7   : > { %2271 = vperm.xlu1 %3240, %v3474_v0  }
  0xd9   : > { %v4043_v34 = vpop.permute.xlu0 %1753 }
  0xdb   : > { %3242 = vset.pattern.permute.xlu1 %v3343_v35 }
  0xdc   : > { %2187 = vperm.xlu1 %3242, %v3483_v3  }
  0xde   : > { %v4047_v18 = vpop.permute.xlu0 %1826  ;;  %v436_v35 = vpop.f32.mrf.mxu0 }
  0xe0   : > { %3243 = vset.pattern.permute.xlu1 %v3346_v17  ;;  %v438_v26 = vpop.f32.mrf.mxu0 }
  0xe1   : > { %2359 = vperm.xlu1 %3243, %v3474_v0  }
  0xe2   : > { %v442_v28 = vpop.f32.mrf.mxu0 }
  0xe3   : > { %v4051_v16 = vpop.permute.xlu0 %1899 }
  0xe5   : > { %3245 = vset.pattern.permute.xlu1 %v3344_v42  ;;  %v444_v42 = vpop.f32.mrf.mxu0 }
  0xe6   : > { %2275 = vperm.xlu1 %3245, %v3483_v3  }
  0xe7   : > { %v448_v30 = vpop.f32.mrf.mxu0 }
  0xe8   : > { %v4054_v27 = vpop.permute.xlu0 %1972  ;;  %v449_v44 = vadd.f32 %v448_v30, %v351_v33 }
  0xe9   : > { %6230 = vst [vmem:[#allocation6_spill] sm:$0xff] %v4054_v27  ;;  %v450_v36 = vpop.f32.mrf.mxu0 }
  0xea   : > { %3246 = vset.pattern.permute.xlu1 %v3347_v24  ;;  %v451_v41 = vadd.f32 %v450_v36, %v351_v33  ;;  %v457_v53 = vmax.f32 %v449_v44, 0.0 }
  0xeb   : > { %2447 = vperm.xlu1 %3246, %v3474_v0  }
  0xec   : > { %v458_v45 = vmax.f32 %v451_v41, 0.0  ;;  %v463_v58 = vmin.f32 %v457_v53, 6.0 }
  0xed   : > { %v4058_v21 = vpop.permute.xlu0 %2045 }
  0xee   : > { %6231 = vst [vmem:[#allocation7_spill] sm:$0xff] %v4058_v21  ;;  %v464_v57 = vmin.f32 %v458_v45, 6.0 }
  0xef   : > { %3248 = vset.pattern.permute.xlu1 %v3346_v17 }
  0xf0   : > { %2363 = vperm.xlu1 %3248, %v3483_v3  }
  0xf2   : > { %v4061_v25 = vpop.permute.xlu0 %2118 }
  0xf3   : > { %6232 = vst [vmem:[#allocation8_spill] sm:$0xff] %v4061_v25 }
  0xf4   : > { %3249 = vset.pattern.permute.xlu1 %v3345_v50 }
  0xf5   : > { %2535 = vperm.xlu1 %3249, %v3474_v0  }
  0xf7   : > { %v4064_v19 = vpop.permute.xlu0 %2191 }
  0xf8   : > { %6233 = vst [vmem:[#allocation9_spill] sm:$0xff] %v4064_v19 }
  0xf9   : > { %3251 = vset.pattern.permute.xlu1 %v3347_v24 }
  0xfa   : > { %2451 = vperm.xlu1 %3251, %v3483_v3  }
  0xfc   : > { %v4068_v29 = vpop.permute.xlu0 %2279 }
  0xfd   : > { %6234 = vst [vmem:[#allocation10_spill] sm:$0xff] %v4068_v29 }
  0xfe   : > { %3252 = vset.pattern.permute.xlu1 %v3346_v17 }
  0xff   : > { %2367 = vperm.xlu1 %3252, %v3516_v13  }
 0x101   : > { %v4071_v31 = vpop.permute.xlu0 %2539 }
 0x102   : > { %6235 = vst [vmem:[#allocation11_spill] sm:$0xff] %v4071_v31 }
 0x103   : > { %3255 = vset.pattern.permute.xlu1 %v3347_v24 }
 0x104   : > { %2455 = vperm.xlu1 %3255, %v3516_v13  }
 0x106   : > { %v341_v37 = vpop.permute.xlu0 %340 }
 0x107   : > { %v437_v38 = vadd.f32 %v436_v35, %v341_v37  ;;  %v439_v39 = vadd.f32 %v438_v26, %v341_v37 }
 0x108   : > { %3256 = vset.pattern.permute.xlu1 %v3345_v50  ;;  %v4083_v50 = vpop.permute.xlu1 %800 }
 0x109   : > { %v453_v0 = vmax.f32 %v437_v38, 0.0  ;;  %v454_v40 = vmax.f32 %v439_v39, 0.0  ;;  %2543 = vperm.xlu1 %3256, %v3516_v13  }
 0x10a   : > { %v346_v20 = vpop.permute.xlu0 %345 }
 0x10b   : > { %v443_v3 = vadd.f32 %v442_v28, %v346_v20  ;;  %v445_v46 = vadd.f32 %v444_v42, %v346_v20  ;;  %v460_v47 = vmin.f32 %v454_v40, 6.0  ;;  %v459_v49 = vmin.f32 %v453_v0, 6.0 }
 0x10c   : > { %v4085_v60 = vpop.permute.xlu1 %804 }
 0x10d   : > { %v455_v51 = vmax.f32 %v443_v3, 0.0  ;;  %v456_v52 = vmax.f32 %v445_v46, 0.0  ;;  %657 = vmatprep.mubr.f32.mxu1 %v460_v47  ;;  %740 = vmatprep.mubr.f32.mxu0 %v460_v47 }
 0x10e   : > { %658 = vmatmul.mubr.f32.vlgmr.msra.gmra.mxu1 %v459_v49  ;;  %741 = vmatmul.mubr.f32.vlgmr.msra.gmra.mxu0 %v459_v49 }
 0x10f   : > { %v462_v56 = vmin.f32 %v456_v52, 6.0  ;;  %v461_v23 = vmin.f32 %v455_v51, 6.0  ;;  %3257 = vset.pattern.permute.xlu1 %v3325_v6 }
 0x110   : > { %v4087_v13 = vpop.permute.xlu1 %869 }
 0x111   : > { %663 = vmatprep.mubr.f32.mxu1 %v462_v56  ;;  %746 = vmatprep.mubr.f32.mxu0 %v462_v56 }
 0x112   : > { %664 = vmatmul.mubr.f32.gmra.mxu1 %v461_v23  ;;  %747 = vmatmul.mubr.f32.gmra.mxu0 %v461_v23 }
 0x113   : > { %669 = vmatprep.mubr.f32.mxu1 %v464_v57  ;;  %752 = vmatprep.mubr.f32.mxu0 %v464_v57 }
 0x114   : > { %v4089_v61 = vpop.permute.xlu1 %877 }
 0x116   : > { %670 = vmatmul.mubr.f32.gmra.mxu1 %v463_v58  ;;  %753 = vmatmul.mubr.f32.gmra.mxu0 %v463_v58 }
 0x117   : > { %2883 = vmatprep.mubr.f32.mxu0 %v6107_v2 }
 0x118   : > { %v4091_v1 = vpop.permute.xlu1 %946 }
 0x11c   : > { %v4093_v4 = vpop.permute.xlu1 %950 }
 0x120   : > { %v4095_v17 = vpop.permute.xlu1 %1015 }
 0x124   : > { %v4097_v6 = vpop.permute.xlu1 %1023 }
 0x128   : > { %v4099_v24 = vpop.permute.xlu1 %1092 }
 0x12c   : > { %v4101_v35 = vpop.permute.xlu1 %1096 }
 0x130   : > { %v4103_v26 = vpop.permute.xlu1 %1161 }
 0x134   : > { %v4105_v28 = vpop.permute.xlu1 %1169 }
 0x138   : > { %v4107_v42 = vpop.permute.xlu1 %1238 }
 0x13c   : > { %v4109_v30 = vpop.permute.xlu1 %1307 }
 0x140   : > { %v4111_v33 = vpop.permute.xlu1 %1311 }
 0x144   : > { %v4113_v36 = vpop.permute.xlu1 %1453 }
 0x148   : > { %v4115_v37 = vpop.permute.xlu1 %1384 }
 0x14c   : > { %v4117_v41 = vpop.permute.xlu1 %1526 }
 0x150   : > { %v4119_v38 = vpop.permute.xlu1 %1457 }
 0x154   : > { %v4121_v39 = vpop.permute.xlu1 %1599 }
 0x158   : > { %v4123_v0 = vpop.permute.xlu1 %1530 }
 0x15c   : > { %v4125_v40 = vpop.permute.xlu1 %1672 }
 0x160   : > { %v4127_v20 = vpop.permute.xlu1 %1603 }
 0x164   : > { %v4129_v44 = vpop.permute.xlu1 %1745 }
 0x168   : > { %v4131_v45 = vpop.permute.xlu1 %1676 }
 0x16c   : > { %v4133_v3 = vpop.permute.xlu1 %1818 }
 0x170   : > { %v4135_v46 = vpop.permute.xlu1 %1749 }
 0x174   : > { %v4137_v47 = vpop.permute.xlu1 %1891 }
 0x178   : > { %v4141_v51 = vpop.permute.xlu1 %1822 }
 0x17c   : > { %v4155_v58 = vpop.permute.xlu1 %1964 }
 0x1ce   : > { %v4139_v49 = vpop.f32.mrf.mxu1  ;;  %v4147_v56 = vpop.f32.mrf.mxu0 }
 0x1cf   : > { %6238 = vst [vmem:[#allocation14_spill] sm:$0xff] %v4139_v49  ;;  %v880_v52 = vmul.f32 %v4087_v13, %v4139_v49  ;;  %v807_v53 = vmul.f32 %v3859_v11, %v4139_v49  ;;  %v882_v57 = vmul.f32 %v4087_v13, %v4147_v56  ;;  %v809_v23 = vmul.f32 %v3859_v11, %v4147_v56 }
 0x1d0   : > { %v1026_v2 = vmul.f32 %v4095_v17, %v4139_v49  ;;  %v1028_v8 = vmul.f32 %v4095_v17, %v4147_v56  ;;  %v1247_v29 = vmul.f32 %v4007_v5, %v4147_v56  ;;  %v1393_v19 = vmul.f32 %v4019_v12, %v4147_v56  ;;  %v4229_v21 = vpop.f32.mrf.mxu1 }
 0x1d1   : > { %898 = vrot.lane.b32.xlu1 %v880_v52, %s3348_s24  ;;  %825 = vrot.lane.b32.xlu0 %v807_v53, %s6146_s25  ;;  %v953_v52 = vmul.f32 %v3913_v32, %v4139_v49  ;;  %v4165_v53 = vpop.permute.xlu1 %1895  ;;  %v1391_v25 = vmul.f32 %v4019_v12, %v4139_v49  ;;  %v1610_v27 = vmul.f32 %v4121_v39, %v4139_v49 }
 0x1d5   : > { %902 = vrot.lane.b32.xlu1 %v882_v57, %s3348_s24  ;;  %829 = vrot.lane.b32.xlu0 %v809_v23, %s6146_s25  ;;  %v955_v57 = vmul.f32 %v3913_v32, %v4147_v56  ;;  %v1172_v23 = vmul.f32 %v4103_v26, %v4139_v49  ;;  %v4177_v31 = vpop.permute.xlu1 %2037 }
 0x1d9   : > { %1044 = vrot.lane.b32.xlu1 %v1026_v2, %s6149_s26  ;;  %971 = vrot.lane.b32.xlu0 %v953_v52, %s6119_s27  ;;  %v1099_v2 = vmul.f32 %v3969_v54, %v4139_v49  ;;  %v1174_v52 = vmul.f32 %v4103_v26, %v4147_v56 }
 0x1dd   : > { %1048 = vrot.lane.b32.xlu1 %v1028_v8, %s6149_s26  ;;  %975 = vrot.lane.b32.xlu0 %v955_v57, %s6119_s27  ;;  %v1101_v8 = vmul.f32 %v3969_v54, %v4147_v56  ;;  %v4187_v57 = vpop.permute.xlu1 %1968  ;;  %s6130_s27 = smov 84  }
 0x1e1   : > { %1190 = vrot.lane.b32.xlu1 %v1172_v23, %s6137_s28  ;;  %1117 = vrot.lane.b32.xlu0 %v1099_v2, %s6116_s29  ;;  %v1245_v23 = vmul.f32 %v4007_v5, %v4139_v49  ;;  %v1318_v2 = vmul.f32 %v4109_v30, %v4139_v49 }
 0x1e5   : > { %1194 = vrot.lane.b32.xlu1 %v1174_v52, %s6137_s28  ;;  %1121 = vrot.lane.b32.xlu0 %v1101_v8, %s6116_s29  ;;  %v1320_v52 = vmul.f32 %v4109_v30, %v4147_v56  ;;  %v4199_v8 = vpop.permute.xlu1 %2110  ;;  %s6132_s29 = smov 85  }
 0x1e9   : > { %1267 = vrot.lane.b32.xlu1 %v1247_v29, %s6124_s14  ;;  %1263 = vrot.lane.b32.xlu0 %v1245_v23, %s6124_s14  ;;  %v1537_v29 = vmul.f32 %v4117_v41, %v4139_v49  ;;  %v4209_v23 = vpop.permute.xlu1 %2041 }
 0x1ed   : > { %1336 = vrot.lane.b32.xlu1 %v1318_v2, %s6114_s17  ;;  %1340 = vrot.lane.b32.xlu0 %v1320_v52, %s6114_s17  ;;  %v1612_v2 = vmul.f32 %v4121_v39, %v4147_v56  ;;  %v1466_v52 = vmul.f32 %v4113_v36, %v4147_v56  ;;  %s6128_s17 = smov 88  }
 0x1f1   : > { %1413 = vrot.lane.b32.xlu1 %v1393_v19, %s6126_s21  ;;  %1555 = vrot.lane.b32.xlu0 %v1537_v29, %s3357_s22  ;;  %v1683_v19 = vmul.f32 %v4125_v40, %v4139_v49  ;;  %v4221_v29 = vpop.permute.xlu1 %2183 }
 0x1f5   : > { %1409 = vrot.lane.b32.xlu1 %v1391_v25, %s6126_s21  ;;  %1632 = vrot.lane.b32.xlu0 %v1612_v2, %s6151_s23  ;;  %v1464_v25 = vmul.f32 %v4113_v36, %v4139_v49  ;;  %v1758_v2 = vmul.f32 %v4129_v44, %v4147_v56  ;;  %v4233_v59 = vpop.permute.xlu1 %2114 }
 0x1f9   : > { %1486 = vrot.lane.b32.xlu1 %v1466_v52, %s6128_s17  ;;  %1701 = vrot.lane.b32.xlu0 %v1683_v19, %s6132_s29  ;;  %v1539_v52 = vmul.f32 %v4117_v41, %v4147_v56  ;;  %v881_v19 = vmul.f32 %v4087_v13, %v4229_v21  ;;  %v4245_v48 = vpop.permute.xlu1 %2271  ;;  %v1173_v13 = vmul.f32 %v4103_v26, %v4229_v21 }
 0x1fa   : > { %v808_v26 = vmul.f32 %v3859_v11, %v4229_v21  ;;  %v1538_v11 = vmul.f32 %v4117_v41, %v4229_v21 }
 0x1fd   : > { %1482 = vrot.lane.b32.xlu1 %v1464_v25, %s6128_s17  ;;  %1778 = vrot.lane.b32.xlu0 %v1758_v2, %s6130_s27  ;;  %v1027_v25 = vmul.f32 %v4095_v17, %v4229_v21  ;;  %v1685_v2 = vmul.f32 %v4125_v40, %v4147_v56  ;;  %v1756_v17 = vmul.f32 %v4129_v44, %v4139_v49 }
 0x201   : > { %1559 = vrot.lane.b32.xlu1 %v1539_v52, %s3357_s22  ;;  %900 = vrot.lane.b32.xlu0 %v881_v19, %s3348_s24  ;;  %v4255_v52 = vpop.permute.xlu1 %2187  ;;  %v1392_v19 = vmul.f32 %v4019_v12, %v4229_v21 }
 0x202   : > { %6239 = vst [vmem:[#allocation15_spill] sm:$0xff] %v4255_v52 }
 0x205   : > { %1628 = vrot.lane.b32.xlu1 %v1610_v27, %s6151_s23  ;;  %1046 = vrot.lane.b32.xlu0 %v1027_v25, %s6149_s26  ;;  %v1246_v27 = vmul.f32 %v4007_v5, %v4229_v21  ;;  %v4267_v25 = vpop.permute.xlu1 %2359  ;;  %v954_v5 = vmul.f32 %v3913_v32, %v4229_v21  ;;  %v1319_v32 = vmul.f32 %v4109_v30, %v4229_v21 }
 0x206   : > { %6240 = vst [vmem:[#allocation16_spill] sm:$0xff] %v4267_v25 }
 0x209   : > { %1705 = vrot.lane.b32.xlu1 %v1685_v2, %s6132_s29  ;;  %1192 = vrot.lane.b32.xlu0 %v1173_v13, %s6137_s28  ;;  %v1465_v2 = vmul.f32 %v4113_v36, %v4229_v21  ;;  %v4277_v12 = vpop.permute.xlu1 %2275  ;;  %v1100_v13 = vmul.f32 %v3969_v54, %v4229_v21  ;;  %v1684_v36 = vmul.f32 %v4125_v40, %v4229_v21 }
 0x20a   : > { %6242 = vst [vmem:[#allocation17_spill] sm:$0xff] %v4277_v12  ;;  %v1611_v54 = vmul.f32 %v4121_v39, %v4229_v21 }
 0x20d   : > { %1774 = vrot.lane.b32.xlu1 %v1756_v17, %s6130_s27  ;;  %1265 = vrot.lane.b32.xlu0 %v1246_v27, %s6124_s14  ;;  %s6241_s14 = smov 125   ;;  %v4289_v17 = vpop.f32.mrf.mxu0  ;;  %v4291_v27 = vpop.f32.mrf.mxu1 }
 0x20e   : > { %6244 = vst [vmem:[#allocation18_spill] sm:$0xff] %v4289_v17  ;;  %v883_v41 = vmul.f32 %v3885_v22, %v4291_v27  ;;  %v1029_v39 = vmul.f32 %v3941_v43, %v4291_v27 }
 0x20f   : > { %v4301_v40 = vpop.f32.mrf.mxu0 }
 0x210   : > { %6247 = vst [vmem:[#allocation20_spill] sm:$0xff] %v4301_v40 }
 0x211   : > { %1411 = vrot.lane.b32.xlu0 %v1392_v19, %s6126_s21  ;;  %827 = vrot.lane.b32.xlu1 %v808_v26, %s6146_s25  ;;  %s6243_s21 = smov 108   ;;  %v4293_v19 = vpop.permute.xlu1 %2447  ;;  %v1757_v26 = vmul.f32 %v4129_v44, %v4229_v21  ;;  %v1031_v44 = vmul.f32 %v3941_v43, %v4301_v40 }
 0x212   : > { %6245 = vst [vmem:[#allocation19_spill] sm:$0xff] %v4293_v19 }
 0x215   : > { %1484 = vrot.lane.b32.xlu0 %v1465_v2, %s6128_s17  ;;  %973 = vrot.lane.b32.xlu1 %v954_v5, %s6241_s14  ;;  %s6246_s17 = smov 105   ;;  %v4305_v30 = vpop.permute.xlu1 %2363  ;;  %v885_v2 = vmul.f32 %v3885_v22, %v4301_v40  ;;  %v810_v5 = vmul.f32 %v4083_v50, %v4291_v27 }
 0x216   : > { %6248 = vst [vmem:[#allocation21_spill] sm:$0xff] %v4305_v30  ;;  %v4395_v30 = vpop.f32.mrf.mxu1 }
 0x217   : > { %6258 = vst [vmem:[#allocation28_spill] sm:$0xff] %v4395_v30 }
 0x219   : > { %1557 = vrot.lane.b32.xlu0 %v1538_v11, %s3357_s22  ;;  %1119 = vrot.lane.b32.xlu1 %v1100_v13, %s6243_s21  ;;  %v4317_v11 = vpop.permute.xlu1 %2535  ;;  %v812_v13 = vmul.f32 %v4083_v50, %v4301_v40 }
 0x21a   : > { %6249 = vst [vmem:[#allocation22_spill] sm:$0xff] %v4317_v11 }
 0x21d   : > { %1703 = vrot.lane.b32.xlu0 %v1684_v36, %s6132_s29  ;;  %1338 = vrot.lane.b32.xlu1 %v1319_v32, %s6246_s17  ;;  %v4327_v36 = vpop.permute.xlu1 %2451  ;;  %v1175_v32 = vmul.f32 %v3997_v63, %v4291_v27  ;;  %s6255_s29 = smov 88  }
 0x21e   : > { %6250 = vst [vmem:[#allocation23_spill] sm:$0xff] %v4327_v36 }
 0x221   : > { %1630 = vrot.lane.b32.xlu1 %v1611_v54, %s6151_s23  ;;  %904 = vrot.lane.b32.xlu0 %v883_v41, %s3348_s24  ;;  %v956_v54 = vmul.f32 %v4091_v1, %v4291_v27  ;;  %v4335_v41 = vpop.permute.xlu1 %2367 }
 0x222   : > { %6251 = vst [vmem:[#allocation24_spill] sm:$0xff] %v4335_v41 }
 0x225   : > { %1776 = vrot.lane.b32.xlu1 %v1757_v26, %s6130_s27  ;;  %908 = vrot.lane.b32.xlu0 %v885_v2, %s3348_s24  ;;  %v1177_v26 = vmul.f32 %v3997_v63, %v4301_v40  ;;  %v958_v2 = vmul.f32 %v4091_v1, %v4301_v40  ;;  %s6253_s27 = smov 106  }
 0x229   : > { %1050 = vrot.lane.b32.xlu0 %v1029_v39, %s6149_s26  ;;  %831 = vrot.lane.b32.xlu1 %v810_v5, %s6146_s25  ;;  %v1248_v39 = vmul.f32 %v4107_v42, %v4291_v27  ;;  %v1102_v5 = vmul.f32 %v4099_v24, %v4291_v27 }
 0x22d   : > { %1054 = vrot.lane.b32.xlu0 %v1031_v44, %s6149_s26  ;;  %835 = vrot.lane.b32.xlu1 %v812_v13, %s6146_s25  ;;  %v4347_v44 = vpop.permute.xlu1 %2455  ;;  %v1321_v13 = vmul.f32 %v4111_v33, %v4291_v27 }
 0x22e   : > { %6252 = vst [vmem:[#allocation25_spill] sm:$0xff] %v4347_v44 }
 0x231   : > { %1196 = vrot.lane.b32.xlu0 %v1175_v32, %s6137_s28  ;;  %977 = vrot.lane.b32.xlu1 %v956_v54, %s6241_s14  ;;  %v1104_v32 = vmul.f32 %v4099_v24, %v4301_v40  ;;  %v4357_v54 = vpop.permute.xlu0 %769 }
 0x235   : > { %1200 = vrot.lane.b32.xlu0 %v1177_v26, %s6137_s28  ;;  %981 = vrot.lane.b32.xlu1 %v958_v2, %s6241_s14  ;;  %v4359_v26 = vpop.permute.xlu1 %2543  ;;  %v1469_v2 = vmul.f32 %v4119_v38, %v4301_v40  ;;  %s6256_s28 = smov 104  }
 0x236   : > { %6254 = vst [vmem:[#allocation26_spill] sm:$0xff] %v4359_v26 }
 0x239   : > { %1269 = vrot.lane.b32.xlu0 %v1248_v39, %s6253_s27  ;;  %1123 = vrot.lane.b32.xlu1 %v1102_v5, %s6243_s21  ;;  %v1250_v39 = vmul.f32 %v4107_v42, %v4301_v40 }
 0x23d   : > { %1342 = vrot.lane.b32.xlu0 %v1321_v13, %s6246_s17  ;;  %1127 = vrot.lane.b32.xlu1 %v1104_v32, %s6243_s21  ;;  %v1467_v13 = vmul.f32 %v4119_v38, %v4291_v27  ;;  %v1323_v32 = vmul.f32 %v4111_v33, %v4301_v40 }
 0x241   : > { %1492 = vrot.lane.b32.xlu0 %v1469_v2, %s6255_s29  ;;  %1273 = vrot.lane.b32.xlu1 %v1250_v39, %s6253_s27  ;;  %v1615_v2 = vmul.f32 %v4127_v20, %v4301_v40  ;;  %v1396_v39 = vmul.f32 %v4115_v37, %v4301_v40 }
 0x243   : > { %v4367_v5 = vpop.permute.xlu1 %898  ;;  %v4369_v44 = vpop.permute.xlu0 %825 }
 0x245   : > { %1488 = vrot.lane.b32.xlu0 %v1467_v13, %s6255_s29  ;;  %1346 = vrot.lane.b32.xlu1 %v1323_v32, %s6246_s17  ;;  %v1613_v13 = vmul.f32 %v4127_v20, %v4291_v27  ;;  %v1394_v32 = vmul.f32 %v4115_v37, %v4291_v27 }
 0x247   : > { %v4377_v26 = vpop.permute.xlu1 %902  ;;  %v4379_v41 = vpop.permute.xlu0 %829 }
 0x249   : > { %1638 = vrot.lane.b32.xlu0 %v1615_v2, %s6151_s23  ;;  %1419 = vrot.lane.b32.xlu1 %v1396_v39, %s6256_s28  ;;  %v1542_v39 = vmul.f32 %v4123_v0, %v4301_v40 }
 0x24b   : > { %v4387_v36 = vpop.permute.xlu1 %1044  ;;  %v4389_v11 = vpop.permute.xlu0 %971 }
 0x24c   : > { %6257 = vst [vmem:[#allocation27_spill] sm:$0xff] %v4387_v36  ;;  %v811_v36 = vmul.f32 %v4083_v50, %v4395_v30 }
 0x24d   : > { %1634 = vrot.lane.b32.xlu0 %v1613_v13, %s6151_s23  ;;  %1415 = vrot.lane.b32.xlu1 %v1394_v32, %s6256_s28  ;;  %v1540_v13 = vmul.f32 %v4123_v0, %v4291_v27  ;;  %v957_v32 = vmul.f32 %v4091_v1, %v4395_v30 }
 0x24f   : > { %v4399_v19 = vpop.permute.xlu1 %1048  ;;  %v4401_v2 = vpop.permute.xlu0 %975 }
 0x251   : > { %1565 = vrot.lane.b32.xlu1 %v1542_v39, %s3357_s22  ;;  %833 = vrot.lane.b32.xlu0 %v811_v36, %s6146_s25  ;;  %v884_v36 = vmul.f32 %v3885_v22, %v4395_v30  ;;  %v1103_v39 = vmul.f32 %v4099_v24, %v4395_v30  ;;  %s6264_s25 = smov 107  }
 0x253   : > { %v4409_v12 = vpop.permute.xlu1 %1190  ;;  %v4411_v25 = vpop.permute.xlu0 %1117 }
 0x254   : > { %6259 = vst [vmem:[#allocation29_spill] sm:$0xff] %v4409_v12 }
 0x255   : > { %1561 = vrot.lane.b32.xlu1 %v1540_v13, %s3357_s22  ;;  %979 = vrot.lane.b32.xlu0 %v957_v32, %s6241_s14  ;;  %v1030_v13 = vmul.f32 %v3941_v43, %v4395_v30  ;;  %v1249_v32 = vmul.f32 %v4107_v42, %v4395_v30 }
 0x257   : > { %v4419_v52 = vpop.permute.xlu1 %1194  ;;  %v4421_v50 = vpop.permute.xlu0 %1121 }
 0x259   : > { %906 = vrot.lane.b32.xlu1 %v884_v36, %s3348_s24  ;;  %1125 = vrot.lane.b32.xlu0 %v1103_v39, %s6243_s21  ;;  %v1176_v36 = vmul.f32 %v3997_v63, %v4395_v30  ;;  %v1322_v39 = vmul.f32 %v4111_v33, %v4395_v30 }
 0x25b   : > { %v4429_v12 = vpop.permute.xlu1 %1267  ;;  %v4431_v1 = vpop.permute.xlu0 %1263 }
 0x25c   : > { %6260 = vst [vmem:[#allocation30_spill] sm:$0xff] %v4429_v12  ;;  %6261 = vst [vmem:[#allocation31_spill] sm:$0xff] %v4431_v1 }
 0x25d   : > { %1052 = vrot.lane.b32.xlu1 %v1030_v13, %s6149_s26  ;;  %1271 = vrot.lane.b32.xlu0 %v1249_v32, %s6253_s27  ;;  %v1468_v13 = vmul.f32 %v4119_v38, %v4395_v30  ;;  %v1395_v32 = vmul.f32 %v4115_v37, %v4395_v30  ;;  %v4469_v38 = vpop.f32.mrf.mxu1  ;;  %s6274_s26 = smov 127  }
 0x25e   : > { %6270 = vst [vmem:[#allocation39_spill] sm:$0xff] %v4469_v38 }
 0x25f   : > { %v4439_v22 = vpop.permute.xlu1 %1336  ;;  %v4441_v24 = vpop.permute.xlu0 %1340 }
 0x260   : > { %6262 = vst [vmem:[#allocation32_spill] sm:$0xff] %v4439_v22  ;;  %6263 = vst [vmem:[#allocation33_spill] sm:$0xff] %v4441_v24 }
 0x261   : > { %1198 = vrot.lane.b32.xlu1 %v1176_v36, %s6264_s25  ;;  %1344 = vrot.lane.b32.xlu0 %v1322_v39, %s6246_s17  ;;  %v1614_v36 = vmul.f32 %v4127_v20, %v4395_v30  ;;  %v1541_v39 = vmul.f32 %v4123_v0, %v4395_v30  ;;  %v813_v20 = vmul.f32 %v4085_v60, %v4469_v38 }
 0x263   : > { %v4449_v43 = vpop.permute.xlu1 %1413  ;;  %v4451_v42 = vpop.permute.xlu0 %1555 }
 0x264   : > { %6265 = vst [vmem:[#allocation34_spill] sm:$0xff] %v4449_v43  ;;  %6266 = vst [vmem:[#allocation35_spill] sm:$0xff] %v4451_v42  ;;  %v4467_v42 = vpop.f32.mrf.mxu0 }
 0x265   : > { %1490 = vrot.lane.b32.xlu1 %v1468_v13, %s6255_s29  ;;  %1417 = vrot.lane.b32.xlu0 %v1395_v32, %s6256_s28  ;;  %6269 = vst [vmem:[#allocation38_spill] sm:$0xff] %v4467_v42  ;;  %v886_v32 = vmul.f32 %v4089_v61, %v4469_v38 }
 0x267   : > { %v4459_v63 = vpop.permute.xlu1 %1409  ;;  %v4461_v33 = vpop.permute.xlu0 %1632 }
 0x268   : > { %6267 = vst [vmem:[#allocation36_spill] sm:$0xff] %v4459_v63  ;;  %6268 = vst [vmem:[#allocation37_spill] sm:$0xff] %v4461_v33  ;;  %v4481_v33 = vpop.f32.mrf.mxu0 }
 0x269   : > { %1636 = vrot.lane.b32.xlu1 %v1614_v36, %s6151_s23  ;;  %1563 = vrot.lane.b32.xlu0 %v1541_v39, %s3357_s22  ;;  %6273 = vst [vmem:[#allocation42_spill] sm:$0xff] %v4481_v33  ;;  %v888_v39 = vmul.f32 %v4089_v61, %v4481_v33  ;;  %s6278_s23 = smov 124  }
 0x26b   : > { %v4473_v37 = vpop.permute.xlu1 %1486  ;;  %v4475_v13 = vpop.permute.xlu0 %1701 }
 0x26c   : > { %6271 = vst [vmem:[#allocation40_spill] sm:$0xff] %v4473_v37  ;;  %6272 = vst [vmem:[#allocation41_spill] sm:$0xff] %v4475_v13  ;;  %v815_v13 = vmul.f32 %v4085_v60, %v4481_v33 }
 0x26d   : > { %910 = vrot.lane.b32.xlu1 %v886_v32, %s3348_s24  ;;  %837 = vrot.lane.b32.xlu0 %v813_v20, %s6274_s26  ;;  %v1032_v32 = vmul.f32 %v4097_v6, %v4469_v38  ;;  %v959_v20 = vmul.f32 %v4093_v4, %v4469_v38 }
 0x26f   : > { %v4485_v0 = vpop.permute.xlu1 %1482  ;;  %v4487_v36 = vpop.permute.xlu0 %1778 }
 0x270   : > { %6275 = vst [vmem:[#allocation43_spill] sm:$0xff] %v4485_v0  ;;  %6276 = vst [vmem:[#allocation44_spill] sm:$0xff] %v4487_v36 }
 0x271   : > { %914 = vrot.lane.b32.xlu1 %v888_v39, %s3348_s24  ;;  %841 = vrot.lane.b32.xlu0 %v815_v13, %s6274_s26  ;;  %v1034_v13 = vmul.f32 %v4097_v6, %v4481_v33  ;;  %v961_v39 = vmul.f32 %v4093_v4, %v4481_v33 }
 0x273   : > { %v4495_v63 = vpop.permute.xlu1 %1559  ;;  %v4497_v22 = vpop.permute.xlu0 %900 }
 0x274   : > { %6277 = vst [vmem:[#allocation45_spill] sm:$0xff] %v4495_v63 }
 0x275   : > { %1056 = vrot.lane.b32.xlu1 %v1032_v32, %s6278_s23  ;;  %983 = vrot.lane.b32.xlu0 %v959_v20, %s6241_s14  ;;  %v1178_v32 = vmul.f32 %v4105_v28, %v4469_v38  ;;  %v1105_v20 = vmul.f32 %v4101_v35, %v4469_v38 }
 0x277   : > { %v4505_v36 = vpop.permute.xlu1 %1628  ;;  %v4507_v0 = vpop.permute.xlu0 %1046 }
 0x278   : > { %6279 = vst [vmem:[#allocation46_spill] sm:$0xff] %v4505_v36 }
 0x279   : > { %1060 = vrot.lane.b32.xlu1 %v1034_v13, %s6278_s23  ;;  %987 = vrot.lane.b32.xlu0 %v961_v39, %s6241_s14  ;;  %v1180_v13 = vmul.f32 %v4105_v28, %v4481_v33  ;;  %v1107_v39 = vmul.f32 %v4101_v35, %v4481_v33 }
 0x27b   : > { %v4515_v63 = vpop.permute.xlu1 %1705  ;;  %v4517_v37 = vpop.permute.xlu0 %1192 }
 0x27c   : > { %6280 = vst [vmem:[#allocation47_spill] sm:$0xff] %v4515_v63  ;;  %6281 = vst [vmem:[#allocation48_spill] sm:$0xff] %v4517_v37 }
 0x27d   : > { %1202 = vrot.lane.b32.xlu1 %v1178_v32, %s6264_s25  ;;  %1129 = vrot.lane.b32.xlu0 %v1105_v20, %s6243_s21  ;;  %v1253_v32 = vmul.f32 %v4011_v7, %v4481_v33  ;;  %v1251_v20 = vmul.f32 %v4011_v7, %v4469_v38 }
 0x27f   : > { %v4525_v36 = vpop.permute.xlu1 %1774  ;;  %v4527_v1 = vpop.permute.xlu0 %1265 }
 0x280   : > { %6282 = vst [vmem:[#allocation49_spill] sm:$0xff] %v4525_v36  ;;  %6283 = vst [vmem:[#allocation50_spill] sm:$0xff] %v4527_v1 }
 0x281   : > { %1206 = vrot.lane.b32.xlu1 %v1180_v13, %s6264_s25  ;;  %1133 = vrot.lane.b32.xlu0 %v1107_v39, %s6243_s21  ;;  %v1324_v13 = vmul.f32 %v4015_v9, %v4469_v38  ;;  %v1326_v39 = vmul.f32 %v4015_v9, %v4481_v33 }
 0x283   : > { %v4535_v63 = vpop.permute.xlu0 %1411  ;;  %v4537_v43 = vpop.permute.xlu1 %827 }
 0x284   : > { %6284 = vst [vmem:[#allocation51_spill] sm:$0xff] %v4535_v63 }
 0x285   : > { %1279 = vrot.lane.b32.xlu1 %v1253_v32, %s6253_s27  ;;  %1275 = vrot.lane.b32.xlu0 %v1251_v20, %s6253_s27  ;;  %v1399_v32 = vmul.f32 %v4023_v55, %v4481_v33  ;;  %v1397_v20 = vmul.f32 %v4023_v55, %v4469_v38 }
 0x287   : > { %v4545_v36 = vpop.permute.xlu0 %1484  ;;  %v4547_v1 = vpop.permute.xlu1 %973 }
 0x288   : > { %6285 = vst [vmem:[#allocation52_spill] sm:$0xff] %v4545_v36 }
 0x289   : > { %1348 = vrot.lane.b32.xlu1 %v1324_v13, %s6246_s17  ;;  %1352 = vrot.lane.b32.xlu0 %v1326_v39, %s6246_s17  ;;  %v1470_v13 = vmul.f32 %v4027_v14, %v4469_v38  ;;  %v1472_v39 = vmul.f32 %v4027_v14, %v4481_v33 }
 0x28b   : > { %v4555_v63 = vpop.permute.xlu0 %1557  ;;  %v4557_v37 = vpop.permute.xlu1 %1119 }
 0x28c   : > { %6286 = vst [vmem:[#allocation53_spill] sm:$0xff] %v4555_v63  ;;  %v4573_v63 = vpop.f32.mrf.mxu1 }
 0x28d   : > { %1425 = vrot.lane.b32.xlu1 %v1399_v32, %s6256_s28  ;;  %1421 = vrot.lane.b32.xlu0 %v1397_v20, %s6256_s28  ;;  %6289 = vst [vmem:[#allocation56_spill] sm:$0xff] %v4573_v63  ;;  %v887_v20 = vmul.f32 %v4089_v61, %v4573_v63 }
 0x28f   : > { %v4565_v36 = vpop.permute.xlu0 %1703  ;;  %v4567_v24 = vpop.permute.xlu1 %1338 }
 0x290   : > { %6287 = vst [vmem:[#allocation54_spill] sm:$0xff] %v4565_v36  ;;  %6288 = vst [vmem:[#allocation55_spill] sm:$0xff] %v4567_v24  ;;  %v814_v36 = vmul.f32 %v4085_v60, %v4573_v63 }
 0x291   : > { %1494 = vrot.lane.b32.xlu1 %v1470_v13, %s6255_s29  ;;  %1498 = vrot.lane.b32.xlu0 %v1472_v39, %s6255_s29  ;;  %v1033_v13 = vmul.f32 %v4097_v6, %v4573_v63  ;;  %v960_v39 = vmul.f32 %v4093_v4, %v4573_v63 }
 0x293   : > { %v4577_v12 = vpop.permute.xlu1 %1630  ;;  %v4579_v32 = vpop.permute.xlu0 %904 }
 0x294   : > { %6290 = vst [vmem:[#allocation57_spill] sm:$0xff] %v4577_v12 }
 0x295   : > { %912 = vrot.lane.b32.xlu0 %v887_v20, %s3348_s24  ;;  %839 = vrot.lane.b32.xlu1 %v814_v36, %s6274_s26  ;;  %v1179_v36 = vmul.f32 %v4105_v28, %v4573_v63  ;;  %v1106_v20 = vmul.f32 %v4101_v35, %v4573_v63  ;;  %s6296_s24 = smov 85   ;;  %s6303_s26 = smov 86  }
 0x297   : > { %v4587_v24 = vpop.permute.xlu1 %1776  ;;  %v4589_v42 = vpop.permute.xlu0 %908 }
 0x298   : > { %6291 = vst [vmem:[#allocation58_spill] sm:$0xff] %v4587_v24 }
 0x299   : > { %1058 = vrot.lane.b32.xlu0 %v1033_v13, %s6278_s23  ;;  %985 = vrot.lane.b32.xlu1 %v960_v39, %s6241_s14  ;;  %v1252_v13 = vmul.f32 %v4011_v7, %v4573_v63  ;;  %v1325_v39 = vmul.f32 %v4015_v9, %v4573_v63  ;;  %s3365_s14 = smov 65  }
 0x29b   : > { %v4597_v61 = vpop.permute.xlu0 %1050  ;;  %v4599_v60 = vpop.permute.xlu1 %831 }
 0x29d   : > { %1204 = vrot.lane.b32.xlu0 %v1179_v36, %s6264_s25  ;;  %1131 = vrot.lane.b32.xlu1 %v1106_v20, %s6243_s21  ;;  %v1398_v36 = vmul.f32 %v4023_v55, %v4573_v63  ;;  %v1471_v20 = vmul.f32 %v4027_v14, %v4573_v63  ;;  %s3362_s25 = smov 68   ;;  %s6224_s21 = smov 48  }
 0x29f   : > { %v4607_v6 = vpop.permute.xlu0 %1054  ;;  %v4609_v4 = vpop.permute.xlu1 %835 }
 0x2a1   : > { %1277 = vrot.lane.b32.xlu0 %v1252_v13, %s6253_s27  ;;  %1350 = vrot.lane.b32.xlu1 %v1325_v39, %s6246_s17  ;;  %v1544_v13 = vmul.f32 %v4031_v62, %v4573_v63  ;;  %v1545_v39 = vmul.f32 %v4031_v62, %v4481_v33  ;;  %s6306_s27 = smov 84   ;;  %s3366_s17 = smov 64  }
 0x2a3   : > { %v4617_v28 = vpop.permute.xlu0 %1196  ;;  %v4619_v35 = vpop.permute.xlu1 %977 }
 0x2a4   : > { %6292 = vst [vmem:[#allocation59_spill] sm:$0xff] %v4617_v28 }
 0x2a5   : > { %1423 = vrot.lane.b32.xlu0 %v1398_v36, %s6256_s28  ;;  %1496 = vrot.lane.b32.xlu1 %v1471_v20, %s6255_s29  ;;  %v1687_v36 = vmul.f32 %v4131_v45, %v4395_v30  ;;  %v1688_v20 = vmul.f32 %v4131_v45, %v4301_v40  ;;  %s3363_s28 = smov 67   ;;  %s3364_s29 = smov 66  }
 0x2a7   : > { %v4627_v7 = vpop.permute.xlu0 %1200  ;;  %v4629_v9 = vpop.permute.xlu1 %981 }
 0x2a8   : > { %6293 = vst [vmem:[#allocation60_spill] sm:$0xff] %v4627_v7 }
 0x2a9   : > { %1569 = vrot.lane.b32.xlu0 %v1544_v13, %s3357_s22  ;;  %1571 = vrot.lane.b32.xlu1 %v1545_v39, %s3357_s22  ;;  %v1830_v13 = vmul.f32 %v4133_v3, %v4229_v21  ;;  %v1831_v39 = vmul.f32 %v4133_v3, %v4147_v56 }
 0x2ab   : > { %v4637_v55 = vpop.permute.xlu0 %1269  ;;  %v4639_v14 = vpop.permute.xlu1 %1123 }
 0x2ac   : > { %6294 = vst [vmem:[#allocation61_spill] sm:$0xff] %v4637_v55  ;;  %6295 = vst [vmem:[#allocation62_spill] sm:$0xff] %v4639_v14 }
 0x2ad   : > { %1709 = vrot.lane.b32.xlu0 %v1687_v36, %s6296_s24  ;;  %1711 = vrot.lane.b32.xlu1 %v1688_v20, %s6296_s24  ;;  %v1543_v20 = vmul.f32 %v4031_v62, %v4469_v38 }
 0x2af   : > { %v4647_v24 = vpop.permute.xlu0 %1342  ;;  %v4649_v12 = vpop.permute.xlu1 %1127 }
 0x2b0   : > { %6297 = vst [vmem:[#allocation63_spill] sm:$0xff] %v4647_v24  ;;  %6298 = vst [vmem:[#allocation64_spill] sm:$0xff] %v4649_v12  ;;  %v1686_v24 = vmul.f32 %v4131_v45, %v4291_v27  ;;  %v990_v12 = vsel %vm989_vm4, %v4389_v11, %v4547_v1  ;;  %v6351_v11 = vld [vmem:[#allocation15_spill] sm:$0xff] }
 0x2b1   : > { %1849 = vrot.lane.b32.xlu0 %v1830_v13, %s3362_s25  ;;  %1851 = vrot.lane.b32.xlu1 %v1831_v39, %s3362_s25  ;;  %v1829_v13 = vmul.f32 %v4133_v3, %v4139_v49  ;;  %v1617_v39 = vmul.f32 %v4035_v15, %v4573_v63 }
 0x2b3   : > { %v4657_v55 = vpop.permute.xlu0 %1492  ;;  %v4659_v36 = vpop.permute.xlu1 %1273 }
 0x2b4   : > { %6299 = vst [vmem:[#allocation65_spill] sm:$0xff] %v4657_v55  ;;  %6300 = vst [vmem:[#allocation66_spill] sm:$0xff] %v4659_v36 }
 0x2b5   : > { %1567 = vrot.lane.b32.xlu0 %v1543_v20, %s3357_s22  ;;  %1707 = vrot.lane.b32.xlu1 %v1686_v24, %s6296_s24  ;;  %v1618_v24 = vmul.f32 %v4035_v15, %v4481_v33  ;;  %v1760_v20 = vmul.f32 %v4135_v46, %v4395_v30 }
 0x2b7   : > { %v4667_v28 = vpop.permute.xlu0 %1488  ;;  %v4669_v7 = vpop.permute.xlu1 %1346 }
 0x2b8   : > { %6301 = vst [vmem:[#allocation67_spill] sm:$0xff] %v4667_v28  ;;  %6302 = vst [vmem:[#allocation68_spill] sm:$0xff] %v4669_v7 }
 0x2b9   : > { %1847 = vrot.lane.b32.xlu0 %v1829_v13, %s3362_s25  ;;  %1642 = vrot.lane.b32.xlu1 %v1617_v39, %s6303_s26  ;;  %v1761_v13 = vmul.f32 %v4135_v46, %v4301_v40  ;;  %v1903_v39 = vmul.f32 %v4137_v47, %v4229_v21 }
 0x2bb   : > { %v4677_v62 = vpop.permute.xlu0 %1638  ;;  %v4679_v45 = vpop.permute.xlu1 %1419 }
 0x2bc   : > { %6304 = vst [vmem:[#allocation69_spill] sm:$0xff] %v4677_v62  ;;  %6305 = vst [vmem:[#allocation70_spill] sm:$0xff] %v4679_v45 }
 0x2bd   : > { %1644 = vrot.lane.b32.xlu0 %v1618_v24, %s6303_s26  ;;  %1782 = vrot.lane.b32.xlu1 %v1760_v20, %s6306_s27  ;;  %v1904_v20 = vmul.f32 %v4137_v47, %v4147_v56 }
 0x2bf   : > { %v4687_v3 = vpop.permute.xlu0 %1634  ;;  %v4689_v28 = vpop.permute.xlu1 %1415 }
 0x2c0   : > { %6307 = vst [vmem:[#allocation71_spill] sm:$0xff] %v4687_v3  ;;  %6308 = vst [vmem:[#allocation72_spill] sm:$0xff] %v4689_v28  ;;  %v1616_v3 = vmul.f32 %v4035_v15, %v4469_v38 }
 0x2c1   : > { %1784 = vrot.lane.b32.xlu0 %v1761_v13, %s6306_s27  ;;  %1922 = vrot.lane.b32.xlu1 %v1903_v39, %s3363_s28  ;;  %v1759_v39 = vmul.f32 %v4135_v46, %v4291_v27 }
 0x2c3   : > { %v4697_v62 = vpop.permute.xlu1 %1565  ;;  %v4699_v24 = vpop.permute.xlu0 %833 }
 0x2c4   : > { %6309 = vst [vmem:[#allocation73_spill] sm:$0xff] %v4697_v62  ;;  %v1902_v62 = vmul.f32 %v4137_v47, %v4139_v49 }
 0x2c5   : > { %1924 = vrot.lane.b32.xlu0 %v1904_v20, %s3363_s28  ;;  %1640 = vrot.lane.b32.xlu1 %v1616_v3, %s6303_s26  ;;  %v1690_v3 = vmul.f32 %v4039_v10, %v4573_v63  ;;  %v1691_v20 = vmul.f32 %v4039_v10, %v4481_v33 }
 0x2c7   : > { %v4707_v55 = vpop.permute.xlu1 %1561  ;;  %v4709_v13 = vpop.permute.xlu0 %979 }
 0x2c8   : > { %6310 = vst [vmem:[#allocation74_spill] sm:$0xff] %v4707_v55 }
 0x2c9   : > { %1780 = vrot.lane.b32.xlu0 %v1759_v39, %s6306_s27  ;;  %1920 = vrot.lane.b32.xlu1 %v1902_v62, %s3363_s28  ;;  %v1833_v62 = vmul.f32 %v4141_v51, %v4395_v30  ;;  %v1834_v39 = vmul.f32 %v4141_v51, %v4301_v40 }
 0x2cb   : > { %v4717_v28 = vpop.permute.xlu1 %906  ;;  %v4719_v15 = vpop.permute.xlu0 %1125 }
 0x2cc   : > { %6311 = vst [vmem:[#allocation75_spill] sm:$0xff] %v4719_v15 }
 0x2cd   : > { %1715 = vrot.lane.b32.xlu0 %v1690_v3, %s6296_s24  ;;  %1717 = vrot.lane.b32.xlu1 %v1691_v20, %s6296_s24  ;;  %v1976_v3 = vmul.f32 %v4155_v58, %v4229_v21  ;;  %v1977_v20 = vmul.f32 %v4155_v58, %v4147_v56 }
 0x2cf   : > { %v4727_v46 = vpop.permute.xlu1 %1052  ;;  %v4729_v47 = vpop.permute.xlu0 %1271 }
 0x2d0   : > { %6312 = vst [vmem:[#allocation76_spill] sm:$0xff] %v4729_v47 }
 0x2d1   : > { %1855 = vrot.lane.b32.xlu0 %v1833_v62, %s3362_s25  ;;  %1857 = vrot.lane.b32.xlu1 %v1834_v39, %s3362_s25  ;;  %v1689_v39 = vmul.f32 %v4039_v10, %v4469_v38 }
 0x2d3   : > { %v4737_v55 = vpop.permute.xlu1 %1198  ;;  %v4739_v45 = vpop.permute.xlu0 %1344 }
 0x2d4   : > { %6313 = vst [vmem:[#allocation77_spill] sm:$0xff] %v4737_v55  ;;  %6314 = vst [vmem:[#allocation78_spill] sm:$0xff] %v4739_v45  ;;  %v1832_v45 = vmul.f32 %v4141_v51, %v4291_v27 }
 0x2d5   : > { %1995 = vrot.lane.b32.xlu0 %v1976_v3, %s3364_s29  ;;  %1997 = vrot.lane.b32.xlu1 %v1977_v20, %s3364_s29  ;;  %v1975_v3 = vmul.f32 %v4155_v58, %v4139_v49  ;;  %v1763_v20 = vmul.f32 %v4043_v34, %v4573_v63 }
 0x2d7   : > { %v4747_v7 = vpop.permute.xlu1 %1490  ;;  %v4749_v62 = vpop.permute.xlu0 %1417 }
 0x2d8   : > { %6315 = vst [vmem:[#allocation79_spill] sm:$0xff] %v4747_v7  ;;  %6316 = vst [vmem:[#allocation80_spill] sm:$0xff] %v4749_v62  ;;  %v1762_v7 = vmul.f32 %v4043_v34, %v4469_v38 }
 0x2d9   : > { %1713 = vrot.lane.b32.xlu0 %v1689_v39, %s6296_s24  ;;  %1853 = vrot.lane.b32.xlu1 %v1832_v45, %s3362_s25  ;;  %v1764_v45 = vmul.f32 %v4043_v34, %v4481_v33  ;;  %v1906_v39 = vmul.f32 %v4165_v53, %v4395_v30  ;;  %s3368_s24 = smov 47  }
 0x2db   : > { %v4757_v47 = vpop.permute.xlu1 %1636  ;;  %v4759_v36 = vpop.permute.xlu0 %1563 }
 0x2dc   : > { %6317 = vst [vmem:[#allocation81_spill] sm:$0xff] %v4757_v47  ;;  %6318 = vst [vmem:[#allocation82_spill] sm:$0xff] %v4759_v36 }
 0x2dd   : > { %1993 = vrot.lane.b32.xlu0 %v1975_v3, %s3364_s29  ;;  %1788 = vrot.lane.b32.xlu1 %v1763_v20, %s6306_s27  ;;  %v1907_v3 = vmul.f32 %v4165_v53, %v4301_v40  ;;  %v2049_v20 = vmul.f32 %v4177_v31, %v4229_v21 }
 0x2df   : > { %v4767_v10 = vpop.permute.xlu1 %910  ;;  %v4769_v51 = vpop.permute.xlu0 %837 }
 0x2e0   : > { %6319 = vst [vmem:[#allocation83_spill] sm:$0xff] %v4767_v10 }
 0x2e1   : > { %1790 = vrot.lane.b32.xlu0 %v1764_v45, %s6306_s27  ;;  %1928 = vrot.lane.b32.xlu1 %v1906_v39, %s3363_s28  ;;  %v2050_v39 = vmul.f32 %v4177_v31, %v4147_v56 }
 0x2e3   : > { %v4777_v58 = vpop.permute.xlu1 %914  ;;  %v4779_v47 = vpop.permute.xlu0 %841 }
 0x2e5   : > { %1930 = vrot.lane.b32.xlu0 %v1907_v3, %s3363_s28  ;;  %2068 = vrot.lane.b32.xlu1 %v2049_v20, %s3365_s14  ;;  %v1905_v20 = vmul.f32 %v4165_v53, %v4291_v27 }
 0x2e7   : > { %v4787_v36 = vpop.permute.xlu1 %1056  ;;  %v4789_v45 = vpop.permute.xlu0 %983 }
 0x2e8   : > { %6320 = vst [vmem:[#allocation84_spill] sm:$0xff] %v4787_v36  ;;  %6321 = vst [vmem:[#allocation85_spill] sm:$0xff] %v4789_v45  ;;  %v2048_v36 = vmul.f32 %v4177_v31, %v4139_v49  ;;  %v4931_v45 = vmul.f32 %v4357_v54, %v4395_v30 }
 0x2e9   : > { %2070 = vrot.lane.b32.xlu0 %v2050_v39, %s3365_s14  ;;  %1786 = vrot.lane.b32.xlu1 %v1762_v7, %s6306_s27  ;;  %v1836_v7 = vmul.f32 %v4047_v18, %v4573_v63  ;;  %v1837_v39 = vmul.f32 %v4047_v18, %v4481_v33 }
 0x2eb   : > { %v4797_v62 = vpop.permute.xlu1 %1060  ;;  %v4799_v3 = vpop.permute.xlu0 %987 }
 0x2ec   : > { %6322 = vst [vmem:[#allocation86_spill] sm:$0xff] %v4797_v62  ;;  %6323 = vst [vmem:[#allocation87_spill] sm:$0xff] %v4799_v3 }
 0x2ed   : > { %1926 = vrot.lane.b32.xlu0 %v1905_v20, %s3363_s28  ;;  %2066 = vrot.lane.b32.xlu1 %v2048_v36, %s3365_s14  ;;  %v1979_v36 = vmul.f32 %v4187_v57, %v4395_v30  ;;  %v1980_v20 = vmul.f32 %v4187_v57, %v4301_v40 }
 0x2ef   : > { %v4807_v55 = vpop.permute.xlu1 %1202  ;;  %v4809_v34 = vpop.permute.xlu0 %1129 }
 0x2f0   : > { %6324 = vst [vmem:[#allocation88_spill] sm:$0xff] %v4807_v55  ;;  %6325 = vst [vmem:[#allocation89_spill] sm:$0xff] %v4809_v34 }
 0x2f1   : > { %1861 = vrot.lane.b32.xlu0 %v1836_v7, %s3362_s25  ;;  %1863 = vrot.lane.b32.xlu1 %v1837_v39, %s3362_s25  ;;  %v2122_v7 = vmul.f32 %v4199_v8, %v4229_v21  ;;  %v2123_v39 = vmul.f32 %v4199_v8, %v4147_v56 }
 0x2f3   : > { %v4817_v53 = vpop.permute.xlu1 %1206  ;;  %v4819_v31 = vpop.permute.xlu0 %1133 }
 0x2f4   : > { %6326 = vst [vmem:[#allocation90_spill] sm:$0xff] %v4817_v53  ;;  %6327 = vst [vmem:[#allocation91_spill] sm:$0xff] %v4819_v31 }
 0x2f5   : > { %2001 = vrot.lane.b32.xlu0 %v1979_v36, %s3364_s29  ;;  %2003 = vrot.lane.b32.xlu1 %v1980_v20, %s3364_s29  ;;  %v1835_v20 = vmul.f32 %v4047_v18, %v4469_v38 }
 0x2f7   : > { %v4827_v55 = vpop.permute.xlu1 %1279  ;;  %v4829_v34 = vpop.permute.xlu0 %1275 }
 0x2f8   : > { %6328 = vst [vmem:[#allocation92_spill] sm:$0xff] %v4827_v55  ;;  %6329 = vst [vmem:[#allocation93_spill] sm:$0xff] %v4829_v34  ;;  %v1978_v34 = vmul.f32 %v4187_v57, %v4291_v27 }
 0x2f9   : > { %2141 = vrot.lane.b32.xlu0 %v2122_v7, %s3366_s17  ;;  %2143 = vrot.lane.b32.xlu1 %v2123_v39, %s3366_s17  ;;  %v2121_v7 = vmul.f32 %v4199_v8, %v4139_v49  ;;  %v1909_v39 = vmul.f32 %v4051_v16, %v4573_v63 }
 0x2fb   : > { %v4837_v53 = vpop.permute.xlu1 %1348  ;;  %v4839_v36 = vpop.permute.xlu0 %1352 }
 0x2fc   : > { %6330 = vst [vmem:[#allocation94_spill] sm:$0xff] %v4837_v53  ;;  %6331 = vst [vmem:[#allocation95_spill] sm:$0xff] %v4839_v36  ;;  %v6340_v36 = vld [vmem:[#allocation12_spill] sm:$0xff] }
 0x2fd   : > { %1859 = vrot.lane.b32.xlu0 %v1835_v20, %s3362_s25  ;;  %1999 = vrot.lane.b32.xlu1 %v1978_v34, %s3364_s29  ;;  %v1910_v34 = vmul.f32 %v4051_v16, %v4481_v33  ;;  %v2052_v20 = vmul.f32 %v4209_v23, %v4395_v30  ;;  %s6225_s25 = smov 46  }
 0x2ff   : > { %v4847_v55 = vpop.permute.xlu1 %1425  ;;  %v4849_v31 = vpop.permute.xlu0 %1421 }
 0x300   : > { %6332 = vst [vmem:[#allocation96_spill] sm:$0xff] %v4847_v55  ;;  %6333 = vst [vmem:[#allocation97_spill] sm:$0xff] %v4849_v31  ;;  %v2194_v55 = vmul.f32 %v4221_v29, %v4139_v49 }
 0x301   : > { %2139 = vrot.lane.b32.xlu0 %v2121_v7, %s3366_s17  ;;  %1934 = vrot.lane.b32.xlu1 %v1909_v39, %s3363_s28  ;;  %v2053_v7 = vmul.f32 %v4209_v23, %v4301_v40  ;;  %v2195_v39 = vmul.f32 %v4221_v29, %v4229_v21 }
 0x303   : > { %v4857_v18 = vpop.permute.xlu1 %1494  ;;  %v4859_v57 = vpop.permute.xlu0 %1498 }
 0x304   : > { %6334 = vst [vmem:[#allocation98_spill] sm:$0xff] %v4857_v18  ;;  %6335 = vst [vmem:[#allocation99_spill] sm:$0xff] %v4859_v57  ;;  %v1908_v57 = vmul.f32 %v4051_v16, %v4469_v38 }
 0x305   : > { %1936 = vrot.lane.b32.xlu0 %v1910_v34, %s3363_s28  ;;  %2074 = vrot.lane.b32.xlu1 %v2052_v20, %s3365_s14  ;;  %v2196_v20 = vmul.f32 %v4221_v29, %v4147_v56 }
 0x307   : > { %v4867_v8 = vpop.permute.xlu0 %912  ;;  %v4869_v31 = vpop.permute.xlu1 %839 }
 0x309   : > { %2076 = vrot.lane.b32.xlu0 %v2053_v7, %s3365_s14  ;;  %2220 = vrot.lane.b32.xlu1 %v2195_v39, %s6224_s21  ;;  %v2051_v39 = vmul.f32 %v4209_v23, %v4291_v27 }
 0x30b   : > { %v4877_v18 = vpop.permute.xlu0 %1058  ;;  %v4879_v34 = vpop.permute.xlu1 %985 }
 0x30c   : > { %6336 = vst [vmem:[#allocation100_spill] sm:$0xff] %v4877_v18  ;;  %6337 = vst [vmem:[#allocation101_spill] sm:$0xff] %v4879_v34  ;;  %v779_v18 = vmul.f32 %v6340_v36, %v4147_v56 }
 0x30d   : > { %2222 = vrot.lane.b32.xlu0 %v2196_v20, %s6224_s21  ;;  %1932 = vrot.lane.b32.xlu1 %v1908_v57, %s3363_s28  ;;  %v844_v57 = vsel %vm843_vm2, %v4369_v44, %v4537_v43  ;;  %v845_v44 = vsel %vm843_vm2, %v4537_v43, %v4379_v41  ;;  %s3370_s28 = smov 45  }
 0x30e   : > { %v861_v16 = vadd.f32 %v4379_v41, %v779_v18  ;;  %v4920_v18 = vmul.f32 %v4357_v54, %v4301_v40  ;;  %v6344_v41 = vld [vmem:[#allocation13_spill] sm:$0xff] }
 0x30f   : > { %v4887_v53 = vpop.permute.xlu0 %1204  ;;  %v4889_v7 = vpop.permute.xlu1 %1131  ;;  %v4935_v43 = vmul.f32 %v6344_v41, %v4481_v33  ;;  %v4939_v14 = vmul.f32 %v6344_v41, %v4469_v38 }
 0x310   : > { %6338 = vst [vmem:[#allocation102_spill] sm:$0xff] %v4887_v53  ;;  %6339 = vst [vmem:[#allocation103_spill] sm:$0xff] %v4889_v7  ;;  %v6343_v53 = vld [vmem:[#allocation6_spill] sm:$0xff] }
 0x311   : > { %2072 = vrot.lane.b32.xlu0 %v2051_v39, %s3365_s14  ;;  %2218 = vrot.lane.b32.xlu1 %v2194_v55, %s6224_s21  ;;  %v1982_v7 = vmul.f32 %v6343_v53, %v4573_v63  ;;  %v1983_v62 = vmul.f32 %v6343_v53, %v4481_v33  ;;  %v777_v39 = vmul.f32 %v6340_v36, %v4139_v49 }
 0x312   : > { %v778_v55 = vmul.f32 %v6340_v36, %v4229_v21  ;;  %6345 = vst [vmem:[#allocation6_spill] sm:$0xff] %v4935_v43 }
 0x313   : > { %v4903_v20 = vpop.permute.xlu0 %1277  ;;  %v4905_v23 = vpop.permute.xlu1 %1350  ;;  %v859_v36 = vadd.f32 %v844_v57, %v777_v39  ;;  %v4952_v39 = vmul.f32 %v6344_v41, %v4573_v63  ;;  %v1981_v41 = vmul.f32 %v6343_v53, %v4469_v38 }
 0x314   : > { %6341 = vst [vmem:[#allocation12_spill] sm:$0xff] %v4903_v20  ;;  %6342 = vst [vmem:[#allocation104_spill] sm:$0xff] %v4905_v23  ;;  %v4924_v23 = vmul.f32 %v4357_v54, %v4291_v27  ;;  %v934_v20 = vadd.f32 %v4377_v26, %v861_v16  ;;  %v2126_v16 = vmul.f32 %v4233_v59, %v4301_v40 }
 0x315   : > { %2007 = vrot.lane.b32.xlu0 %v1982_v7, %s3364_s29  ;;  %2009 = vrot.lane.b32.xlu1 %v1983_v62, %s3364_s29  ;;  %v2125_v62 = vmul.f32 %v4233_v59, %v4395_v30  ;;  %v860_v57 = vadd.f32 %v845_v44, %v778_v55  ;;  %v2653_v55 = vld [vmem:[%s6099_s2 + $0xf8] sm:$0xff] }
 0x316   : > { %v1007_v54 = vadd.f32 %v4401_v2, %v934_v20  ;;  %v2284_v20 = vmul.f32 %v4245_v48, %v4147_v56  ;;  %2736 = vmatprep.subr.mxu1 %v2653_v55 }
 0x317   : > { %v4941_v15 = vpop.permute.xlu0 %1423  ;;  %v4943_v7 = vpop.permute.xlu1 %1496 }
 0x318   : > { %6346 = vst [vmem:[#allocation13_spill] sm:$0xff] %v4941_v15  ;;  %6347 = vst [vmem:[#allocation105_spill] sm:$0xff] %v4943_v7  ;;  %v917_v15 = vsel %vm916_vm3, %v4367_v5, %v4497_v22  ;;  %v2283_v7 = vmul.f32 %v4245_v48, %v4229_v21  ;;  %v2124_v5 = vmul.f32 %v4233_v59, %v4291_v27 }
 0x319   : > { %2147 = vrot.lane.b32.xlu0 %v2125_v62, %s3366_s17  ;;  %2149 = vrot.lane.b32.xlu1 %v2126_v16, %s3366_s17  ;;  %v932_v44 = vadd.f32 %v917_v15, %v859_v36  ;;  %v4972_v62 = vmul.f32 %v4221_v29, %v4289_v17  ;;  %v918_v16 = vsel %vm916_vm3, %v4497_v22, %v4377_v26  ;;  %v6350_v29 = vld [vmem:[#allocation7_spill] sm:$0xff] }
 0x31a   : > { %v4986_v59 = vmul.f32 %v4245_v48, %v4139_v49  ;;  %v4990_v53 = vmul.f32 %v6350_v29, %v4573_v63  ;;  %v1080_v55 = vadd.f32 %v4399_v19, %v1007_v54  ;;  %v933_v10 = vadd.f32 %v918_v16, %v860_v57  ;;  %v6352_v57 = vld [vmem:[#allocation16_spill] sm:$0xff] }
 0x31b   : > { %v4980_v15 = vpop.permute.xlu0 %1569  ;;  %v4982_v36 = vpop.permute.xlu1 %1571  ;;  %v4995_v26 = vmul.f32 %v6350_v29, %v4481_v33  ;;  %v4999_v22 = vmul.f32 %v6351_v11, %v4395_v30  ;;  %v5008_v54 = vmul.f32 %v6351_v11, %v4301_v40  ;;  %v5012_v16 = vmul.f32 %v6352_v57, %v4229_v21 }
 0x31c   : > { %6348 = vst [vmem:[#allocation106_spill] sm:$0xff] %v4980_v15  ;;  %6349 = vst [vmem:[#allocation107_spill] sm:$0xff] %v4982_v36  ;;  %v991_v15 = vsel %vm989_vm4, %v4547_v1, %v4401_v2  ;;  %v2652_v36 = vld [vmem:[%s6099_s2 + $0xf0] sm:$0xff]  ;;  %v2651_v2 = vld [vmem:[%s6099_s2 + $0xe8] sm:$0xff]  ;;  %v1153_v1 = vadd.f32 %v4421_v50, %v1080_v55  ;;  %v5027_v43 = vmul.f32 %v6350_v29, %v4469_v38 }
 0x31d   : > { %2308 = vrot.lane.b32.xlu0 %v2283_v7, %s3368_s24  ;;  %2310 = vrot.lane.b32.xlu1 %v2284_v20, %s3368_s24  ;;  %6353 = vst [vmem:[#allocation7_spill] sm:$0xff] %v5012_v16  ;;  %v1005_v7 = vadd.f32 %v990_v12, %v932_v44  ;;  %v5023_v20 = vmul.f32 %v6352_v57, %v4147_v56  ;;  %v2650_v16 = vld [vmem:[%s6099_s2 + $0xe0] sm:$0xff] }
 0x31e   : > { %2737 = vmatpush1.msra.mxu1 %v2652_v36  ;;  %v5038_v12 = vmul.f32 %v6351_v11, %v4291_v27  ;;  %v5042_v44 = vmul.f32 %v4245_v48, %v4289_v17  ;;  %v5046_v29 = vmul.f32 %v6352_v57, %v4139_v49  ;;  %v6359_v36 = vld [vmem:[#allocation8_spill] sm:$0xff]  ;;  %v6362_v48 = vld [vmem:[#allocation17_spill] sm:$0xff] }
 0x31f   : > { %v5032_v34 = vpop.permute.xlu0 %1709  ;;  %v5034_v3 = vpop.permute.xlu1 %1711  ;;  %v5050_v55 = vmul.f32 %v6359_v36, %v4573_v63  ;;  %2738 = vmatprep.subr.mxu1 %v2651_v2 }
 0x320   : > { %6354 = vst [vmem:[#allocation15_spill] sm:$0xff] %v5032_v34  ;;  %6355 = vst [vmem:[#allocation16_spill] sm:$0xff] %v5034_v3  ;;  %v2649_v34 = vld [vmem:[%s6099_s2 + $0xd8] sm:$0xff]  ;;  %v1006_v3 = vadd.f32 %v991_v15, %v933_v10  ;;  %2739 = vmatpush1.msra.mxu1 %v2650_v16  ;;  %v5070_v10 = vmul.f32 %v6362_v48, %v4301_v40  ;;  %v6366_v15 = vld [vmem:[#allocation19_spill] sm:$0xff] }
 0x321   : > { %6356 = vst [vmem:[#allocation108_spill] sm:$0xff] %v5038_v12  ;;  %6357 = vst [vmem:[#allocation109_spill] sm:$0xff] %v5042_v44  ;;  %v5057_v12 = vmul.f32 %v6359_v36, %v4481_v33  ;;  %v5061_v44 = vmul.f32 %v6362_v48, %v4395_v30  ;;  %2005 = vrot.lane.b32.xlu0 %v1981_v41, %s3364_s29  ;;  %2145 = vrot.lane.b32.xlu1 %v2124_v5, %s3366_s17  ;;  %v2648_v16 = vld [vmem:[%s6099_s2 + $0xd0] sm:$0xff]  ;;  %s3371_s29 = smov 44  }
 0x322   : > { %6358 = vst [vmem:[#allocation110_spill] sm:$0xff] %v5046_v29  ;;  %6360 = vst [vmem:[#allocation8_spill] sm:$0xff] %v5050_v55  ;;  %v6364_v29 = vld [vmem:[#allocation27_spill] sm:$0xff]  ;;  %v5074_v2 = vmul.f32 %v6366_v15, %v4229_v21  ;;  %v1226_v41 = vadd.f32 %v4419_v52, %v1153_v1  ;;  %v5085_v5 = vmul.f32 %v6366_v15, %v4147_v56  ;;  %2740 = vmatprep.subr.mxu1 %v2649_v34 }
 0x323   : > { %6361 = vst [vmem:[#allocation111_spill] sm:$0xff] %v5057_v12  ;;  %6363 = vst [vmem:[#allocation17_spill] sm:$0xff] %v5061_v44  ;;  %v1063_v55 = vsel %vm1062_vm5, %v6364_v29, %v4507_v0  ;;  %v2647_v29 = vld [vmem:[%s6099_s2 + $0xc8] sm:$0xff]  ;;  %v1136_v12 = vsel %vm1135_vm6, %v4411_v25, %v4557_v37  ;;  %v847_v1 = vsel %vm843_vm2, %v4699_v24, %v4609_v4  ;;  %2741 = vmatpush1.msra.mxu1 %v2648_v16 }
 0x324   : > { %6365 = vst [vmem:[#allocation27_spill] sm:$0xff] %v5070_v10  ;;  %6367 = vst [vmem:[#allocation112_spill] sm:$0xff] %v5074_v2  ;;  %v1078_v44 = vadd.f32 %v1063_v55, %v1005_v7  ;;  %v5089_v10 = vmul.f32 %v6359_v36, %v4469_v38  ;;  %v1064_v2 = vsel %vm1062_vm5, %v4507_v0, %v4399_v19  ;;  %v5100_v7 = vpop.permute.xlu0 %1849  ;;  %v5102_v55 = vpop.permute.xlu1 %1851  ;;  %v2646_v19 = vld [vmem:[%s6099_s2 + $0xc0] sm:$0xff]  ;;  %2742 = vmatprep.subr.mxu1 %v2647_v29 }
 0x325   : > { %6368 = vst [vmem:[#allocation113_spill] sm:$0xff] %v5085_v5  ;;  %6369 = vst [vmem:[#allocation114_spill] sm:$0xff] %v5100_v7  ;;  %v6370_v5 = vld [vmem:[#allocation38_spill] sm:$0xff]  ;;  %v1079_v0 = vadd.f32 %v1064_v2, %v1006_v3  ;;  %v846_v25 = vsel %vm843_vm2, %v4599_v60, %v4699_v24  ;;  %v5116_v34 = vmul.f32 %v6362_v48, %v4291_v27  ;;  %2224 = vrot.lane.b32.xlu0 %v4972_v62, %s6224_s21 }
 0x326   : > { %v5106_v36 = vmul.f32 %v6351_v11, %v6370_v5  ;;  %v5120_v7 = vmul.f32 %v6352_v57, %v4289_v17  ;;  %v2645_v11 = vld [vmem:[%s6099_s2 + $0xb8] sm:$0xff]  ;;  %v1137_v3 = vsel %vm1135_vm6, %v4557_v37, %v4421_v50  ;;  %v920_v60 = vsel %vm916_vm3, %v4717_v28, %v4589_v42  ;;  %2306 = vrot.lane.b32.xlu1 %v4986_v59, %s3368_s24  ;;  %v2644_v57 = vld [vmem:[%s6099_s2 + $0xb0] sm:$0xff] }
 0x327   : > { %v5137_v24 = vmul.f32 %v6366_v15, %v4139_v49  ;;  %v6371_v2 = vld [vmem:[#allocation30_spill] sm:$0xff]  ;;  %v1151_v37 = vadd.f32 %v1136_v12, %v1078_v44  ;;  %v863_v16 = vadd.f32 %v847_v1, %v4931_v45  ;;  %v919_v62 = vsel %vm916_vm3, %v4579_v32, %v4717_v28  ;;  %2743 = vmatpush1.msra.mxu1 %v2646_v19  ;;  %v6372_v15 = vld [vmem:[#allocation9_spill] sm:$0xff]  ;;  %v2643_v32 = vld [vmem:[%s6099_s2 + $0xa8] sm:$0xff] }
 0x328   : > { %v1299_v50 = vadd.f32 %v6371_v2, %v1226_v41  ;;  %v862_v59 = vadd.f32 %v846_v25, %v4924_v23  ;;  %v5148_v29 = vpop.permute.xlu0 %1567  ;;  %v5150_v49 = vpop.permute.xlu1 %1707  ;;  %v5154_v17 = vmul.f32 %v6372_v15, %v4573_v63  ;;  %v5158_v12 = vmul.f32 %v6372_v15, %v4481_v33  ;;  %v6373_v45 = vld [vmem:[#allocation21_spill] sm:$0xff]  ;;  %2744 = vmatprep.subr.mxu1 %v2645_v11  ;;  %v2642_v25 = vld [vmem:[%s6099_s2 + $0xa0] sm:$0xff] }
 0x329   : > { %v5162_v44 = vmul.f32 %v6373_v45, %v4395_v30  ;;  %v6374_v28 = vld [vmem:[#allocation33_spill] sm:$0xff]  ;;  %v1152_v41 = vadd.f32 %v1137_v3, %v1079_v0  ;;  %v936_v1 = vadd.f32 %v920_v60, %v863_v16  ;;  %v849_v19 = vsel %vm843_vm2, %v4869_v31, %v4779_v47  ;;  %2745 = vmatpush1.msra.mxu1 %v2644_v57  ;;  %v6375_v30 = vld [vmem:[#allocation48_spill] sm:$0xff]  ;;  %v2641_v3 = vld [vmem:[%s6099_s2 + $0x98] sm:$0xff] }
 0x32a   : > { %v1372_v23 = vadd.f32 %v6374_v28, %v1299_v50  ;;  %v6376_v33 = vld [vmem:[#allocation29_spill] sm:$0xff]  ;;  %v935_v63 = vadd.f32 %v919_v62, %v862_v59  ;;  %2080 = vrot.lane.b32.xlu0 %v4990_v53, %s3365_s14  ;;  %2082 = vrot.lane.b32.xlu1 %v4995_v26, %s3365_s14  ;;  %v5183_v0 = vmul.f32 %v6373_v45, %v4301_v40  ;;  %v6377_v60 = vld [vmem:[#allocation34_spill] sm:$0xff] }
 0x32b   : > { %v1209_v11 = vsel %vm1208_vm7, %v6376_v33, %v6375_v30  ;;  %v6378_v33 = vld [vmem:[#allocation22_spill] sm:$0xff]  ;;  %2746 = vmatprep.subr.mxu1 %v2643_v32  ;;  %v1210_v26 = vsel %vm1208_vm7, %v6375_v30, %v4419_v52  ;;  %v864_v62 = vadd.f32 %v4609_v4, %v4920_v18  ;;  %v866_v59 = vadd.f32 %v849_v19, %v4952_v39  ;;  %v2639_v18 = vld [vmem:[%s6099_s2 + $0x88] sm:$0xff]  ;;  %v6380_v19 = vld [vmem:[#allocation31_spill] sm:$0xff] }
 0x32c   : > { %v1445_v57 = vadd.f32 %v6377_v60, %v1372_v23  ;;  %v1224_v50 = vadd.f32 %v1209_v11, %v1151_v37  ;;  %v5191_v16 = vmul.f32 %v6378_v33, %v4229_v21  ;;  %v5195_v53 = vmul.f32 %v6378_v33, %v4147_v56  ;;  %v5206_v21 = vpop.permute.xlu0 %1847  ;;  %v5208_v23 = vpop.permute.xlu1 %1642  ;;  %2747 = vmatpush1.msra.mxu1 %v2642_v25  ;;  %v2640_v56 = vld [vmem:[%s6099_s2 + $0x90] sm:$0xff]  ;;  %v6379_v39 = vld [vmem:[#allocation50_spill] sm:$0xff] }
 0x32d   : > { %v993_v37 = vsel %vm989_vm4, %v4709_v13, %v4629_v9  ;;  %v1225_v32 = vadd.f32 %v1210_v26, %v1152_v41  ;;  %v992_v52 = vsel %vm989_vm4, %v4619_v35, %v4709_v13  ;;  %v848_v4 = vsel %vm843_vm2, %v4769_v51, %v4869_v31  ;;  %2748 = vmatprep.subr.mxu1 %v2641_v3  ;;  %v2638_v13 = vld [vmem:[%s6099_s2 + $0x80] sm:$0xff]  ;;  %v6381_v51 = vld [vmem:[#allocation40_spill] sm:$0xff] }
 0x32e   : > { %v1009_v30 = vadd.f32 %v993_v37, %v936_v1  ;;  %v1282_v25 = vsel %vm1281_vm8, %v6380_v19, %v6379_v39  ;;  %v1008_v41 = vadd.f32 %v992_v52, %v935_v63  ;;  %v1066_v35 = vsel %vm1062_vm5, %v4727_v46, %v4607_v6  ;;  %2228 = vrot.lane.b32.xlu0 %v4999_v22, %s6224_s21 }
 0x32f   : > { %2230 = vrot.lane.b32.xlu1 %v5008_v54, %s6224_s21  ;;  %v1518_v31 = vadd.f32 %v6381_v51, %v1445_v57  ;;  %v1297_v1 = vadd.f32 %v1282_v25, %v1224_v50  ;;  %v1065_v63 = vsel %vm1062_vm5, %v4597_v61, %v4727_v46  ;;  %v922_v11 = vsel %vm916_vm3, %v4867_v8, %v4777_v58  ;;  %v2637_v61 = vld [vmem:[%s6099_s2 + $0x78] sm:$0xff]  ;;  %v6382_v46 = vld [vmem:[#allocation45_spill] sm:$0xff]  ;;  %v6388_v25 = vld [vmem:[#allocation51_spill] sm:$0xff] }
 0x330   : > { %2749 = vmatpush1.msra.mxu1 %v2640_v56  ;;  %v1283_v22 = vsel %vm1281_vm8, %v6379_v39, %v6371_v2  ;;  %v937_v54 = vadd.f32 %v4589_v42, %v864_v62  ;;  %v865_v3 = vadd.f32 %v848_v4, %v4939_v14  ;;  %v939_v26 = vadd.f32 %v922_v11, %v866_v59  ;;  %v5247_v57 = vpop.permute.xlu0 %1644  ;;  %v5249_v50 = vpop.permute.xlu1 %1782  ;;  %v6383_v2 = vld [vmem:[#allocation87_spill] sm:$0xff]  ;;  %v6384_v39 = vld [vmem:[#allocation101_spill] sm:$0xff]  ;;  %v6386_v59 = vld [vmem:[#allocation32_spill] sm:$0xff] }
 0x331   : > { %2750 = vmatprep.subr.mxu1 %v2639_v18  ;;  %v5255_v37 = vadd.f32 %v6382_v46, %v1518_v31  ;;  %v1298_v56 = vadd.f32 %v1283_v22, %v1225_v32  ;;  %v1082_v52 = vadd.f32 %v1066_v35, %v1009_v30  ;;  %v995_v42 = vsel %vm989_vm4, %v6384_v39, %v6383_v2  ;;  %v2636_v14 = vld [vmem:[%s6099_s2 + $0x70] sm:$0xff]  ;;  %v6385_v62 = vld [vmem:[#allocation55_spill] sm:$0xff]  ;;  %v2635_v30 = vld [vmem:[%s6099_s2 + $0x68] sm:$0xff] }
 0x332   : > { %2751 = vmatpush1.msra.mxu1 %v2638_v13  ;;  %v1355_v4 = vsel %vm1354_vm10, %v6386_v59, %v6385_v62  ;;  %v1010_v18 = vadd.f32 %v4629_v9, %v937_v54  ;;  %v1081_v19 = vadd.f32 %v1065_v63, %v1008_v41  ;;  %v6387_v32 = vld [vmem:[#allocation7_spill] sm:$0xff]  ;;  %v6389_v35 = vld [vmem:[#allocation36_spill] sm:$0xff]  ;;  %v6390_v11 = vld [vmem:[#allocation6_spill] sm:$0xff]  ;;  %v1012_v40 = vadd.f32 %v995_v42, %v939_v26 }
 0x333   : > { %2396 = vrot.lane.b32.xlu0 %v6387_v32, %s6225_s25  ;;  %2398 = vrot.lane.b32.xlu1 %v5023_v20, %s6225_s25  ;;  %v1428_v13 = vsel %vm1427_vm9, %v6389_v35, %v6388_v25  ;;  %v1370_v31 = vadd.f32 %v1355_v4, %v1297_v1  ;;  %v867_v9 = vadd.f32 %v4779_v47, %v6390_v11  ;;  %v6391_v41 = vld [vmem:[#allocation83_spill] sm:$0xff]  ;;  %v6392_v22 = vld [vmem:[#allocation64_spill] sm:$0xff]  ;;  %v6395_v4 = vld [vmem:[#allocation85_spill] sm:$0xff]  ;;  %vm1938_vm2 = vcmask 547840  }
 0x334   : > { %v921_v63 = vsel %vm916_vm3, %v6391_v41, %v4867_v8  ;;  %2752 = vmatprep.subr.mxu1 %v2637_v61  ;;  %v1356_v20 = vsel %vm1354_vm10, %v6385_v62, %v6374_v28  ;;  %v6393_v54 = vld [vmem:[#allocation75_spill] sm:$0xff]  ;;  %v5288_v35 = vpop.permute.xlu0 %1784  ;;  %v5290_v1 = vpop.permute.xlu1 %1922  ;;  %v6394_v61 = vld [vmem:[#allocation62_spill] sm:$0xff]  ;;  %v1083_v42 = vadd.f32 %v4607_v6, %v1010_v18  ;;  %v6396_v11 = vld [vmem:[#allocation60_spill] sm:$0xff]  ;;  %vm2011_vm3 = vcmask 539648  }
 0x335   : > { %v1139_v59 = vsel %vm1135_vm6, %v6393_v54, %v6392_v22  ;;  %v938_v32 = vadd.f32 %v921_v63, %v865_v3  ;;  %2753 = vmatpush1.msra.mxu1 %v2636_v14  ;;  %v2634_v47 = vld [vmem:[%s6099_s2 + $0x60] sm:$0xff]  ;;  %v1371_v8 = vadd.f32 %v1356_v20, %v1298_v56  ;;  %v1138_v28 = vsel %vm1135_vm6, %v6394_v61, %v6393_v54  ;;  %v2633_v26 = vld [vmem:[%s6099_s2 + $0x58] sm:$0xff]  ;;  %v6397_v56 = vld [vmem:[#allocation77_spill] sm:$0xff] }
 0x336   : > { %v1155_v62 = vadd.f32 %v1139_v59, %v1082_v52  ;;  %v994_v3 = vsel %vm989_vm4, %v6395_v4, %v6384_v39  ;;  %2754 = vmatprep.subr.mxu1 %v2635_v30  ;;  %v1154_v14 = vadd.f32 %v1138_v28, %v1081_v19  ;;  %v1212_v41 = vsel %vm1208_vm7, %v6397_v56, %v6396_v11  ;;  %v6398_v52 = vld [vmem:[#allocation108_spill] sm:$0xff]  ;;  %v2632_v39 = vld [vmem:[%s6099_s2 + $0x50] sm:$0xff]  ;;  %v6399_v63 = vld [vmem:[#allocation59_spill] sm:$0xff] }
 0x337   : > { %2078 = vrot.lane.b32.xlu0 %v5027_v43, %s3365_s14  ;;  %2226 = vrot.lane.b32.xlu1 %v6398_v52, %s6224_s21  ;;  %v1443_v30 = vadd.f32 %v1428_v13, %v1370_v31  ;;  %v1211_v6 = vsel %vm1208_vm7, %v6399_v63, %v6397_v56  ;;  %v940_v18 = vadd.f32 %v4777_v58, %v867_v9  ;;  %v6400_v19 = vld [vmem:[#allocation86_spill] sm:$0xff]  ;;  %v6401_v20 = vld [vmem:[#allocation100_spill] sm:$0xff]  ;;  %vm2084_vm4 = vcmask 531456  }
 0x338   : > { %v1068_v54 = vsel %vm1062_vm5, %v6401_v20, %v6400_v19  ;;  %2755 = vmatpush1.msra.mxu1 %v2634_v47  ;;  %v1156_v43 = vadd.f32 %v6392_v22, %v1083_v42  ;;  %v1011_v59 = vadd.f32 %v994_v3, %v938_v32  ;;  %v5323_v28 = vpop.permute.xlu0 %1924  ;;  %v5325_v4 = vpop.permute.xlu1 %1640  ;;  %v5329_v13 = vmul.f32 %v6372_v15, %v4469_v38  ;;  %v2631_v58 = vld [vmem:[%s6099_s2 + $0x48] sm:$0xff]  ;;  %v6402_v22 = vld [vmem:[#allocation91_spill] sm:$0xff] }
 0x339   : > { %v1085_v61 = vadd.f32 %v1068_v54, %v1012_v40  ;;  %2756 = vmatprep.subr.mxu1 %v2633_v26  ;;  %v1429_v31 = vsel %vm1427_vm9, %v6388_v25, %v6377_v60  ;;  %v1228_v9 = vadd.f32 %v1212_v41, %v1155_v62  ;;  %v1013_v40 = vadd.f32 %v6383_v2, %v940_v18  ;;  %v6403_v32 = vld [vmem:[#allocation103_spill] sm:$0xff]  ;;  %v6404_v26 = vld [vmem:[#allocation52_spill] sm:$0xff]  ;;  %v6406_v60 = vld [vmem:[#allocation109_spill] sm:$0xff] }
 0x33a   : > { %v1141_v47 = vsel %vm1135_vm6, %v6403_v32, %v6402_v22  ;;  %2757 = vmatpush1.msra.mxu1 %v2632_v39  ;;  %v2630_v3 = vld [vmem:[%s6099_s2 + $0x40] sm:$0xff]  ;;  %v1444_v52 = vadd.f32 %v1429_v31, %v1371_v8  ;;  %v1227_v63 = vadd.f32 %v1211_v6, %v1154_v14  ;;  %v6407_v2 = vld [vmem:[#allocation110_spill] sm:$0xff]  ;;  %v6408_v62 = vld [vmem:[#allocation37_spill] sm:$0xff]  ;;  %v1502_v39 = vsel %vm1500_vm11, %v6404_v26, %v6381_v51 }
 0x33b   : > { %v6405_v42 = vld [vmem:[#allocation43_spill] sm:$0xff]  ;;  %2312 = vrot.lane.b32.xlu0 %v6406_v60, %s3368_s24  ;;  %2394 = vrot.lane.b32.xlu1 %v6407_v2, %s6225_s25  ;;  %v2629_v25 = vld [vmem:[%s6099_s2 + $0x38] sm:$0xff]  ;;  %v1664_v41 = vadd.f32 %v6408_v62, %v5255_v37  ;;  %v6409_v8 = vld [vmem:[#allocation84_spill] sm:$0xff]  ;;  %v1229_v6 = vadd.f32 %v6396_v11, %v1156_v43  ;;  %v1158_v2 = vadd.f32 %v1141_v47, %v1085_v61 }
 0x33c   : > { %v1501_v56 = vsel %vm1500_vm11, %v6405_v42, %v6404_v26  ;;  %v1067_v14 = vsel %vm1062_vm5, %v6409_v8, %v6401_v20  ;;  %2758 = vmatprep.subr.mxu1 %v2631_v58  ;;  %v6410_v54 = vld [vmem:[#allocation66_spill] sm:$0xff]  ;;  %v6411_v31 = vld [vmem:[#allocation76_spill] sm:$0xff]  ;;  %v5366_v38 = vpop.permute.xlu0 %1780  ;;  %v5368_v37 = vpop.permute.xlu1 %1920  ;;  %v2628_v51 = vld [vmem:[%s6099_s2 + $0x30] sm:$0xff]  ;;  %v1086_v43 = vadd.f32 %v6400_v19, %v1013_v40  ;;  %v1517_v26 = vadd.f32 %v1502_v39, %v1444_v52 }
 0x33d   : > { %v1516_v18 = vadd.f32 %v1501_v56, %v1443_v30  ;;  %v1285_v42 = vsel %vm1281_vm8, %v6411_v31, %v6410_v54  ;;  %v1084_v60 = vadd.f32 %v1067_v14, %v1011_v59  ;;  %2759 = vmatpush1.msra.mxu1 %v2630_v3  ;;  %v6412_v30 = vld [vmem:[#allocation61_spill] sm:$0xff]  ;;  %v2627_v61 = vld [vmem:[%s6099_s2 + $0x28] sm:$0xff]  ;;  %v6414_v47 = vld [vmem:[#allocation47_spill] sm:$0xff]  ;;  %vm2242_vm5 = vcmask 392192  }
 0x33e   : > { %v1284_v20 = vsel %vm1281_vm8, %v6412_v30, %v6411_v31  ;;  %v1301_v11 = vadd.f32 %v1285_v42, %v1228_v9  ;;  %v6413_v58 = vld [vmem:[#allocation89_spill] sm:$0xff]  ;;  %2760 = vmatprep.subr.mxu1 %v2629_v25  ;;  %v1737_v3 = vadd.f32 %v6414_v47, %v1664_v41  ;;  %v6415_v8 = vld [vmem:[#allocation8_spill] sm:$0xff]  ;;  %v6416_v9 = vld [vmem:[#allocation111_spill] sm:$0xff]  ;;  %v1159_v52 = vadd.f32 %v6402_v22, %v1086_v43 }
 0x33f   : > { %v1140_v59 = vsel %vm1135_vm6, %v6413_v58, %v6403_v32  ;;  %v1300_v56 = vadd.f32 %v1284_v20, %v1227_v63  ;;  %2153 = vrot.lane.b32.xlu0 %v6415_v8, %s3366_s17  ;;  %2155 = vrot.lane.b32.xlu1 %v6416_v9, %s3366_s17  ;;  %v2626_v19 = vld [vmem:[%s6099_s2 + $0x20] sm:$0xff]  ;;  %v6417_v40 = vld [vmem:[#allocation53_spill] sm:$0xff]  ;;  %v6419_v63 = vld [vmem:[#allocation90_spill] sm:$0xff]  ;;  %v1302_v31 = vadd.f32 %v6410_v54, %v1229_v6  ;;  %vm2330_vm6 = vcmask 384000  }
 0x340   : > { %v6418_v32 = vld [vmem:[#allocation35_spill] sm:$0xff]  ;;  %v1575_v41 = vsel %vm1573_vm12, %v6417_v40, %v6382_v46  ;;  %v6420_v39 = vld [vmem:[#allocation102_spill] sm:$0xff]  ;;  %2761 = vmatpush1.msra.mxu1 %v2628_v51  ;;  %v6421_v42 = vld [vmem:[#allocation68_spill] sm:$0xff]  ;;  %v1157_v58 = vadd.f32 %v1140_v59, %v1084_v60  ;;  %v5405_v9 = vpop.permute.xlu0 %1715 }
 0x341   : > { %v1574_v25 = vsel %vm1573_vm12, %v6418_v32, %v6417_v40  ;;  %v1214_v14 = vsel %vm1208_vm7, %v6420_v39, %v6419_v63  ;;  %v6422_v30 = vld [vmem:[#allocation78_spill] sm:$0xff]  ;;  %v5407_v32 = vpop.permute.xlu1 %1717  ;;  %2762 = vmatprep.subr.mxu1 %v2627_v61  ;;  %v6423_v51 = vld [vmem:[#allocation63_spill] sm:$0xff]  ;;  %v6424_v43 = vld [vmem:[#allocation92_spill] sm:$0xff]  ;;  %v1590_v59 = vadd.f32 %v1575_v41, %v1517_v26  ;;  %v1375_v61 = vadd.f32 %v6421_v42, %v1302_v31 }
 0x342   : > { %v1358_v20 = vsel %vm1354_vm10, %v6422_v30, %v6421_v42  ;;  %v1231_v8 = vadd.f32 %v1214_v14, %v1158_v2  ;;  %v2625_v46 = vld [vmem:[%s6099_s2 + $0x18] sm:$0xff]  ;;  %v1589_v22 = vadd.f32 %v1574_v25, %v1516_v18  ;;  %v1357_v6 = vsel %vm1354_vm10, %v6423_v51, %v6422_v30  ;;  %v6425_v40 = vld [vmem:[#allocation12_spill] sm:$0xff]  ;;  %2763 = vmatpush1.msra.mxu1 %v2626_v19  ;;  %v2624_v2 = vld [vmem:[%s6099_s2 + $0x10] sm:$0xff] }
 0x343   : > { %v1374_v54 = vadd.f32 %v1358_v20, %v1301_v11  ;;  %v1287_v60 = vsel %vm1281_vm8, %v6425_v40, %v6424_v43  ;;  %v1373_v14 = vadd.f32 %v1357_v6, %v1300_v56  ;;  %v6426_v18 = vld [vmem:[#allocation17_spill] sm:$0xff]  ;;  %v6427_v25 = vld [vmem:[#allocation27_spill] sm:$0xff]  ;;  %v2623_v11 = vld [vmem:[%s6099_s2 + $0x8] sm:$0xff]  ;;  %v1232_v51 = vadd.f32 %v6419_v63, %v1159_v52  ;;  %2764 = vmatprep.subr.mxu1 %v2625_v46 }
 0x344   : > { %2316 = vrot.lane.b32.xlu0 %v6426_v18, %s3368_s24  ;;  %2318 = vrot.lane.b32.xlu1 %v6427_v25, %s3368_s24  ;;  %v6428_v19 = vld [vmem:[#allocation57_spill] sm:$0xff]  ;;  %v6429_v30 = vld [vmem:[#allocation46_spill] sm:$0xff]  ;;  %v6430_v26 = vld [vmem:[#allocation88_spill] sm:$0xff]  ;;  %v1304_v33 = vadd.f32 %v1287_v60, %v1231_v8  ;;  %v5443_v45 = vpop.permute.xlu0 %1855 }
 0x345   : > { %v1647_v20 = vsel %vm1646_vm13, %v6429_v30, %v6428_v19  ;;  %v1213_v56 = vsel %vm1208_vm7, %v6430_v26, %v6420_v39  ;;  %v6431_v41 = vld [vmem:[#allocation44_spill] sm:$0xff]  ;;  %v6432_v42 = vld [vmem:[#allocation70_spill] sm:$0xff]  ;;  %v5445_v30 = vpop.permute.xlu1 %1857  ;;  %2765 = vmatpush1.msra.mxu1 %v2624_v2  ;;  %v2622_v52 = vld [vmem:[%s6099_s2] sm:$0xff]  ;;  %vm2418_vm7 = vcmask 375808  }
 0x346   : > { %v5437_v31 = vadd.f32 %v6431_v41, %v1737_v3  ;;  %v1448_v6 = vadd.f32 %v6432_v42, %v1375_v61  ;;  %v6433_v18 = vld [vmem:[#allocation80_spill] sm:$0xff]  ;;  %v1230_v15 = vadd.f32 %v1213_v56, %v1157_v58  ;;  %v1648_v3 = vsel %vm1646_vm13, %v6428_v19, %v6408_v62  ;;  %v6435_v58 = vld [vmem:[#allocation93_spill] sm:$0xff]  ;;  %2766 = vmatprep.subr.mxu1 %v2623_v11  ;;  %v2685_v60 = vld [vmem:[%s6099_s2 + $0x1f8] sm:$0xff] }
 0x347   : > { %v1431_v25 = vsel %vm1427_vm9, %v6433_v18, %v6432_v42  ;;  %v6434_v63 = vld [vmem:[#allocation72_spill] sm:$0xff]  ;;  %v1286_v8 = vsel %vm1281_vm8, %v6435_v58, %v6425_v40  ;;  %v1662_v2 = vadd.f32 %v1647_v20, %v1589_v22  ;;  %v1663_v61 = vadd.f32 %v1648_v3, %v1590_v59  ;;  %v6437_v19 = vld [vmem:[#allocation113_spill] sm:$0xff]  ;;  %v6438_v40 = vld [vmem:[#allocation54_spill] sm:$0xff]  ;;  %2767 = vmatpush1.msra.mxu1 %v2622_v52 }
 0x348   : > { %v1430_v39 = vsel %vm1427_vm9, %v6434_v63, %v6433_v18  ;;  %v1447_v46 = vadd.f32 %v1431_v25, %v1374_v54  ;;  %v6436_v62 = vld [vmem:[#allocation112_spill] sm:$0xff]  ;;  %2486 = vrot.lane.b32.xlu1 %v6437_v19, %s3370_s28  ;;  %v2684_v54 = vld [vmem:[%s6099_s2 + $0x1f0] sm:$0xff]  ;;  %v1721_v22 = vsel %vm1719_vm14, %v6438_v40, %v6414_v47  ;;  %v1305_v59 = vadd.f32 %v6424_v43, %v1232_v51  ;;  %v6443_v3 = vld [vmem:[#allocation79_spill] sm:$0xff] }
 0x349   : > { %v1446_v26 = vadd.f32 %v1430_v39, %v1373_v14  ;;  %2484 = vrot.lane.b32.xlu0 %v6436_v62, %s3370_s28  ;;  %v6439_v11 = vld [vmem:[#allocation41_spill] sm:$0xff]  ;;  %v6440_v14 = vld [vmem:[#allocation95_spill] sm:$0xff]  ;;  %v6441_v20 = vld [vmem:[#allocation104_spill] sm:$0xff]  ;;  %v1303_v39 = vadd.f32 %v1286_v8, %v1230_v15  ;;  %v5483_v62 = vpop.permute.xlu0 %1995  ;;  %v5485_v19 = vpop.permute.xlu1 %1997  ;;  %2768 = vmatprep.subr.mxu1 %v2685_v60  ;;  %v1736_v60 = vadd.f32 %v1721_v22, %v1663_v61  ;;  %vm2506_vm8 = vcmask 367616  }
 0x34a   : > { %v1720_v56 = vsel %vm1719_vm14, %v6439_v11, %v6438_v40  ;;  %v1360_v42 = vsel %vm1354_vm10, %v6441_v20, %v6440_v14  ;;  %v6442_v18 = vld [vmem:[#allocation65_spill] sm:$0xff]  ;;  %v2683_v47 = vld [vmem:[%s6099_s2 + $0x1e8] sm:$0xff]  ;;  %v6444_v43 = vld [vmem:[#allocation67_spill] sm:$0xff]  ;;  %v1378_v52 = vadd.f32 %v6440_v14, %v1305_v59  ;;  %2769 = vmatpush2.msra.mxu1 %v2684_v54 }
 0x34b   : > { %v1521_v25 = vadd.f32 %v6442_v18, %v1448_v6  ;;  %v1504_v63 = vsel %vm1500_vm11, %v6443_v3, %v6442_v18  ;;  %v1377_v58 = vadd.f32 %v1360_v42, %v1304_v33  ;;  %v1503_v51 = vsel %vm1500_vm11, %v6444_v43, %v6443_v3  ;;  %v6445_v40 = vld [vmem:[#allocation96_spill] sm:$0xff]  ;;  %v6446_v11 = vld [vmem:[#allocation13_spill] sm:$0xff]  ;;  %v2682_v33 = vld [vmem:[%s6099_s2 + $0x1e0] sm:$0xff]  ;;  %2770 = vmatprep.subr.mxu1 %v2683_v47 }
 0x34c   : > { %v1520_v6 = vadd.f32 %v1504_v63, %v1447_v46  ;;  %v1433_v15 = vsel %vm1427_vm9, %v6446_v11, %v6445_v40  ;;  %v1735_v8 = vadd.f32 %v1720_v56, %v1662_v2  ;;  %v1519_v42 = vadd.f32 %v1503_v51, %v1446_v26  ;;  %2232 = vrot.lane.b32.xlu1 %v5106_v36, %s6224_s21  ;;  %v2681_v46 = vld [vmem:[%s6099_s2 + $0x1d8] sm:$0xff]  ;;  %v6448_v14 = vld [vmem:[#allocation49_spill] sm:$0xff] }
 0x34d   : > { %2151 = vrot.lane.b32.xlu0 %v5089_v10, %s3366_s17  ;;  %v6447_v59 = vld [vmem:[#allocation58_spill] sm:$0xff]  ;;  %v6449_v18 = vld [vmem:[#allocation73_spill] sm:$0xff]  ;;  %v1451_v2 = vadd.f32 %v6445_v40, %v1378_v52  ;;  %v1450_v63 = vadd.f32 %v1433_v15, %v1377_v58  ;;  %v5521_v43 = vpop.permute.xlu0 %1713  ;;  %2771 = vmatpush2.msra.mxu1 %v2682_v33  ;;  %v6453_v52 = vld [vmem:[#allocation99_spill] sm:$0xff]  ;;  %s6479_s17 = smov 46  }
 0x34e   : > { %v1793_v54 = vsel %vm1792_vm15, %v6448_v14, %v6447_v59  ;;  %v1594_v3 = vadd.f32 %v6449_v18, %v1521_v25  ;;  %v6450_v61 = vld [vmem:[#allocation94_spill] sm:$0xff]  ;;  %v1794_v10 = vsel %vm1792_vm15, %v6447_v59, %v6431_v41  ;;  %v5523_v25 = vpop.permute.xlu1 %1853  ;;  %v6454_v59 = vld [vmem:[#allocation97_spill] sm:$0xff]  ;;  %2772 = vmatprep.subr.mxu1 %v2681_v46  ;;  %v2679_v58 = vld [vmem:[%s6099_s2 + $0x1c8] sm:$0xff] }
 0x34f   : > { %v1359_v26 = vsel %vm1354_vm10, %v6450_v61, %v6441_v20  ;;  %v6451_v36 = vld [vmem:[#allocation82_spill] sm:$0xff]  ;;  %v2680_v20 = vld [vmem:[%s6099_s2 + $0x1d0] sm:$0xff]  ;;  %v1524_v40 = vadd.f32 %v6453_v52, %v1451_v2  ;;  %v5538_v15 = vadd.f32 %v1793_v54, %v1735_v8  ;;  %v1809_v33 = vadd.f32 %v1794_v10, %v1736_v60 }
 0x350   : > { %v1577_v56 = vsel %vm1573_vm12, %v6451_v36, %v6449_v18  ;;  %v1376_v22 = vadd.f32 %v1359_v26, %v1303_v39  ;;  %v6452_v47 = vld [vmem:[#allocation74_spill] sm:$0xff]  ;;  %v1432_v39 = vsel %vm1427_vm9, %v6454_v59, %v6446_v11  ;;  %2400 = vrot.lane.b32.xlu1 %v5120_v7, %s6225_s25  ;;  %v6455_v11 = vld [vmem:[#allocation105_spill] sm:$0xff]  ;;  %v6456_v18 = vld [vmem:[#allocation107_spill] sm:$0xff]  ;;  %2773 = vmatpush2.msra.mxu1 %v2680_v20  ;;  %vm2594_vm9 = vcmask 359424  }
 0x351   : > { %v1576_v51 = vsel %vm1573_vm12, %v6452_v47, %v6451_v36  ;;  %v1593_v41 = vadd.f32 %v1577_v56, %v1520_v6  ;;  %2314 = vrot.lane.b32.xlu0 %v5116_v34, %s3368_s24  ;;  %v2678_v6 = vld [vmem:[%s6099_s2 + $0x1c0] sm:$0xff]  ;;  %v1506_v46 = vsel %vm1500_vm11, %v6455_v11, %v6453_v52  ;;  %v1597_v2 = vadd.f32 %v6456_v18, %v1524_v40  ;;  %v6457_v8 = vld [vmem:[#allocation69_spill] sm:$0xff]  ;;  %v5558_v10 = vpop.permute.xlu0 %1993  ;;  %v6460_v56 = vld [vmem:[#allocation106_spill] sm:$0xff] }
 0x352   : > { %v1592_v14 = vadd.f32 %v1576_v51, %v1519_v42  ;;  %v1667_v54 = vadd.f32 %v6457_v8, %v1594_v3  ;;  %v6458_v60 = vld [vmem:[#allocation81_spill] sm:$0xff]  ;;  %v6459_v42 = vld [vmem:[#allocation71_spill] sm:$0xff]  ;;  %v1449_v61 = vadd.f32 %v1432_v39, %v1376_v22  ;;  %v1523_v26 = vadd.f32 %v1506_v46, %v1450_v63  ;;  %v5560_v36 = vpop.permute.xlu1 %1788  ;;  %2774 = vmatprep.subr.mxu1 %v2679_v58  ;;  %v2677_v3 = vld [vmem:[%s6099_s2 + $0x1b8] sm:$0xff] }
 0x353   : > { %v1649_v34 = vsel %vm1646_vm13, %v6459_v42, %v6458_v60  ;;  %v1650_v7 = vsel %vm1646_vm13, %v6458_v60, %v6457_v8  ;;  %v1579_v20 = vsel %vm1573_vm12, %v6460_v56, %v6456_v18  ;;  %v6461_v51 = vld [vmem:[#allocation16_spill] sm:$0xff]  ;;  %v6462_v52 = vld [vmem:[#allocation15_spill] sm:$0xff]  ;;  %v1670_v22 = vadd.f32 %v5247_v57, %v1597_v2  ;;  %2775 = vmatpush2.msra.mxu1 %v2678_v6  ;;  %v2676_v63 = vld [vmem:[%s6099_s2 + $0x1b0] sm:$0xff] }
 0x354   : > { %v1666_v47 = vadd.f32 %v1650_v7, %v1593_v41  ;;  %v1723_v40 = vsel %vm1719_vm14, %v6462_v52, %v6461_v51  ;;  %v6463_v59 = vld [vmem:[#allocation98_spill] sm:$0xff]  ;;  %v1740_v58 = vadd.f32 %v6461_v51, %v1667_v54  ;;  %v1665_v46 = vadd.f32 %v1649_v34, %v1592_v14  ;;  %2236 = vrot.lane.b32.xlu1 %v5154_v17, %s6224_s21  ;;  %v2675_v41 = vld [vmem:[%s6099_s2 + $0x1a8] sm:$0xff] }
 0x355   : > { %v1505_v39 = vsel %vm1500_vm11, %v6463_v59, %v6455_v11  ;;  %2482 = vrot.lane.b32.xlu0 %v5137_v24, %s3370_s28  ;;  %v6464_v6 = vld [vmem:[#allocation114_spill] sm:$0xff]  ;;  %v1578_v11 = vsel %vm1573_vm12, %v5148_v29, %v6460_v56  ;;  %v1796_v14 = vsel %vm1792_vm15, %v5249_v50, %v5288_v35  ;;  %v1743_v24 = vadd.f32 %v5407_v32, %v1670_v22  ;;  %v5601_v60 = vpop.permute.xlu0 %1790  ;;  %v2674_v29 = vld [vmem:[%s6099_s2 + $0x1a0] sm:$0xff] }
 0x356   : > { %v1867_v18 = vsel %vm1865_vm1, %v6464_v6, %v5102_v55  ;;  %2776 = vmatprep.subr.mxu1 %v2677_v3  ;;  %v1522_v17 = vadd.f32 %v1505_v39, %v1449_v61  ;;  %v5596_v2 = vadd.f32 %v1579_v20, %v1523_v26  ;;  %v1739_v8 = vadd.f32 %v1723_v40, %v1666_v47  ;;  %v5603_v42 = vpop.permute.xlu1 %1928  ;;  %v2673_v26 = vld [vmem:[%s6099_s2 + $0x198] sm:$0xff] }
 0x357   : > { %v1722_v54 = vsel %vm1719_vm14, %v5150_v49, %v6462_v52  ;;  %2777 = vmatpush2.msra.mxu1 %v2676_v63  ;;  %v1883_v34 = vadd.f32 %v5102_v55, %v5437_v31  ;;  %v1813_v7 = vadd.f32 %v5288_v35, %v1740_v58  ;;  %v1869_v61 = vsel %vm1865_vm1, %v5443_v45, %v5445_v30  ;;  %v2672_v55 = vld [vmem:[%s6099_s2 + $0x190] sm:$0xff] }
 0x358   : > { %v5615_v49 = vadd.f32 %v5601_v60, %v1743_v24  ;;  %2778 = vmatprep.subr.mxu1 %v2675_v41  ;;  %v1882_v3 = vadd.f32 %v1867_v18, %v1809_v33  ;;  %v1595_v56 = vadd.f32 %v1578_v11, %v1522_v17  ;;  %v1812_v20 = vadd.f32 %v1796_v14, %v1739_v8 }
 0x359   : > { %2238 = vrot.lane.b32.xlu0 %v5158_v12, %s6224_s21  ;;  %2404 = vrot.lane.b32.xlu1 %v5162_v44, %s6225_s25  ;;  %v1738_v35 = vadd.f32 %v1722_v54, %v1665_v46  ;;  %v1940_v31 = vsel %vm1938_vm2, %v5290_v1, %v5323_v28  ;;  %v1651_v33 = vsel %vm1646_vm13, %v5325_v4, %v5208_v23  ;;  %v1931_v40 = vpop.permute.xlu0 %1930  ;;  %v2671_v4 = vld [vmem:[%s6099_s2 + $0x188] sm:$0xff]  ;;  %vm2720_vm10 = vcmask 490496  }
 0x35a   : > { %v1886_v47 = vadd.f32 %v5445_v30, %v1813_v7  ;;  %2779 = vmatpush2.msra.mxu1 %v2674_v29  ;;  %v1866_v12 = vsel %vm1865_vm1, %v5206_v21, %v6464_v6  ;;  %v1956_v44 = vadd.f32 %v5323_v28, %v1883_v34  ;;  %v1795_v51 = vsel %vm1792_vm15, %v5366_v38, %v5249_v50  ;;  %v2069_v22 = vpop.permute.xlu1 %2068  ;;  %v2670_v50 = vld [vmem:[%s6099_s2 + $0x180] sm:$0xff] }
 0x35b   : > { %v1885_v52 = vadd.f32 %v1869_v61, %v1812_v20  ;;  %2780 = vmatprep.subr.mxu1 %v2673_v26  ;;  %v2013_v30 = vsel %vm2011_vm3, %v5483_v62, %v5485_v19  ;;  %v1724_v21 = vsel %vm1719_vm14, %v5521_v43, %v5405_v9  ;;  %v1942_v28 = vsel %vm1938_vm2, %v5603_v42, %v1931_v40  ;;  %v2669_v43 = vld [vmem:[%s6099_s2 + $0x178] sm:$0xff]  ;;  %v6465_v61 = vld [vmem:[#allocation21_spill] sm:$0xff] }
 0x35c   : > { %v5652_v38 = vadd.f32 %v1931_v40, %v1886_v47  ;;  %2781 = vmatpush2.msra.mxu1 %v2672_v55  ;;  %v1955_v63 = vadd.f32 %v1940_v31, %v1882_v3  ;;  %v1668_v59 = vadd.f32 %v1651_v33, %v1595_v56  ;;  %v1881_v58 = vadd.f32 %v1866_v12, %v5538_v15  ;;  %v2664_v3 = vld [vmem:[%s6099_s2 + $0x150] sm:$0xff]  ;;  %v2663_v56 = vld [vmem:[%s6099_s2 + $0x148] sm:$0xff]  ;;  %v6466_v12 = vld [vmem:[#allocation18_spill] sm:$0xff] }
 0x35d   : > { %v5657_v39 = vadd.f32 %v1942_v28, %v1885_v52  ;;  %2406 = vrot.lane.b32.xlu0 %v5183_v0, %s6225_s25  ;;  %2572 = vrot.lane.b32.xlu1 %v5191_v16, %s3371_s29  ;;  %v1652_v46 = vsel %vm1646_vm13, %v5208_v23, %v5247_v57  ;;  %v1939_v41 = vsel %vm1938_vm2, %v5368_v37, %v5290_v1  ;;  %v2071_v14 = vpop.permute.xlu0 %2070  ;;  %v2668_v23 = vld [vmem:[%s6099_s2 + $0x170] sm:$0xff]  ;;  %v6468_v52 = vld [vmem:[#allocation14_spill] sm:$0xff]  ;;  %vm2921_vm11 = vcmask 195584  }
 0x35e   : > { %v2029_v0 = vadd.f32 %v5485_v19, %v1956_v44  ;;  %2782 = vmatprep.subr.mxu1 %v2671_v4  ;;  %v1811_v6 = vadd.f32 %v1795_v51, %v1738_v35  ;;  %v2028_v16 = vadd.f32 %v2013_v30, %v1955_v63  ;;  %v1741_v18 = vadd.f32 %v1724_v21, %v1668_v59  ;;  %v1787_v15 = vpop.permute.xlu1 %1786  ;;  %v6467_v44 = vld [vmem:[#allocation19_spill] sm:$0xff]  ;;  %v6469_v40 = vld [vmem:[#allocation22_spill] sm:$0xff]  ;;  %v2660_v63 = vld [vmem:[%s6099_s2 + $0x130] sm:$0xff] }
 0x35f   : > { %v1868_v11 = vsel %vm1865_vm1, %v5523_v25, %v5443_v45  ;;  %2783 = vmatpush2.msra.mxu1 %v2670_v50  ;;  %v2012_v57 = vsel %vm2011_vm3, %v5558_v10, %v5483_v62  ;;  %v2086_v1 = vsel %vm2084_vm4, %v2069_v22, %v2071_v14  ;;  %v1797_v19 = vsel %vm1792_vm15, %v1787_v15, %v5560_v36  ;;  %v2667_v45 = vld [vmem:[%s6099_s2 + $0x168] sm:$0xff]  ;;  %v2666_v62 = vld [vmem:[%s6099_s2 + $0x160] sm:$0xff]  ;;  %v2701_v10 = vld [vmem:[%s6099_s2 + $0x278] sm:$0xf] }
 0x360   : > { %v5684_v37 = vadd.f32 %v2071_v14, %v2029_v0  ;;  %2784 = vmatprep.subr.mxu1 %v2669_v43  ;;  %v1954_v25 = vadd.f32 %v1939_v41, %v1881_v58  ;;  %v5691_v24 = vadd.f32 %v2086_v1, %v2028_v16  ;;  %v5693_v17 = vadd.f32 %v1797_v19, %v1741_v18  ;;  %v2662_v4 = vld [vmem:[%s6099_s2 + $0x140] sm:$0xff]  ;;  %v2697_v30 = vld [vmem:[%s6099_s2 + $0x258] sm:$0xff]  ;;  %v2695_v43 = vld [vmem:[%s6099_s2 + $0x248] sm:$0xff] }
 0x361   : > { %2574 = vrot.lane.b32.xlu0 %v5195_v53, %s3371_s29  ;;  %2234 = vrot.lane.b32.xlu1 %v5329_v13, %s6224_s21  ;;  %v1725_v8 = vsel %vm1719_vm14, %v5405_v9, %v5407_v32  ;;  %v2289_v54 = vmul.f32 %v6362_v48, %v6370_v5  ;;  %v1669_v53 = vadd.f32 %v1652_v46, %v5596_v2  ;;  %v1927_v34 = vpop.permute.xlu0 %1926  ;;  %v2665_v9 = vld [vmem:[%s6099_s2 + $0x158] sm:$0xff]  ;;  %v6470_v41 = vld [vmem:[#allocation56_spill] sm:$0xff]  ;;  %v2694_v14 = vld [vmem:[%s6099_s2 + $0x240] sm:$0xff]  ;;  %s6478_s21 = smov 48  }
 0x362   : > { %2785 = vmatpush2.msra.mxu1 %v2668_v23  ;;  %3090 = vmatprep.subr.msk.mxu0 %vm365_vm0, %v2701_v10  ;;  %v1884_v13 = vadd.f32 %v1868_v11, %v1811_v6  ;;  %v2027_v29 = vadd.f32 %v2012_v57, %v1954_v25  ;;  %v2067_v7 = vpop.permute.xlu1 %2066  ;;  %v2374_v26 = vmul.f32 %v6465_v61, %v4291_v27  ;;  %v2661_v50 = vld [vmem:[%s6099_s2 + $0x138] sm:$0xff]  ;;  %v2659_v11 = vld [vmem:[%s6099_s2 + $0x128] sm:$0xff]  ;;  %v2658_v57 = vld [vmem:[%s6099_s2 + $0x120] sm:$0xff] }
 0x363   : > { %2786 = vmatprep.subr.mxu1 %v2667_v45  ;;  %v1798_v48 = vsel %vm1792_vm15, %v5560_v36, %v5601_v60  ;;  %v1941_v32 = vsel %vm1938_vm2, %v1927_v34, %v5603_v42  ;;  %v2085_v2 = vsel %vm2084_vm4, %v2067_v7, %v2069_v22  ;;  %v1742_v20 = vadd.f32 %v1725_v8, %v1669_v53  ;;  %v2700_v36 = vld [vmem:[%s6099_s2 + $0x270] sm:$0xf]  ;;  %v2699_v60 = vld [vmem:[%s6099_s2 + $0x268] sm:$0xff]  ;;  %v2698_v42 = vld [vmem:[%s6099_s2 + $0x260] sm:$0xff]  ;;  %v5819_v34 = vpop.f32.mrf.mxu0 }
 0x364   : > { %2787 = vmatpush2.msra.mxu1 %v2666_v62  ;;  %v5729_v55 = vadd.f32 %v1941_v32, %v1884_v13  ;;  %v5731_v35 = vadd.f32 %v2085_v2, %v2027_v29  ;;  %3091 = vmatpush1.msk.msra.mxu0 %vm365_vm0, %v2700_v36  ;;  %v2461_v51 = vmul.f32 %v6467_v44, %v6466_v12  ;;  %v6471_v0 = vld [vmem:[#allocation10_spill] sm:$0xff]  ;;  %vm2157_vm0 = vcmask 523264   ;;  %v2692_v45 = vld [vmem:[%s6099_s2 + $0x230] sm:$0xff]  ;;  %v6473_v10 = vld [vmem:[#allocation28_spill] sm:$0xff] }
 0x365   : > { %2320 = vrot.lane.b32.xlu0 %v2289_v54, %s3368_s24  ;;  %2402 = vrot.lane.b32.xlu1 %v2374_v26, %s6225_s25  ;;  %v1815_v31 = vadd.f32 %v1798_v48, %v1742_v20  ;;  %v5745_v33 = vpop.permute.xlu0 %1861  ;;  %v2546_v22 = vmul.f32 %v6469_v40, %v6468_v52  ;;  %v2291_v6 = vmul.f32 %v6471_v0, %v6470_v41  ;;  %v6472_v16 = vld [vmem:[#allocation42_spill] sm:$0xff]  ;;  %v6475_v54 = vld [vmem:[#allocation20_spill] sm:$0xff]  ;;  %v2656_v13 = vld [vmem:[%s6099_s2 + $0x110] sm:$0xff]  ;;  %s3102_s25 = sshll.u32 %s3444_s13, 7  ;;  %s3372_s13 = smov [#allocation2]  }
 0x366   : > { %2788 = vmatprep.subr.mxu1 %v2665_v9  ;;  %v1864_v47 = vpop.permute.xlu1 %1863  ;;  %2837 = vmatprep.subr.mxu0 %v2699_v60  ;;  %v2292_v18 = vmul.f32 %v6471_v0, %v6472_v16  ;;  %v2693_v1 = vld [vmem:[%s6099_s2 + $0x238] sm:$0xff]  ;;  %v2691_v29 = vld [vmem:[%s6099_s2 + $0x228] sm:$0xff]  ;;  %v2690_v48 = vld [vmem:[%s6099_s2 + $0x220] sm:$0xff]  ;;  %s3264_s23 = sshll.u32 %s3372_s13, 4  ;;  %s3265_s23 = int_to_ptr.vmem [resolvable:$false] %s3264_s23 }
 0x367   : > { %2789 = vmatpush2.msra.mxu1 %v2664_v3  ;;  %v1871_v21 = vsel %vm1865_vm1, %v5745_v33, %v1864_v47  ;;  %v5760_v28 = vadd.f32 %v1864_v47, %v5615_v49  ;;  %2838 = vmatpush1.msra.mxu0 %v2698_v42  ;;  %v2696_v49 = vld [vmem:[%s6099_s2 + $0x250] sm:$0xff]  ;;  %v2655_v9 = vld [vmem:[%s6099_s2 + $0x108] sm:$0xff]  ;;  %v2689_v2 = vld [vmem:[%s6099_s2 + $0x218] sm:$0xff] }
 0x368   : > { %2790 = vmatprep.subr.mxu1 %v2663_v56  ;;  %v5768_v59 = vadd.f32 %v1871_v21, %v1815_v31  ;;  %2839 = vmatprep.subr.mxu0 %v2697_v30  ;;  %v6476_v20 = vld [vmem:[#allocation9_spill] sm:$0xff]  ;;  %v2687_v44 = vld [vmem:[%s6099_s2 + $0x208] sm:$0xff]  ;;  %v2377_v30 = vmul.f32 %v6465_v61, %v6370_v5 }
 0x369   : > { %2488 = vrot.lane.b32.xlu0 %v2461_v51, %s3370_s28  ;;  %2570 = vrot.lane.b32.xlu1 %v2546_v22, %s3371_s29  ;;  %v2002_v58 = vpop.permute.xlu0 %2001  ;;  %v2205_v36 = vmul.f32 %v6476_v20, %v5819_v34  ;;  %v2688_v42 = vld [vmem:[%s6099_s2 + $0x210] sm:$0xff]  ;;  %v6480_v61 = vld [vmem:[#allocation24_spill] sm:$0xff] }
 0x36a   : > { %2791 = vmatpush2.msra.mxu1 %v2662_v4  ;;  %v2004_v46 = vpop.permute.xlu1 %2003  ;;  %2840 = vmatpush1.msra.mxu0 %v2696_v49  ;;  %v2549_v49 = vmul.f32 %v6469_v40, %v6466_v12  ;;  %v6481_v12 = vld [vmem:[#allocation11_spill] sm:$0xff] }
 0x36b   : > { %2792 = vmatprep.subr.mxu1 %v2661_v50  ;;  %v2015_v15 = vsel %vm2011_vm3, %v2002_v58, %v2004_v46  ;;  %v5790_v23 = vadd.f32 %v2004_v46, %v5652_v38  ;;  %2841 = vmatprep.subr.mxu0 %v2695_v43  ;;  %v2657_v38 = vld [vmem:[%s6099_s2 + $0x118] sm:$0xff]  ;;  %v2379_v43 = vmul.f32 %v6480_v61, %v6470_v41 }
 0x36c   : > { %2793 = vmatpush2.msra.mxu1 %v2660_v63  ;;  %v5799_v19 = vadd.f32 %v2015_v15, %v5657_v39  ;;  %2842 = vmatpush1.msra.mxu0 %v2694_v14  ;;  %v6474_v39 = vld [vmem:[#allocation23_spill] sm:$0xff]  ;;  %v2551_v40 = vmul.f32 %v6481_v12, %v6473_v10 }
 0x36d   : > { %2324 = vrot.lane.b32.xlu0 %v2291_v6, %s3368_s24  ;;  %2326 = vrot.lane.b32.xlu1 %v2292_v18, %s3368_s24  ;;  %v2142_v25 = vpop.permute.xlu0 %2141  ;;  %v2463_v8 = vmul.f32 %v6474_v39, %v6473_v10  ;;  %v2464_v53 = vmul.f32 %v6474_v39, %v6475_v54  ;;  %v2462_v21 = vmul.f32 %v6474_v39, %v4291_v27 }
 0x36e   : > { %2794 = vmatprep.subr.mxu1 %v2659_v11  ;;  %v2144_v62 = vpop.permute.xlu1 %2143  ;;  %2843 = vmatprep.subr.mxu0 %v2693_v1  ;;  %v2380_v11 = vmul.f32 %v6480_v61, %v6472_v16  ;;  %v2552_v1 = vmul.f32 %v6481_v12, %v6475_v54  ;;  %v2465_v54 = vmul.f32 %v6474_v39, %v6370_v5 }
 0x36f   : > { %2795 = vmatpush2.msra.mxu1 %v2658_v57  ;;  %v2159_v7 = vsel %vm2157_vm0, %v2142_v25, %v2144_v62  ;;  %v5823_v26 = vadd.f32 %v2144_v62, %v5684_v37  ;;  %2844 = vmatpush1.msra.mxu0 %v2692_v45  ;;  %v2654_v37 = vld [vmem:[%s6099_s2 + $0x100] sm:$0xff] }
 0x370   : > { %2796 = vmatprep.subr.mxu1 %v2657_v38  ;;  %v2174_v32 = vadd.f32 %v2159_v7, %v5691_v24  ;;  %2845 = vmatprep.subr.mxu0 %v2691_v29  ;;  %v6477_v24 = vld [vmem:[#allocation39_spill] sm:$0xff]  ;;  %v2293_v38 = vmul.f32 %v6471_v0, %v5819_v34 }
 0x371   : > { %2492 = vrot.lane.b32.xlu0 %v2463_v8, %s3370_s28  ;;  %2494 = vrot.lane.b32.xlu1 %v2464_v53, %s3370_s28  ;;  %v1860_v3 = vpop.permute.xlu0 %1859  ;;  %v2290_v60 = vmul.f32 %v6471_v0, %v6477_v24  ;;  %v2378_v8 = vmul.f32 %v6480_v61, %v6477_v24 }
 0x372   : > { %2797 = vmatpush2.msra.mxu1 %v2656_v13  ;;  %v2000_v56 = vpop.permute.xlu1 %1999  ;;  %2846 = vmatpush1.msra.mxu0 %v2690_v48  ;;  %v1870_v31 = vsel %vm1865_vm1, %v1860_v3, %v5745_v33  ;;  %v2686_v33 = vld [vmem:[%s6099_s2 + $0x200] sm:$0xff]  ;;  %v2550_v48 = vmul.f32 %v6481_v12, %v4291_v27 }
 0x373   : > { %2798 = vmatprep.subr.mxu1 %v2655_v9  ;;  %v2014_v47 = vsel %vm2011_vm3, %v2000_v56, %v2002_v58  ;;  %2847 = vmatprep.subr.mxu0 %v2689_v2  ;;  %v1887_v51 = vadd.f32 %v1870_v31, %v5693_v17 }
 0x374   : > { %2799 = vmatpush2.msra.mxu1 %v2654_v37  ;;  %v2030_v52 = vadd.f32 %v2014_v47, %v5729_v55  ;;  %2848 = vmatpush1.msra.mxu0 %v2688_v42 }
 0x375   : > { %2240 = vrot.lane.b32.xlu0 %v2205_v36, %s6478_s21  ;;  %2322 = vrot.lane.b32.xlu1 %v2290_v60, %s3368_s24  ;;  %v2140_v22 = vpop.permute.xlu0 %2139  ;;  %v2381_v60 = vmul.f32 %v6480_v61, %v5819_v34  ;;  %s3017_s21 = scalar_lea.hbm %s6106_s9, %s3102_s25 }
 0x376   : > { %v1935_v4 = vpop.permute.xlu1 %1934  ;;  %2849 = vmatprep.subr.mxu0 %v2687_v44  ;;  %v2158_v17 = vsel %vm2157_vm0, %v2140_v22, %v2142_v25 }
 0x377   : > { %2850 = vmatpush1.msra.mxu0 %v2686_v33  ;;  %v2173_v55 = vadd.f32 %v2158_v17, %v5731_v35 }
 0x379   : > { %2408 = vrot.lane.b32.xlu0 %v2377_v30, %s6479_s17  ;;  %2490 = vrot.lane.b32.xlu1 %v2462_v21, %s3370_s28  ;;  %v1937_v50 = vpop.permute.xlu0 %1936 }
 0x37a   : > { %v2075_v63 = vpop.permute.xlu1 %2074  ;;  %v1944_v58 = vsel %vm1938_vm2, %v1935_v4, %v1937_v50  ;;  %v1962_v46 = vadd.f32 %v1937_v50, %v5760_v28 }
 0x37b   : > { %v1961_v6 = vadd.f32 %v1944_v58, %v5768_v59 }
 0x37d   : > { %2576 = vrot.lane.b32.xlu0 %v2549_v49, %s3371_s29  ;;  %2412 = vrot.lane.b32.xlu1 %v2379_v43, %s6479_s17  ;;  %v2077_v35 = vpop.permute.xlu0 %2076 }
 0x37e   : > { %v2221_v18 = vpop.permute.xlu1 %2220  ;;  %v2088_v14 = vsel %vm2084_vm4, %v2075_v63, %v2077_v35  ;;  %v2105_v15 = vadd.f32 %v2077_v35, %v5790_v23 }
 0x37f   : > { %v2104_v28 = vadd.f32 %v2088_v14, %v5799_v19  ;;  %v2702_v14 = vld [vmem:[%s6103_s6] sm:$0xff] }
 0x381   : > { %2414 = vrot.lane.b32.xlu0 %v2380_v11, %s6479_s17  ;;  %2580 = vrot.lane.b32.xlu1 %v2551_v40, %s3371_s29  ;;  %v2223_v59 = vpop.permute.xlu0 %2222 }
 0x382   : > { %v1933_v57 = vpop.permute.xlu1 %1932  ;;  %v2244_v45 = vsel %vm2242_vm5, %v2221_v18, %v2223_v59 }
 0x383   : > { %v1943_v25 = vsel %vm1938_vm2, %v1933_v57, %v1935_v4  ;;  %v5892_v23 = vadd.f32 %v2244_v45, %v2174_v32  ;;  %v6482_v32 = vld [vmem:[#allocation25_spill] sm:$0xff]  ;;  %v6483_v4 = vld [vmem:[#allocation26_spill] sm:$0xff]  ;;  %v2915_v57 = vld [vmem:[%s6105_s8] sm:$0xf] }
 0x384   : > { %v1960_v19 = vadd.f32 %v1943_v25, %v1887_v51  ;;  %v2467_v37 = vmul.f32 %v6482_v32, %v6470_v41  ;;  %v2468_v36 = vmul.f32 %v6482_v32, %v6472_v16  ;;  %v2466_v51 = vmul.f32 %v6482_v32, %v6477_v24 }
 0x385   : > { %2582 = vrot.lane.b32.xlu0 %v2552_v1, %s3371_s29  ;;  %2328 = vrot.lane.b32.xlu1 %v2293_v38, %s3368_s24  ;;  %v2073_v62 = vpop.permute.xlu0 %2072  ;;  %v2555_v30 = vmul.f32 %v6483_v4, %v6470_v41  ;;  %v2556_v21 = vmul.f32 %v6483_v4, %v6472_v16  ;;  %v2469_v61 = vmul.f32 %v6482_v32, %v5819_v34 }
 0x386   : > { %v2219_v10 = vpop.permute.xlu1 %2218  ;;  %v2087_v0 = vsel %vm2084_vm4, %v2073_v62, %v2075_v63  ;;  %v2554_v41 = vmul.f32 %v6483_v4, %v6477_v24 }
 0x387   : > { %v2243_v53 = vsel %vm2242_vm5, %v2219_v10, %v2221_v18  ;;  %v2103_v13 = vadd.f32 %v2087_v0, %v2030_v52  ;;  %v2553_v52 = vmul.f32 %v6481_v12, %v6370_v5  ;;  %v2557_v18 = vmul.f32 %v6483_v4, %v5819_v34  ;;  %v2704_v12 = vld [vmem:[%s6103_s6 + $0x10] sm:$0xff] }
 0x388   : > { %v2261_v29 = vadd.f32 %v2243_v53, %v2173_v55 }
 0x389   : > { %2410 = vrot.lane.b32.xlu0 %v2378_v8, %s6479_s17  ;;  %2496 = vrot.lane.b32.xlu1 %v2465_v54, %s3370_s28  ;;  %v2008_v7 = vpop.permute.xlu0 %2007 }
 0x38a   : > { %v2010_v9 = vpop.permute.xlu1 %2009 }
 0x38b   : > { %v2017_v39 = vsel %vm2011_vm3, %v2008_v7, %v2010_v9  ;;  %v2035_v2 = vadd.f32 %v2010_v9, %v1962_v46 }
 0x38c   : > { %v2034_v3 = vadd.f32 %v2017_v39, %v1961_v6 }
 0x38d   : > { %2578 = vrot.lane.b32.xlu0 %v2550_v48, %s3371_s29  ;;  %2500 = vrot.lane.b32.xlu1 %v2467_v37, %s3370_s28  ;;  %v2148_v56 = vpop.permute.xlu0 %2147 }
 0x38e   : > { %v2150_v20 = vpop.permute.xlu1 %2149 }
 0x38f   : > { %v2161_v27 = vsel %vm2157_vm0, %v2148_v56, %v2150_v20  ;;  %v5916_v42 = vadd.f32 %v2150_v20, %v2105_v15 }
 0x390   : > { %v2177_v31 = vadd.f32 %v2161_v27, %v2104_v28 }
 0x391   : > { %2502 = vrot.lane.b32.xlu0 %v2468_v36, %s3370_s28  ;;  %2416 = vrot.lane.b32.xlu1 %v2381_v60, %s6479_s17  ;;  %v5920_v47 = vpop.permute.xlu0 %2308  ;;  %s323_s17 = sand.u32 1, %s3312_s10  }
 0x392   : > { %v5922_v44 = vpop.permute.xlu1 %2310  ;;  %s3082_s24 = sshll.u32 %s323_s17, 3  ;;  %s3005_s22 = scalar_lea.sflag [#allocation3], %s323_s17 }
 0x393   : > { %s325_s26 = scalar_lea.vmem [#allocation2], %s3082_s24 }
 0x395   : > { %2498 = vrot.lane.b32.xlu0 %v2466_v51, %s3370_s28  ;;  %2584 = vrot.lane.b32.xlu1 %v2553_v52, %s3371_s29  ;;  %v2006_v33 = vpop.permute.xlu0 %2005 }
 0x396   : > { %v2146_v22 = vpop.permute.xlu1 %2145  ;;  %v2016_v17 = vsel %vm2011_vm3, %v2006_v33, %v2008_v7 }
 0x397   : > { %v2160_v55 = vsel %vm2157_vm0, %v2146_v22, %v2148_v56  ;;  %v2033_v50 = vadd.f32 %v2016_v17, %v1960_v19 }
 0x398   : > { %v2176_v63 = vadd.f32 %v2160_v55, %v2103_v13 }
 0x399   : > { %2588 = vrot.lane.b32.xlu0 %v2555_v30, %s3371_s29  ;;  %2590 = vrot.lane.b32.xlu1 %v2556_v21, %s3371_s29  ;;  %v2225_v5 = vpop.permute.xlu0 %2224 }
 0x39a   : > { %v2307_v49 = vpop.permute.xlu1 %2306  ;;  %v2245_v16 = vsel %vm2242_vm5, %v2223_v59, %v2225_v5 }
 0x39b   : > { %v2331_v43 = vsel %vm2330_vm6, %v2307_v49, %v5920_v47  ;;  %v2263_v58 = vadd.f32 %v2245_v16, %v5823_v26  ;;  %v2703_v26 = vld [vmem:[%s6103_s6 + $0x8] sm:$0xff] }
 0x39c   : > { %v5946_v46 = vadd.f32 %v2331_v43, %v2261_v29 }
 0x39d   : > { %2504 = vrot.lane.b32.xlu0 %v2469_v61, %s3370_s28  ;;  %2586 = vrot.lane.b32.xlu1 %v2554_v41, %s3371_s29  ;;  %v2081_v6 = vpop.permute.xlu0 %2080  ;;  %s3019_s28 = sshll.u32 %s325_s26, 4  ;;  %s3020_s28 = int_to_ptr.vmem [resolvable:$true] %s3019_s28 }
 0x39e   : > { %v2083_v35 = vpop.permute.xlu1 %2082  ;;  %p3267_p0 = scmp.lt.s32.totalorder %s3020_s28, %s3265_s23 }
 0x39f   : > { %v2090_v24 = vsel %vm2084_vm4, %v2081_v6, %v2083_v35  ;;  %v2108_v11 = vadd.f32 %v2083_v35, %v2035_v2 }
 0x3a0   : > { %v2107_v40 = vadd.f32 %v2090_v24, %v2034_v3 }
 0x3a1   : > { %2592 = vrot.lane.b32.xlu0 %v2557_v18, %s3371_s29  ;;  %2717 = vperm.xlu1 %3257, %v2704_v12   ;;  %v2229_v34 = vpop.permute.xlu0 %2228  ;;  %s3260_s29 = scalar_lea.vmem %s3020_s28, 128 }
 0x3a2   : > { %v2231_v15 = vpop.permute.xlu1 %2230  ;;  %p3261_p11 = scmp.ne.s32.totalorder %s3020_s28, %s3260_s29 }
 0x3a3   : > { %v2247_v28 = vsel %vm2242_vm5, %v2229_v34, %v2231_v15 }
 0x3a4   : > { %v5964_v59 = vadd.f32 %v2247_v28, %v2177_v31  ;;  %p3262_p12 = pnand %p3261_p11, %p3461_p5 }
 0x3a5   : > { %2712 = vperm.xlu0 %3254, %v2703_v26   ;;  %2707 = vperm.xlu1 %3257, %v2702_v14   ;;  %v2397_v1 = vpop.permute.xlu0 %2396 }
 0x3a6   : > { %v2399_v38 = vpop.permute.xlu1 %2398  ;;  %p3263_p13 = pneg %p3262_p12 }
 0x3a9   : > { %2918 = vperm.xlu1 %3257, %v2915_v57   ;;  %v2079_v45 = vpop.permute.xlu0 %2078 }
 0x3aa   : > { %v2227_v25 = vpop.permute.xlu1 %2226  ;;  %v2089_v19 = vsel %vm2084_vm4, %v2079_v45, %v2081_v6 }
 0x3ab   : > { %v2246_v62 = vsel %vm2242_vm5, %v2227_v25, %v2229_v34  ;;  %v2106_v10 = vadd.f32 %v2089_v19, %v2033_v50 }
 0x3ac   : > { %v2264_v8 = vadd.f32 %v2246_v62, %v2176_v63  ;;  %v2420_v63 = vsel %vm2418_vm7, %v2397_v1, %v2399_v38 }
 0x3ad   : > { %v2313_v54 = vpop.permute.xlu0 %2312 }
 0x3ae   : > { %v2395_v0 = vpop.permute.xlu1 %2394  ;;  %v2333_v53 = vsel %vm2330_vm6, %v5922_v44, %v2313_v54 }
 0x3af   : > { %v2351_v13 = vadd.f32 %v2333_v53, %v2263_v58 }
 0x3b1   : > { %v2154_v29 = vpop.permute.xlu0 %2153 }
 0x3b2   : > { %v2156_v7 = vpop.permute.xlu1 %2155 }
 0x3b3   : > { %v2163_v9 = vsel %vm2157_vm0, %v2154_v29, %v2156_v7  ;;  %v2181_v48 = vadd.f32 %v2156_v7, %v2108_v11 }
 0x3b4   : > { %v5974_v32 = vadd.f32 %v2163_v9, %v2107_v40 }
 0x3b6   : > { %v5976_v37 = vpop.permute.xlu0 %2316  ;;  %v5978_v39 = vpop.permute.xlu1 %2318 }
 0x3b7   : > { %v2335_v9 = vsel %vm2330_vm6, %v5976_v37, %v5978_v39 }
 0x3ba   : > { %v2487_v3 = vpop.permute.xlu1 %2486 }
 0x3bb   : > { %v2485_v2 = vpop.permute.xlu0 %2484 }
 0x3bc   : > { %v2508_v41 = vsel %vm2506_vm8, %v2485_v2, %v2487_v3 }
 0x3be   : > { %v2233_v20 = vpop.permute.xlu1 %2232 }
 0x3bf   : > { %v2152_v56 = vpop.permute.xlu0 %2151  ;;  %v2248_v60 = vsel %vm2242_vm5, %v2231_v15, %v2233_v20 }
 0x3c0   : > { %v2162_v36 = vsel %vm2157_vm0, %v2152_v56, %v2154_v29  ;;  %v2266_v31 = vadd.f32 %v2248_v60, %v5916_v42  ;;  %v2332_v42 = vsel %vm2330_vm6, %v5920_v47, %v5922_v44 }
 0x3c1   : > { %v2179_v27 = vadd.f32 %v2162_v36, %v2106_v10  ;;  %v2350_v5 = vadd.f32 %v2332_v42, %v5892_v23  ;;  %v2419_v23 = vsel %vm2418_vm7, %v2395_v0, %v2397_v1 }
 0x3c2   : > { %v2401_v52 = vpop.permute.xlu1 %2400  ;;  %v2437_v26 = vadd.f32 %v2419_v23, %v5946_v46 }
 0x3c3   : > { %v2315_v51 = vpop.permute.xlu0 %2314  ;;  %v2421_v22 = vsel %vm2418_vm7, %v2399_v38, %v2401_v52  ;;  %v2438_v16 = vadd.f32 %v2420_v63, %v2350_v5 }
 0x3c4   : > { %v2334_v33 = vsel %vm2330_vm6, %v2315_v51, %v5976_v37  ;;  %v2439_v30 = vadd.f32 %v2421_v22, %v2351_v13 }
 0x3c5   : > { %v5986_v4 = vadd.f32 %v2334_v33, %v2264_v8  ;;  %v2526_v43 = vadd.f32 %v2508_v41, %v2438_v16 }
 0x3c6   : > { %v5988_v17 = vpop.permute.xlu1 %2236 }
 0x3c7   : > { %v2483_v21 = vpop.permute.xlu0 %2482 }
 0x3c8   : > { %v2507_v12 = vsel %vm2506_vm8, %v2483_v21, %v2485_v2 }
 0x3c9   : > { %v2525_v34 = vadd.f32 %v2507_v12, %v2437_v26 }
 0x3cb   : > { %v5990_v55 = vpop.permute.xlu0 %2238  ;;  %v5992_v50 = vpop.permute.xlu1 %2404 }
 0x3cf   : > { %v5999_v49 = vpop.permute.xlu0 %2406  ;;  %v2573_v61 = vpop.permute.xlu1 %2572 }
 0x3d0   : > { %v2423_v20 = vsel %vm2418_vm7, %v5992_v50, %v5999_v49 }
 0x3d3   : > { %v2575_v58 = vpop.permute.xlu0 %2574  ;;  %v2235_v6 = vpop.permute.xlu1 %2234 }
 0x3d4   : > { %v2596_v35 = vsel %vm2594_vm9, %v2573_v61, %v2575_v58  ;;  %v2249_v47 = vsel %vm2242_vm5, %v2235_v6, %v5988_v17  ;;  %v2250_v6 = vsel %vm2242_vm5, %v5988_v17, %v5990_v55 }
 0x3d5   : > { %v2614_v44 = vadd.f32 %v2596_v35, %v2526_v43  ;;  %v6005_v18 = vadd.f32 %v2249_v47, %v2179_v27  ;;  %v6484_v27 = vmov 0.0  }
 0x3d7   : > { %v2321_v24 = vpop.permute.xlu0 %2320  ;;  %2800 = vmatprep.mubr.f32.mxu1 %v2614_v44  ;;  %v2403_v11 = vpop.permute.xlu1 %2402 }
 0x3d8   : > { %v2336_v40 = vsel %vm2330_vm6, %v5978_v39, %v2321_v24  ;;  %v2268_v24 = vadd.f32 %v2250_v6, %v5974_v32 }
 0x3d9   : > { %v2354_v14 = vadd.f32 %v2336_v40, %v2266_v31 }
 0x3db   : > { %v2489_v15 = vpop.permute.xlu0 %2488  ;;  %v2571_v28 = vpop.permute.xlu1 %2570 }
 0x3dc   : > { %v2595_v57 = vsel %vm2594_vm9, %v2571_v28, %v2573_v61  ;;  %v2509_v53 = vsel %vm2506_vm8, %v2487_v3, %v2489_v15 }
 0x3dd   : > { %v2613_v38 = vadd.f32 %v2595_v57, %v2525_v34  ;;  %v2527_v13 = vadd.f32 %v2509_v53, %v2439_v30 }
 0x3df   : > { %v2325_v45 = vpop.permute.xlu0 %2324  ;;  %2801 = vmatmul.mubr.f32.vlgmr.msra.gmra.mxu1 %v2613_v38  ;;  %v2327_v1 = vpop.permute.xlu1 %2326 }
 0x3e0   : > { %v2338_v44 = vsel %vm2330_vm6, %v2325_v45, %v2327_v1 }
 0x3e1   : > { %v2356_v26 = vadd.f32 %v2338_v44, %v2268_v24 }
 0x3e3   : > { %v2493_v25 = vpop.permute.xlu0 %2492  ;;  %v2495_v19 = vpop.permute.xlu1 %2494 }
 0x3e4   : > { %v2511_v60 = vsel %vm2506_vm8, %v2493_v25, %v2495_v19 }
 0x3e7   : > { %v2241_v62 = vpop.permute.xlu0 %2240  ;;  %v2323_v10 = vpop.permute.xlu1 %2322 }
 0x3e8   : > { %v2251_v8 = vsel %vm2242_vm5, %v5990_v55, %v2241_v62 }
 0x3e9   : > { %v2269_v54 = vadd.f32 %v2251_v8, %v2181_v48  ;;  %v2353_v48 = vadd.f32 %v2335_v9, %v5964_v59  ;;  %v2422_v59 = vsel %vm2418_vm7, %v2403_v11, %v5992_v50 }
 0x3ea   : > { %v2440_v5 = vadd.f32 %v2422_v59, %v5986_v4 }
 0x3eb   : > { %v2409_v0 = vpop.permute.xlu0 %2408  ;;  %v2491_v46 = vpop.permute.xlu1 %2490  ;;  %v2441_v31 = vadd.f32 %v2423_v20, %v2353_v48 }
 0x3ec   : > { %v2510_v63 = vsel %vm2506_vm8, %v2491_v46, %v2493_v25  ;;  %v2424_v50 = vsel %vm2418_vm7, %v5999_v49, %v2409_v0  ;;  %v2337_v49 = vsel %vm2330_vm6, %v2323_v10, %v2325_v45 }
 0x3ed   : > { %v2529_v37 = vadd.f32 %v2511_v60, %v2441_v31  ;;  %v2528_v61 = vadd.f32 %v2510_v63, %v2440_v5  ;;  %v2442_v11 = vadd.f32 %v2424_v50, %v2354_v14  ;;  %v2355_v32 = vadd.f32 %v2337_v49, %v6005_v18 }
 0x3ef   : > { %v2577_v29 = vpop.permute.xlu0 %2576  ;;  %v2413_v7 = vpop.permute.xlu1 %2412 }
 0x3f0   : > { %v2597_v2 = vsel %vm2594_vm9, %v2575_v58, %v2577_v29 }
 0x3f1   : > { %v2615_v56 = vadd.f32 %v2597_v2, %v2527_v13 }
 0x3f3   : > { %v2415_v36 = vpop.permute.xlu0 %2414  ;;  %3092 = vmatmul.mubr.msk.f32.vlgmr.msra.gmra.mxu0 %vm2720_vm10, %v2615_v56  ;;  %v2581_v3 = vpop.permute.xlu1 %2580 }
 0x3f4   : > { %2889 = vmatprep.mubr.f32.mxu0 %v6484_v27  ;;  %v2426_v40 = vsel %vm2418_vm7, %v2413_v7, %v2415_v36 }
 0x3f5   : > { %v2444_v57 = vadd.f32 %v2426_v40, %v2356_v26 }
 0x3f7   : > { %v2583_v39 = vpop.permute.xlu0 %2582  ;;  %v2329_v51 = vpop.permute.xlu1 %2328 }
 0x3f8   : > { %v2599_v52 = vsel %vm2594_vm9, %v2581_v3, %v2583_v39  ;;  %v2339_v33 = vsel %vm2330_vm6, %v2327_v1, %v2329_v51 }
 0x3f9   : > { %v2617_v22 = vadd.f32 %v2599_v52, %v2529_v37  ;;  %v2357_v30 = vadd.f32 %v2339_v33, %v2269_v54 }
 0x3fb   : > { %v2411_v21 = vpop.permute.xlu0 %2410  ;;  %2806 = vmatprep.mubr.f32.mxu1 %v2617_v22  ;;  %v2497_v42 = vpop.permute.xlu1 %2496 }
 0x3fc   : > { %v2512_v4 = vsel %vm2506_vm8, %v2495_v19, %v2497_v42  ;;  %v2425_v1 = vsel %vm2418_vm7, %v2411_v21, %v2413_v7 }
 0x3fd   : > { %v2530_v17 = vadd.f32 %v2512_v4, %v2442_v11  ;;  %v2443_v45 = vadd.f32 %v2425_v1, %v2355_v32  ;;  %v3259_v1 = vld [vmem:[%s3491_s16] sm:$0xff]  ;;  %s3266_s16 = scalar_lea.vmem %s3265_s23, 256 }
 0x3fe   : > { %p3268_p1 = scmp.lt.s32.totalorder %s3266_s16, %s3260_s29 }
 0x3ff   : > { %v2579_v41 = vpop.permute.xlu0 %2578  ;;  %v2501_v16 = vpop.permute.xlu1 %2500 }
 0x400   : > { %v2598_v43 = vsel %vm2594_vm9, %v2579_v41, %v2581_v3  ;;  %p3269_p2 = por %p3268_p1, %p3267_p0 }
 0x401   : > { %v2616_v58 = vadd.f32 %v2598_v43, %v2528_v61 }
 0x402   : > { %p3270_p3 = pnand %p3269_p2, %p3263_p13 }
 0x403   : > { %v2503_v35 = vpop.permute.xlu0 %2502  ;;  %2807 = vmatmul.mubr.f32.gmra.mxu1 %v2616_v58  ;;  %v2417_v47 = vpop.permute.xlu1 %2416 }
 0x404   : > { %v2427_v23 = vsel %vm2418_vm7, %v2415_v36, %v2417_v47  ;;  %v2514_v15 = vsel %vm2506_vm8, %v2501_v16, %v2503_v35 }
 0x405   : > { %v2445_v12 = vadd.f32 %v2427_v23, %v2357_v30  ;;  %v2532_v14 = vadd.f32 %v2514_v15, %v2444_v57 }
 0x407   : > { %v2499_v55 = vpop.permute.xlu0 %2498  ;;  %v2585_v34 = vpop.permute.xlu1 %2584 }
 0x408   : > { %v2600_v28 = vsel %vm2594_vm9, %v2583_v39, %v2585_v34  ;;  %v2513_v62 = vsel %vm2506_vm8, %v2499_v55, %v2501_v16  ;;  %v2914_v34 = vld [vmem:[%s6104_s7] sm:$0xf] }
 0x409   : > { %v2618_v38 = vadd.f32 %v2600_v28, %v2530_v17  ;;  %v2531_v54 = vadd.f32 %v2513_v62, %v2443_v45 }
 0x40b   : > { %v2589_v25 = vpop.permute.xlu0 %2588  ;;  %3093 = vmatmul.mubr.msk.f32.gmra.mxu0 %vm2720_vm10, %v2618_v38  ;;  %v2591_v19 = vpop.permute.xlu1 %2590 }
 0x40c   : > { %v2602_v8 = vsel %vm2594_vm9, %v2589_v25, %v2591_v19  ;;  %2895 = vmatprep.mubr.f32.mxu0 %v6484_v27 }
 0x40d   : > { %v2620_v10 = vadd.f32 %v2602_v8, %v2532_v14  ;;  %v6485_v14 = vld [vmem:[#allocation5_spill] sm:$0xff] }
 0x40f   : > { %v2505_v0 = vpop.permute.xlu0 %2504  ;;  %v2587_v46 = vpop.permute.xlu1 %2586  ;;  %2812 = vmatprep.mubr.f32.mxu1 %v2620_v10 }
 0x410   : > { %v2515_v53 = vsel %vm2506_vm8, %v2503_v35, %v2505_v0  ;;  %v2601_v18 = vsel %vm2594_vm9, %v2587_v46, %v2589_v25 }
 0x411   : > { %v2533_v13 = vadd.f32 %v2515_v53, %v2445_v12  ;;  %v2619_v29 = vadd.f32 %v2601_v18, %v2531_v54 }
 0x413   : > { %v2593_v7 = vpop.permute.xlu0 %2592  ;;  %2813 = vmatmul.mubr.f32.gmra.mxu1 %v2619_v29 }
 0x414   : > { %v2603_v9 = vsel %vm2594_vm9, %v2591_v19, %v2593_v7 }
 0x415   : > { %v2621_v2 = vadd.f32 %v2603_v9, %v2533_v13 }
 0x417   : > { %3094 = vmatmul.mubr.msk.f32.gmra.mxu0 %vm2720_vm10, %v2621_v2 }
 0x418   : > { %2989 = vmatprep.mubr.f32.mxu0 %v6484_v27 }
 0x41c   : > { %v2718_v60 = vpop.permute.xlu1 %2717 }
 0x420   : > { %v2713_v51 = vpop.permute.xlu0 %2712  ;;  %v2708_v22 = vpop.permute.xlu1 %2707 }
 0x424   : > { %v2919_v49 = vpop.permute.xlu1 %2918 }
 0x49f   : > { %v2802_v56 = vpop.f32.mrf.mxu1 }
 0x4a0   : > { %v2803_v41 = vadd.f32 %v2802_v56, %v2708_v22 }
 0x4a1   : > { %v2804_v20 = vpop.f32.mrf.mxu1 }
 0x4a2   : > { %v2805_v63 = vadd.f32 %v2804_v20, %v2708_v22 }
 0x4b3   : > { %v2885_v48 = vpop.f32.mrf.mxu0 }
 0x4b4   : > { %v2886_v50 = vadd.f32 %v2885_v48, %v2803_v41 }
 0x4b5   : > { %v2887_v3 = vpop.f32.mrf.mxu0 }
 0x4b6   : > { %v2888_v58 = vadd.f32 %v2887_v3, %v2805_v63  ;;  %v2902_v11 = vmax.f32 %v2886_v50, 0.0 }
 0x4b8   : > { %v2903_v23 = vmax.f32 %v2888_v58, 0.0  ;;  %v2908_v55 = vmin.f32 %v2902_v11, 6.0 }
 0x4ba   : > { %v2909_v17 = vmin.f32 %v2903_v23, 6.0 }
 0x4c3   : > { %v2808_v36 = vpop.f32.mrf.mxu1 }
 0x4c4   : > { %v2809_v21 = vadd.f32 %v2808_v36, %v2713_v51 }
 0x4c5   : > { %v2810_v31 = vpop.f32.mrf.mxu1 }
 0x4c6   : > { %v2811_v30 = vadd.f32 %v2810_v31, %v2713_v51 }
 0x4cb   : > { %v2891_v37 = vpop.f32.mrf.mxu0 }
 0x4cc   : > { %v2892_v16 = vadd.f32 %v2891_v37, %v2809_v21 }
 0x4cd   : > { %v2893_v52 = vpop.f32.mrf.mxu0 }
 0x4ce   : > { %v2894_v5 = vadd.f32 %v2893_v52, %v2811_v30  ;;  %v2904_v4 = vmax.f32 %v2892_v16, 0.0 }
 0x4d0   : > { %v2905_v47 = vmax.f32 %v2894_v5, 0.0  ;;  %v2910_v26 = vmin.f32 %v2904_v4, 6.0 }
 0x4d2   : > { %v2911_v40 = vmin.f32 %v2905_v47, 6.0 }
 0x4d3   : > { %v2814_v39 = vpop.f32.mrf.mxu1 }
 0x4d4   : > { %v2815_v59 = vadd.f32 %v2814_v39, %v2718_v60 }
 0x4d5   : > { %v2816_v33 = vpop.f32.mrf.mxu1 }
 0x4d6   : > { %v2817_v27 = vadd.f32 %v2816_v33, %v2718_v60 }
 0x4d7   : > { %v2897_v42 = vpop.f32.mrf.mxu0 }
 0x4d8   : > { %v2898_v61 = vadd.f32 %v2897_v42, %v2815_v59 }
 0x4d9   : > { %v2899_v43 = vpop.f32.mrf.mxu0 }
 0x4da   : > { %v2900_v6 = vadd.f32 %v2899_v43, %v2817_v27  ;;  %v2906_v35 = vmax.f32 %v2898_v61, 0.0 }
 0x4dc   : > { %v2907_v44 = vmax.f32 %v2900_v6, 0.0  ;;  %v2912_v12 = vmin.f32 %v2906_v35, 6.0 }
 0x4de   : > { %v2913_v24 = vmin.f32 %v2907_v44, 6.0 }
 0x4e0   : > { %2951 = vmatprep.subr.mxu0 %v2913_v24 }
 0x4e1   : > { %2952 = vmatpush1.msra.mxu0 %v2912_v12 }
 0x4e2   : > { %2953 = vmatprep.subr.mxu0 %v2911_v40 }
 0x4e3   : > { %2954 = vmatpush1.msra.mxu0 %v2910_v26 }
 0x4e4   : > { %2955 = vmatprep.subr.mxu0 %v2909_v17 }
 0x4e5   : > { %2956 = vmatpush1.msra.mxu0 %v2908_v55 }
 0x4e6   : > { %3095 = vmatmul.mubr.msk.f32.vlgmr.msra.gmra.mxu0 %vm2921_vm11, %v2914_v34 }
 0x5a6   : > { %v2991_v15 = vpop.f32.mrf.mxu0 }
 0x5a7   : > { %v2992_v28 = vadd.f32 %v2991_v15, %v2919_v49 }
 0x5a8   : > { %v2993_v57 = vpop.f32.mrf.mxu0 }
 0x5a9   : > { %v2994_v38 = vadd.f32 %v2993_v57, %v2919_v49  ;;  %v2997_v32 = vadd.f32 %v3259_v1, %v2992_v28 }
 0x5ab   : > { %v2998_v25 = vadd.f32 %v2994_v38, %v6485_v14 }
 0x5ad   : > { %v3001_v19 = vcombine.low %v2997_v32, %v2998_v25 }
 0x5af   : > { %3003 = vst [vmem:[%s325_s26] sm:$0xff] %v3001_v19 }
 0x5b0   : > { %3273 = shalt.err (!%p3270_p3)
}
 0x5b1   : > { %s3274_s24 = scalar_lea.hbm %s3017_s21, 128  ;;  %s3278_s26 = scalar_lea.hbm %s6106_s9, 256 }
 0x5b2   : > { %p3275_p4 = scmp.ne.s32.totalorder %s3017_s21, %s3274_s24  ;;  %p3279_p9 = scmp.lt.s32.totalorder %s3017_s21, %s6106_s9 }
 0x5b3   : > { %p3280_p10 = scmp.lt.s32.totalorder %s3278_s26, %s3274_s24 }
 0x5b4   : > { %p3276_p7 = pnand %p3275_p4, %p3461_p5 }
 0x5b5   : > { %p3281_p11 = por %p3280_p10, %p3279_p9 }
 0x5b6   : > { %p3277_p8 = pneg %p3276_p7 }
 0x5b8   : > { %p3282_p12 = pnand %p3281_p11, %p3277_p8 }
 0x5ba   : > { %3285 = shalt.err (!%p3282_p12)
}
 0x5bb   : > { %3103 = dma.vmem_to_hbm [thread:$0]  (%p3461_p5), %s3020_s28, 128, %s3017_s21, %s3005_s22  }
 0x5bc PF: > { %p3109_p13 = scmp.ge.s32.totalorder %s3320_s12, 2  ;;  %s3031_s29 = sand.u32 1, %s3308_s30  }
 0x5bd   : > { %s3032_s13 = scalar_lea.sflag [#allocation3], %s3031_s29 }
 0x5be   : > { %p3106_p0 = pnand %p3109_p13, %p3465_p6 }
 0x5c0   : > { %p3107_p1 = pneg %p3106_p0 }
 0x5c2   : > { %3303 = dma.done.wait (%p3107_p1), %s3032_s13, 128  }
 0x5c3   : > { %3305 = vsyncadd (%p3107_p1), %s3032_s13, 4294967168  ;;  %p19_p2 = scmp.ge.s32.totalorder %s3448_s15, 4   ;;  %s6486_s30 = smov %s3312_s10 }
 0x5c4   : > { %s6487_s10 = smov %s3316_s11  ;;  %s6488_s11 = smov %s3459_s18 }
 0x5c5   : > { %s6489_s12 = smov %s3448_s15  ;;  %21 = sbr.rel (!%p19_p2) target bundleno = 3 (0x3), region = 91 }
 0x5ca   :  { %3037 = vsyncpa [#allocation3], 1 }
 0x5cb   :  { %3039 = vsyncpa [#allocation3 + $0x1], 1 }

</bundles_post_ra>
